<compile_context>
chip_gen: v5e
topology: v5e:2x2
jax: 0.10.0
libtpu: 0.0.40
codegen_flags: <defaults>
</compile_context>

<pallas_src>
import functools

import jax
import jax.numpy as jnp
from jax.experimental import pallas as pl
from jax.experimental.pallas import tpu as pltpu

NEG_SLOPE = 1.0   # nn.LeakyReLU(True): negative_slope == 1.0 -> identity
BN_EPS = 1e-5     # nn.BatchNorm2d default eps
KH = KW = 3       # 3x3 convs (the 1x1 conv2 is fused as a plain matmul)


# ---------------------------------------------------------------------------
# Pallas kernels (one grid step == one image; channels-minor layout in VMEM)
# ---------------------------------------------------------------------------
def _conv1_conv2_kernel(x_ref, w1_ref, w2_ref, h_ref, *, stride, OH, OW):
    """conv1 (3x3/stride, no bias) -> [LeakyReLU slope=1: identity]
       -> conv2 (1x1, no bias, fused epilogue matmul) -> bf16 h.

    x_ref : (stride*stride, HPs, WPs, Cin)  phase-decomposed padded input, bf16
    w1_ref: (9, Cin, Cmid) bf16;  w2_ref: (Cmid, Cout) bf16
    h_ref : (1, OH*OW, Cout) bf16
    """
    s = stride
    acc = None
    for i in range(KH):
        for j in range(KW):
            ph = (i % s) * s + (j % s)
            win = x_ref[ph, i // s:i // s + OH, j // s:j // s + OW, :]
            win = win.reshape(OH * OW, win.shape[-1])
            part = jnp.dot(win, w1_ref[i * KW + j],
                           preferred_element_type=jnp.float32)
            acc = part if acc is None else acc + part
    # LeakyReLU(True) has slope 1.0 -> identity (skipped).
    h = jnp.dot(acc.astype(jnp.bfloat16), w2_ref[...],
                preferred_element_type=jnp.float32)
    # LeakyReLU(True): identity (skipped).
    h_ref[0] = h.astype(h_ref.dtype)


def _conv3_shortcutconv_stats_kernel(h_ref, w3_ref, x_ref, ws_ref, bs_ref,
                                     s_ref, sum_ref, ssq_ref,
                                     *, stride, OH, OW):
    """conv3 (3x3/1, no bias) on h  +  shortcut conv (3x3/stride, bias) on x,
       residual add, [LeakyReLU slope=1: identity]; emits the pre-BN tensor and
       per-image per-channel sum / sum-of-squares partials (BN batch stats)."""
    # conv3 on spatially padded h
    acc = None
    for i in range(KH):
        for j in range(KW):
            win = h_ref[0, i:i + OH, j:j + OW, :]
            win = win.reshape(OH * OW, win.shape[-1])
            part = jnp.dot(win, w3_ref[i * KW + j],
                           preferred_element_type=jnp.float32)
            acc = part if acc is None else acc + part
    # shortcut conv on phase-decomposed x
    s = stride
    sc = None
    for i in range(KH):
        for j in range(KW):
            ph = (i % s) * s + (j % s)
            win = x_ref[ph, i // s:i // s + OH, j // s:j // s + OW, :]
            win = win.reshape(OH * OW, win.shape[-1])
            part = jnp.dot(win, ws_ref[i * KW + j],
                           preferred_element_type=jnp.float32)
            sc = part if sc is None else sc + part
    out = acc + sc + bs_ref[...]                # (OH*OW, C) f32; (1, C) bias bcast
    # LeakyReLU(True): identity (skipped).
    s_ref[0] = out.astype(s_ref.dtype)
    sum_ref[0] = jnp.sum(out, axis=0, keepdims=True)
    ssq_ref[0] = jnp.sum(out * out, axis=0, keepdims=True)


def _conv3_identity_stats_kernel(h_ref, w3_ref, res_ref,
                                 s_ref, sum_ref, ssq_ref, *, OH, OW):
    """Same as above but with an identity shortcut."""
    acc = None
    for i in range(KH):
        for j in range(KW):
            win = h_ref[0, i:i + OH, j:j + OW, :]
            win = win.reshape(OH * OW, win.shape[-1])
            part = jnp.dot(win, w3_ref[i * KW + j],
                           preferred_element_type=jnp.float32)
            acc = part if acc is None else acc + part
    out = acc + res_ref[0].astype(jnp.float32)
    # LeakyReLU(True): identity (skipped).
    s_ref[0] = out.astype(s_ref.dtype)
    sum_ref[0] = jnp.sum(out, axis=0, keepdims=True)
    ssq_ref[0] = jnp.sum(out * out, axis=0, keepdims=True)


def _affine_kernel(s_ref, scale_ref, shift_ref, o_ref):
    """BN apply (lane-dense per-channel affine): out = s*scale + shift."""
    o_ref[...] = (s_ref[...] * scale_ref[...] + shift_ref[...]).astype(o_ref.dtype)


# ---------------------------------------------------------------------------
# Wrappers
# ---------------------------------------------------------------------------
def _phase_decompose(x_nhwc, stride, pad):
    """Pad spatially and split into stride*stride phases so that every conv tap
    becomes a contiguous (unstrided) window inside the kernel.
    Returns (N*stride*stride, HPs, WPs, C)."""
    N, H, W, C = x_nhwc.shape
    s = stride
    HP, WP = H + 2 * pad, W + 2 * pad
    HPs, WPs = -(-HP // s), -(-WP // s)
    xp = jnp.pad(x_nhwc, ((0, 0),
                          (pad, HPs * s - H - pad),
                          (pad, WPs * s - W - pad),
                          (0, 0)))
    xp = xp.reshape(N, HPs, s, WPs, s, C)
    xp = jnp.transpose(xp, (0, 2, 4, 1, 3, 5)).reshape(N * s * s, HPs, WPs, C)
    return xp


def _conv1_conv2(x_ph, w1_taps, w2_mat, stride, OH, OW):
    ss = stride * stride
    N = x_ph.shape[0] // ss
    _, HPs, WPs, Cin = x_ph.shape
    Cmid = w1_taps.shape[2]
    Cout = w2_mat.shape[1]
    kernel = functools.partial(_conv1_conv2_kernel, stride=stride, OH=OH, OW=OW)
    return pl.pallas_call(
        kernel,
        out_shape=jax.ShapeDtypeStruct((N, OH * OW, Cout), jnp.bfloat16),
        grid=(N,),
        in_specs=[
            pl.BlockSpec((ss, HPs, WPs, Cin), lambda n: (n, 0, 0, 0)),
            pl.BlockSpec((KH * KW, Cin, Cmid), lambda n: (0, 0, 0)),
            pl.BlockSpec((Cmid, Cout), lambda n: (0, 0)),
        ],
        out_specs=pl.BlockSpec((1, OH * OW, Cout), lambda n: (n, 0, 0)),
        compiler_params=pltpu.CompilerParams(dimension_semantics=("parallel",)),
    )(x_ph, w1_taps, w2_mat)


def _conv3_shortcut_stats(h_pad, w3_taps, x_ph, ws_taps, bs, stride, OH, OW):
    N, HP2, WP2, C = h_pad.shape
    ss = stride * stride
    _, HPs, WPs, Cin = x_ph.shape
    kernel = functools.partial(_conv3_shortcutconv_stats_kernel,
                               stride=stride, OH=OH, OW=OW)
    return pl.pallas_call(
        kernel,
        out_shape=(
            jax.ShapeDtypeStruct((N, OH * OW, C), jnp.float32),
            jax.ShapeDtypeStruct((N, 1, C), jnp.float32),
            jax.ShapeDtypeStruct((N, 1, C), jnp.float32),
        ),
        grid=(N,),
        in_specs=[
            pl.BlockSpec((1, HP2, WP2, C), lambda n: (n, 0, 0, 0)),
            pl.BlockSpec((KH * KW, C, C), lambda n: (0, 0, 0)),
            pl.BlockSpec((ss, HPs, WPs, Cin), lambda n: (n, 0, 0, 0)),
            pl.BlockSpec((KH * KW, Cin, C), lambda n: (0, 0, 0)),
            pl.BlockSpec((1, C), lambda n: (0, 0)),
        ],
        out_specs=(
            pl.BlockSpec((1, OH * OW, C), lambda n: (n, 0, 0)),
            pl.BlockSpec((1, 1, C), lambda n: (n, 0, 0)),
            pl.BlockSpec((1, 1, C), lambda n: (n, 0, 0)),
        ),
        compiler_params=pltpu.CompilerParams(dimension_semantics=("parallel",)),
    )(h_pad, w3_taps, x_ph, ws_taps, bs)


def _conv3_identity_stats(h_pad, w3_taps, res, OH, OW):
    N, HP2, WP2, C = h_pad.shape
    kernel = functools.partial(_conv3_identity_stats_kernel, OH=OH, OW=OW)
    return pl.pallas_call(
        kernel,
        out_shape=(
            jax.ShapeDtypeStruct((N, OH * OW, C), jnp.float32),
            jax.ShapeDtypeStruct((N, 1, C), jnp.float32),
            jax.ShapeDtypeStruct((N, 1, C), jnp.float32),
        ),
        grid=(N,),
        in_specs=[
            pl.BlockSpec((1, HP2, WP2, C), lambda n: (n, 0, 0, 0)),
            pl.BlockSpec((KH * KW, C, C), lambda n: (0, 0, 0)),
            pl.BlockSpec((1, OH * OW, C), lambda n: (n, 0, 0)),
        ],
        out_specs=(
            pl.BlockSpec((1, OH * OW, C), lambda n: (n, 0, 0)),
            pl.BlockSpec((1, 1, C), lambda n: (n, 0, 0)),
            pl.BlockSpec((1, 1, C), lambda n: (n, 0, 0)),
        ),
        compiler_params=pltpu.CompilerParams(dimension_semantics=("parallel",)),
    )(h_pad, w3_taps, res)


def _channel_affine(s_mc, scale, shift):
    """Per-channel affine (BN apply) computed on a lane-dense reshaped view."""
    M, C = s_mc.shape
    total = M * C
    if total % 128 == 0 and 128 % C == 0:
        L = 128
        R = total // L
        s2 = s_mc.reshape(R, L)
        scale2 = jnp.tile(scale, L // C).reshape(1, L)
        shift2 = jnp.tile(shift, L // C).reshape(1, L)
    else:                                     # fallback: channels on lanes
        R, L = M, C
        s2 = s_mc
        scale2 = scale.reshape(1, C)
        shift2 = shift.reshape(1, C)
    TR = next((t for t in (1024, 512, 256, 128, 64, 32, 16, 8)
               if t <= R and R % t == 0), R)
    out = pl.pallas_call(
        _affine_kernel,
        out_shape=jax.ShapeDtypeStruct((R, L), jnp.float32),
        grid=(R // TR,),
        in_specs=[
            pl.BlockSpec((TR, L), lambda i: (i, 0)),
            pl.BlockSpec((1, L), lambda i: (0, 0)),
            pl.BlockSpec((1, L), lambda i: (0, 0)),
        ],
        out_specs=pl.BlockSpec((TR, L), lambda i: (i, 0)),
        compiler_params=pltpu.CompilerParams(dimension_semantics=("parallel",)),
    )(s2, scale2, shift2)
    return out.reshape(M, C)


# ---------------------------------------------------------------------------
# Parameters
# ---------------------------------------------------------------------------
def init_resblock_params(key, in_channel, out_channel, stride):
    mid = in_channel * stride
    k1, k2, k3, k4, k5 = jax.random.split(key, 5)
    p = {
        "w1": jax.random.normal(k1, (mid, in_channel, 3, 3), jnp.float32) * 0.1,
        "w2": jax.random.normal(k2, (out_channel, mid, 1, 1), jnp.float32) * 0.1,
        "w3": jax.random.normal(k3, (out_channel, out_channel, 3, 3), jnp.float32) * 0.1,
        "gamma": jnp.ones((out_channel,), jnp.float32),   # BatchNorm2d weight init
        "beta": jnp.zeros((out_channel,), jnp.float32),   # BatchNorm2d bias init
    }
    if not (stride == 1 and in_channel == out_channel):
        # shortcut conv has bias=True (PyTorch Conv2d default)
        p["ws"] = jax.random.normal(k4, (out_channel, in_channel, 3, 3), jnp.float32) * 0.1
        p["bs"] = jax.random.normal(k5, (out_channel,), jnp.float32) * 0.1
    return p


def _oihw_to_taps(w):
    """(Cout, Cin, KH, KW) -> (KH*KW, Cin, Cout) bf16 tap matrices."""
    Cout, Cin, kh, kw = w.shape
    return jnp.transpose(w, (2, 3, 1, 0)).reshape(kh * kw, Cin, Cout).astype(jnp.bfloat16)


def prepare_resblock_params(params):
    """One-time weight layout / dtype preparation (hoisted out of the forward)."""
    prepped = {
        "w1": _oihw_to_taps(params["w1"]),
        "w2": params["w2"][:, :, 0, 0].T.astype(jnp.bfloat16),     # (Cmid, Cout)
        "w3": _oihw_to_taps(params["w3"]),
        "gamma": params["gamma"].astype(jnp.float32),
        "beta": params["beta"].astype(jnp.float32),
    }
    if "ws" in params:
        prepped["ws"] = _oihw_to_taps(params["ws"])
        prepped["bs"] = params["bs"].reshape(1, -1).astype(jnp.float32)
    return prepped


# ---------------------------------------------------------------------------
# ResBlock forward
# ---------------------------------------------------------------------------
def resblock_forward(x_nchw, prepped, in_channel, out_channel, stride):
    N, _, H, W = x_nchw.shape
    C = out_channel
    x = jnp.transpose(x_nchw, (0, 2, 3, 1))                    # NCHW -> NHWC
    OH = (H + 2 - KH) // stride + 1
    OW = (W + 2 - KW) // stride + 1

    # Phase-decomposed bf16 input shared by conv1 and the shortcut conv.
    x_ph = _phase_decompose(x.astype(jnp.bfloat16), stride, 1)

    # conv1 (3x3/stride) -> [LReLU] -> conv2 (1x1, fused) -> [LReLU]
    h = _conv1_conv2(x_ph, prepped["w1"], prepped["w2"], stride, OH, OW)

    # Spatial zero-pad of h for the 3x3/1 conv3.
    h_pad = jnp.pad(h.reshape(N, OH, OW, C), ((0, 0), (1, 1), (1, 1), (0, 0)))

    if stride == 1 and in_channel == out_channel:
        res = x.reshape(N, H * W, C).astype(jnp.float32)
        s, sums, ssq = _conv3_identity_stats(h_pad, prepped["w3"], res, OH, OW)
    else:
        s, sums, ssq = _conv3_shortcut_stats(h_pad, prepped["w3"], x_ph,
                                             prepped["ws"], prepped["bs"],
                                             stride, OH, OW)

    # BatchNorm2d (training-mode batch statistics, biased variance).
    # TODO(synk): running-mean/var buffer updates are not modeled.
    M = N * OH * OW
    mean = jnp.sum(sums, axis=(0, 1)) / M
    var = jnp.maximum(jnp.sum(ssq, axis=(0, 1)) / M - mean * mean, 0.0)
    inv = jax.lax.rsqrt(var + BN_EPS)
    scale = prepped["gamma"] * inv
    shift = prepped["beta"] - mean * scale

    out = _channel_affine(s.reshape(M, C), scale, shift)       # (M, C) f32
    out = out.reshape(N, OH, OW, C)
    return jnp.transpose(out, (0, 3, 1, 2))                    # NHWC -> NCHW


if __name__ == "__main__":
    key = jax.random.PRNGKey(0)
    kx, kp = jax.random.split(key)

    in_channel, out_channel, stride = 4, 8, 2
    x = jax.random.normal(kx, (2, in_channel, 16, 16), jnp.float32)   # NCHW like PyTorch
    params = init_resblock_params(kp, in_channel, out_channel, stride)
    prepped = prepare_resblock_params(params)   # hoisted layout/dtype prep

    fwd = jax.jit(functools.partial(resblock_forward,
                                    in_channel=in_channel,
                                    out_channel=out_channel,
                                    stride=stride))
    out = fwd(x, prepped)
    out = jax.block_until_ready(out)

    assert out.shape == (2, out_channel, 16 // stride, 16 // stride), out.shape
    assert bool(jnp.all(jnp.isfinite(out)))
    print("KERNEL_OK")
</pallas_src>

<mosaic_0001>
module attributes {stable_mosaic.version = 11 : i64} {
  func.func @_conv1_conv2_kernel(%arg0: i32, %arg1: memref<4x9x9x4xbf16, #tpu.memory_space<vmem>>, %arg2: memref<9x4x8xbf16, #tpu.memory_space<vmem>>, %arg3: memref<8x8xbf16, #tpu.memory_space<vmem>>, %arg4: memref<1x64x8xbf16, #tpu.memory_space<vmem>>) attributes {dimension_semantics = [#tpu.dimension_semantics<parallel>], iteration_bounds = array<i64: 2>, scalar_prefetch = 0 : i64, scratch_operands = 0 : i64, tpu.core_type = #tpu.core_type<tc>, window_params = [{transform_indices = @transform_0, window_bounds = array<i64: 4, 9, 9, 4>}, {pipeline_mode = #tpu.pipeline_mode<synchronous>, transform_indices = @transform_1, window_bounds = array<i64: 9, 4, 8>}, {pipeline_mode = #tpu.pipeline_mode<synchronous>, transform_indices = @transform_2, window_bounds = array<i64: 8, 8>}, {transform_indices = @transform_3, window_bounds = array<i64: 1, 64, 8>}]} {
    %c0 = arith.constant 0 : index
    %c0_0 = arith.constant 0 : index
    %c0_1 = arith.constant 0 : index
    %c0_2 = arith.constant 0 : index
    %0 = vector.load %arg1[%c0, %c0_0, %c0_1, %c0_2] : memref<4x9x9x4xbf16, #tpu.memory_space<vmem>>, vector<1x8x8x4xbf16>
    %1 = vector.shape_cast %0 : vector<1x8x8x4xbf16> to vector<8x8x4xbf16>
    %2 = vector.shape_cast %1 : vector<8x8x4xbf16> to vector<64x4xbf16>
    %c0_3 = arith.constant 0 : index
    %c0_4 = arith.constant 0 : index
    %c0_5 = arith.constant 0 : index
    %3 = vector.load %arg2[%c0_3, %c0_4, %c0_5] : memref<9x4x8xbf16, #tpu.memory_space<vmem>>, vector<1x4x8xbf16>
    %4 = vector.shape_cast %3 : vector<1x4x8xbf16> to vector<4x8xbf16>
    %cst = arith.constant dense<0.000000e+00> : vector<64x8xf32>
    %5 = tpu.matmul %2, %4, %cst {dimension_numbers = #tpu.dot_dimension_numbers<[1], [0], [0], [1], [0, 0, 1, 1], [], []>} : vector<64x4xbf16>, vector<4x8xbf16>, vector<64x8xf32> -> vector<64x8xf32>
    %c1 = arith.constant 1 : index
    %c0_6 = arith.constant 0 : index
    %c0_7 = arith.constant 0 : index
    %c0_8 = arith.constant 0 : index
    %6 = vector.load %arg1[%c1, %c0_6, %c0_7, %c0_8] : memref<4x9x9x4xbf16, #tpu.memory_space<vmem>>, vector<1x8x8x4xbf16>
    %7 = vector.shape_cast %6 : vector<1x8x8x4xbf16> to vector<8x8x4xbf16>
    %8 = vector.shape_cast %7 : vector<8x8x4xbf16> to vector<64x4xbf16>
    %c1_9 = arith.constant 1 : index
    %c0_10 = arith.constant 0 : index
    %c0_11 = arith.constant 0 : index
    %9 = vector.load %arg2[%c1_9, %c0_10, %c0_11] : memref<9x4x8xbf16, #tpu.memory_space<vmem>>, vector<1x4x8xbf16>
    %10 = vector.shape_cast %9 : vector<1x4x8xbf16> to vector<4x8xbf16>
    %cst_12 = arith.constant dense<0.000000e+00> : vector<64x8xf32>
    %11 = tpu.matmul %8, %10, %cst_12 {dimension_numbers = #tpu.dot_dimension_numbers<[1], [0], [0], [1], [0, 0, 1, 1], [], []>} : vector<64x4xbf16>, vector<4x8xbf16>, vector<64x8xf32> -> vector<64x8xf32>
    %12 = arith.addf %5, %11 : vector<64x8xf32>
    %c0_13 = arith.constant 0 : index
    %c0_14 = arith.constant 0 : index
    %c1_15 = arith.constant 1 : index
    %c0_16 = arith.constant 0 : index
    %13 = vector.load %arg1[%c0_13, %c0_14, %c1_15, %c0_16] : memref<4x9x9x4xbf16, #tpu.memory_space<vmem>>, vector<1x8x8x4xbf16>
    %14 = vector.shape_cast %13 : vector<1x8x8x4xbf16> to vector<8x8x4xbf16>
    %15 = vector.shape_cast %14 : vector<8x8x4xbf16> to vector<64x4xbf16>
    %c2 = arith.constant 2 : index
    %c0_17 = arith.constant 0 : index
    %c0_18 = arith.constant 0 : index
    %16 = vector.load %arg2[%c2, %c0_17, %c0_18] : memref<9x4x8xbf16, #tpu.memory_space<vmem>>, vector<1x4x8xbf16>
    %17 = vector.shape_cast %16 : vector<1x4x8xbf16> to vector<4x8xbf16>
    %cst_19 = arith.constant dense<0.000000e+00> : vector<64x8xf32>
    %18 = tpu.matmul %15, %17, %cst_19 {dimension_numbers = #tpu.dot_dimension_numbers<[1], [0], [0], [1], [0, 0, 1, 1], [], []>} : vector<64x4xbf16>, vector<4x8xbf16>, vector<64x8xf32> -> vector<64x8xf32>
    %19 = arith.addf %12, %18 : vector<64x8xf32>
    %c2_20 = arith.constant 2 : index
    %c0_21 = arith.constant 0 : index
    %c0_22 = arith.constant 0 : index
    %c0_23 = arith.constant 0 : index
    %20 = vector.load %arg1[%c2_20, %c0_21, %c0_22, %c0_23] : memref<4x9x9x4xbf16, #tpu.memory_space<vmem>>, vector<1x8x8x4xbf16>
    %21 = vector.shape_cast %20 : vector<1x8x8x4xbf16> to vector<8x8x4xbf16>
    %22 = vector.shape_cast %21 : vector<8x8x4xbf16> to vector<64x4xbf16>
    %c3 = arith.constant 3 : index
    %c0_24 = arith.constant 0 : index
    %c0_25 = arith.constant 0 : index
    %23 = vector.load %arg2[%c3, %c0_24, %c0_25] : memref<9x4x8xbf16, #tpu.memory_space<vmem>>, vector<1x4x8xbf16>
    %24 = vector.shape_cast %23 : vector<1x4x8xbf16> to vector<4x8xbf16>
    %cst_26 = arith.constant dense<0.000000e+00> : vector<64x8xf32>
    %25 = tpu.matmul %22, %24, %cst_26 {dimension_numbers = #tpu.dot_dimension_numbers<[1], [0], [0], [1], [0, 0, 1, 1], [], []>} : vector<64x4xbf16>, vector<4x8xbf16>, vector<64x8xf32> -> vector<64x8xf32>
    %26 = arith.addf %19, %25 : vector<64x8xf32>
    %c3_27 = arith.constant 3 : index
    %c0_28 = arith.constant 0 : index
    %c0_29 = arith.constant 0 : index
    %c0_30 = arith.constant 0 : index
    %27 = vector.load %arg1[%c3_27, %c0_28, %c0_29, %c0_30] : memref<4x9x9x4xbf16, #tpu.memory_space<vmem>>, vector<1x8x8x4xbf16>
    %28 = vector.shape_cast %27 : vector<1x8x8x4xbf16> to vector<8x8x4xbf16>
    %29 = vector.shape_cast %28 : vector<8x8x4xbf16> to vector<64x4xbf16>
    %c4 = arith.constant 4 : index
    %c0_31 = arith.constant 0 : index
    %c0_32 = arith.constant 0 : index
    %30 = vector.load %arg2[%c4, %c0_31, %c0_32] : memref<9x4x8xbf16, #tpu.memory_space<vmem>>, vector<1x4x8xbf16>
    %31 = vector.shape_cast %30 : vector<1x4x8xbf16> to vector<4x8xbf16>
    %cst_33 = arith.constant dense<0.000000e+00> : vector<64x8xf32>
    %32 = tpu.matmul %29, %31, %cst_33 {dimension_numbers = #tpu.dot_dimension_numbers<[1], [0], [0], [1], [0, 0, 1, 1], [], []>} : vector<64x4xbf16>, vector<4x8xbf16>, vector<64x8xf32> -> vector<64x8xf32>
    %33 = arith.addf %26, %32 : vector<64x8xf32>
    %c2_34 = arith.constant 2 : index
    %c0_35 = arith.constant 0 : index
    %c1_36 = arith.constant 1 : index
    %c0_37 = arith.constant 0 : index
    %34 = vector.load %arg1[%c2_34, %c0_35, %c1_36, %c0_37] : memref<4x9x9x4xbf16, #tpu.memory_space<vmem>>, vector<1x8x8x4xbf16>
    %35 = vector.shape_cast %34 : vector<1x8x8x4xbf16> to vector<8x8x4xbf16>
    %36 = vector.shape_cast %35 : vector<8x8x4xbf16> to vector<64x4xbf16>
    %c5 = arith.constant 5 : index
    %c0_38 = arith.constant 0 : index
    %c0_39 = arith.constant 0 : index
    %37 = vector.load %arg2[%c5, %c0_38, %c0_39] : memref<9x4x8xbf16, #tpu.memory_space<vmem>>, vector<1x4x8xbf16>
    %38 = vector.shape_cast %37 : vector<1x4x8xbf16> to vector<4x8xbf16>
    %cst_40 = arith.constant dense<0.000000e+00> : vector<64x8xf32>
    %39 = tpu.matmul %36, %38, %cst_40 {dimension_numbers = #tpu.dot_dimension_numbers<[1], [0], [0], [1], [0, 0, 1, 1], [], []>} : vector<64x4xbf16>, vector<4x8xbf16>, vector<64x8xf32> -> vector<64x8xf32>
    %40 = arith.addf %33, %39 : vector<64x8xf32>
    %c0_41 = arith.constant 0 : index
    %c1_42 = arith.constant 1 : index
    %c0_43 = arith.constant 0 : index
    %c0_44 = arith.constant 0 : index
    %41 = vector.load %arg1[%c0_41, %c1_42, %c0_43, %c0_44] : memref<4x9x9x4xbf16, #tpu.memory_space<vmem>>, vector<1x8x8x4xbf16>
    %42 = vector.shape_cast %41 : vector<1x8x8x4xbf16> to vector<8x8x4xbf16>
    %43 = vector.shape_cast %42 : vector<8x8x4xbf16> to vector<64x4xbf16>
    %c6 = arith.constant 6 : index
    %c0_45 = arith.constant 0 : index
    %c0_46 = arith.constant 0 : index
    %44 = vector.load %arg2[%c6, %c0_45, %c0_46] : memref<9x4x8xbf16, #tpu.memory_space<vmem>>, vector<1x4x8xbf16>
    %45 = vector.shape_cast %44 : vector<1x4x8xbf16> to vector<4x8xbf16>
    %cst_47 = arith.constant dense<0.000000e+00> : vector<64x8xf32>
    %46 = tpu.matmul %43, %45, %cst_47 {dimension_numbers = #tpu.dot_dimension_numbers<[1], [0], [0], [1], [0, 0, 1, 1], [], []>} : vector<64x4xbf16>, vector<4x8xbf16>, vector<64x8xf32> -> vector<64x8xf32>
    %47 = arith.addf %40, %46 : vector<64x8xf32>
    %c1_48 = arith.constant 1 : index
    %c1_49 = arith.constant 1 : index
    %c0_50 = arith.constant 0 : index
    %c0_51 = arith.constant 0 : index
    %48 = vector.load %arg1[%c1_48, %c1_49, %c0_50, %c0_51] : memref<4x9x9x4xbf16, #tpu.memory_space<vmem>>, vector<1x8x8x4xbf16>
    %49 = vector.shape_cast %48 : vector<1x8x8x4xbf16> to vector<8x8x4xbf16>
    %50 = vector.shape_cast %49 : vector<8x8x4xbf16> to vector<64x4xbf16>
    %c7 = arith.constant 7 : index
    %c0_52 = arith.constant 0 : index
    %c0_53 = arith.constant 0 : index
    %51 = vector.load %arg2[%c7, %c0_52, %c0_53] : memref<9x4x8xbf16, #tpu.memory_space<vmem>>, vector<1x4x8xbf16>
    %52 = vector.shape_cast %51 : vector<1x4x8xbf16> to vector<4x8xbf16>
    %cst_54 = arith.constant dense<0.000000e+00> : vector<64x8xf32>
    %53 = tpu.matmul %50, %52, %cst_54 {dimension_numbers = #tpu.dot_dimension_numbers<[1], [0], [0], [1], [0, 0, 1, 1], [], []>} : vector<64x4xbf16>, vector<4x8xbf16>, vector<64x8xf32> -> vector<64x8xf32>
    %54 = arith.addf %47, %53 : vector<64x8xf32>
    %c0_55 = arith.constant 0 : index
    %c1_56 = arith.constant 1 : index
    %c1_57 = arith.constant 1 : index
    %c0_58 = arith.constant 0 : index
    %55 = vector.load %arg1[%c0_55, %c1_56, %c1_57, %c0_58] : memref<4x9x9x4xbf16, #tpu.memory_space<vmem>>, vector<1x8x8x4xbf16>
    %56 = vector.shape_cast %55 : vector<1x8x8x4xbf16> to vector<8x8x4xbf16>
    %57 = vector.shape_cast %56 : vector<8x8x4xbf16> to vector<64x4xbf16>
    %c8 = arith.constant 8 : index
    %c0_59 = arith.constant 0 : index
    %c0_60 = arith.constant 0 : index
    %58 = vector.load %arg2[%c8, %c0_59, %c0_60] : memref<9x4x8xbf16, #tpu.memory_space<vmem>>, vector<1x4x8xbf16>
    %59 = vector.shape_cast %58 : vector<1x4x8xbf16> to vector<4x8xbf16>
    %cst_61 = arith.constant dense<0.000000e+00> : vector<64x8xf32>
    %60 = tpu.matmul %57, %59, %cst_61 {dimension_numbers = #tpu.dot_dimension_numbers<[1], [0], [0], [1], [0, 0, 1, 1], [], []>} : vector<64x4xbf16>, vector<4x8xbf16>, vector<64x8xf32> -> vector<64x8xf32>
    %61 = arith.addf %54, %60 : vector<64x8xf32>
    %62 = arith.truncf %61 : vector<64x8xf32> to vector<64x8xbf16>
    %c0_62 = arith.constant 0 : index
    %c0_63 = arith.constant 0 : index
    %63 = vector.load %arg3[%c0_62, %c0_63] : memref<8x8xbf16, #tpu.memory_space<vmem>>, vector<8x8xbf16>
    %cst_64 = arith.constant dense<0.000000e+00> : vector<64x8xf32>
    %64 = tpu.matmul %62, %63, %cst_64 {dimension_numbers = #tpu.dot_dimension_numbers<[1], [0], [0], [1], [0, 0, 1, 1], [], []>} : vector<64x8xbf16>, vector<8x8xbf16>, vector<64x8xf32> -> vector<64x8xf32>
    %65 = arith.truncf %64 : vector<64x8xf32> to vector<64x8xbf16>
    %c0_65 = arith.constant 0 : index
    %c0_66 = arith.constant 0 : index
    %c0_67 = arith.constant 0 : index
    %66 = vector.load %arg4[%c0_65, %c0_66, %c0_67] : memref<1x64x8xbf16, #tpu.memory_space<vmem>>, vector<1x64x8xbf16>
    %67 = vector.shape_cast %66 : vector<1x64x8xbf16> to vector<64x8xbf16>
    %68 = vector.shape_cast %65 : vector<64x8xbf16> to vector<1x64x8xbf16>
    tpu.vector_store %arg4[%c0_65, %c0_66, %c0_67], %68 {strides = array<i32>} : memref<1x64x8xbf16, #tpu.memory_space<vmem>>, vector<1x64x8xbf16>,
    return
  }
  func.func @transform_0(%arg0: i32) -> (i32, i32, i32, i32) {
    %c0_i32 = arith.constant 0 : i32
    %c0_i32_0 = arith.constant 0 : i32
    %c0_i32_1 = arith.constant 0 : i32
    %c0_i32_2 = arith.constant 0 : i32
    return %arg0, %c0_i32, %c0_i32_0, %c0_i32_1 : i32, i32, i32, i32
  }
  func.func @transform_1(%arg0: i32) -> (i32, i32, i32) {
    %c0_i32 = arith.constant 0 : i32
    %c0_i32_0 = arith.constant 0 : i32
    %c0_i32_1 = arith.constant 0 : i32
    %c0_i32_2 = arith.constant 0 : i32
    return %c0_i32, %c0_i32_0, %c0_i32_1 : i32, i32, i32
  }
  func.func @transform_2(%arg0: i32) -> (i32, i32) {
    %c0_i32 = arith.constant 0 : i32
    %c0_i32_0 = arith.constant 0 : i32
    %c0_i32_1 = arith.constant 0 : i32
    return %c0_i32, %c0_i32_0 : i32, i32
  }
  func.func @transform_3(%arg0: i32) -> (i32, i32, i32) {
    %c0_i32 = arith.constant 0 : i32
    %c0_i32_0 = arith.constant 0 : i32
    %c0_i32_1 = arith.constant 0 : i32
    return %arg0, %c0_i32, %c0_i32_0 : i32, i32, i32
  }
}

module attributes {stable_mosaic.version = 11 : i64} {
  func.func @_conv3_shortcutconv_stats_kernel(%arg0: i32, %arg1: memref<1x10x10x8xbf16, #tpu.memory_space<vmem>>, %arg2: memref<9x8x8xbf16, #tpu.memory_space<vmem>>, %arg3: memref<4x9x9x4xbf16, #tpu.memory_space<vmem>>, %arg4: memref<9x4x8xbf16, #tpu.memory_space<vmem>>, %arg5: memref<1x8xf32, #tpu.memory_space<vmem>>, %arg6: memref<1x64x8xf32, #tpu.memory_space<vmem>>, %arg7: memref<1x1x8xf32, #tpu.memory_space<vmem>>, %arg8: memref<1x1x8xf32, #tpu.memory_space<vmem>>) attributes {dimension_semantics = [#tpu.dimension_semantics<parallel>], iteration_bounds = array<i64: 2>, scalar_prefetch = 0 : i64, scratch_operands = 0 : i64, tpu.core_type = #tpu.core_type<tc>, window_params = [{transform_indices = @transform_0, window_bounds = array<i64: 1, 10, 10, 8>}, {pipeline_mode = #tpu.pipeline_mode<synchronous>, transform_indices = @transform_1, window_bounds = array<i64: 9, 8, 8>}, {transform_indices = @transform_2, window_bounds = array<i64: 4, 9, 9, 4>}, {pipeline_mode = #tpu.pipeline_mode<synchronous>, transform_indices = @transform_3, window_bounds = array<i64: 9, 4, 8>}, {pipeline_mode = #tpu.pipeline_mode<synchronous>, transform_indices = @transform_4, window_bounds = array<i64: 1, 8>}, {transform_indices = @transform_5, window_bounds = array<i64: 1, 64, 8>}, {transform_indices = @transform_6, window_bounds = array<i64: 1, 1, 8>}, {transform_indices = @transform_7, window_bounds = array<i64: 1, 1, 8>}]} {
    %c0 = arith.constant 0 : index
    %c0_0 = arith.constant 0 : index
    %c0_1 = arith.constant 0 : index
    %c0_2 = arith.constant 0 : index
    %0 = vector.load %arg1[%c0, %c0_0, %c0_1, %c0_2] : memref<1x10x10x8xbf16, #tpu.memory_space<vmem>>, vector<1x8x8x8xbf16>
    %1 = vector.shape_cast %0 : vector<1x8x8x8xbf16> to vector<8x8x8xbf16>
    %2 = vector.shape_cast %1 : vector<8x8x8xbf16> to vector<64x8xbf16>
    %c0_3 = arith.constant 0 : index
    %c0_4 = arith.constant 0 : index
    %c0_5 = arith.constant 0 : index
    %3 = vector.load %arg2[%c0_3, %c0_4, %c0_5] : memref<9x8x8xbf16, #tpu.memory_space<vmem>>, vector<1x8x8xbf16>
    %4 = vector.shape_cast %3 : vector<1x8x8xbf16> to vector<8x8xbf16>
    %cst = arith.constant dense<0.000000e+00> : vector<64x8xf32>
    %5 = tpu.matmul %2, %4, %cst {dimension_numbers = #tpu.dot_dimension_numbers<[1], [0], [0], [1], [0, 0, 1, 1], [], []>} : vector<64x8xbf16>, vector<8x8xbf16>, vector<64x8xf32> -> vector<64x8xf32>
    %c0_6 = arith.constant 0 : index
    %c0_7 = arith.constant 0 : index
    %c1 = arith.constant 1 : index
    %c0_8 = arith.constant 0 : index
    %6 = vector.load %arg1[%c0_6, %c0_7, %c1, %c0_8] : memref<1x10x10x8xbf16, #tpu.memory_space<vmem>>, vector<1x8x8x8xbf16>
    %7 = vector.shape_cast %6 : vector<1x8x8x8xbf16> to vector<8x8x8xbf16>
    %8 = vector.shape_cast %7 : vector<8x8x8xbf16> to vector<64x8xbf16>
    %c1_9 = arith.constant 1 : index
    %c0_10 = arith.constant 0 : index
    %c0_11 = arith.constant 0 : index
    %9 = vector.load %arg2[%c1_9, %c0_10, %c0_11] : memref<9x8x8xbf16, #tpu.memory_space<vmem>>, vector<1x8x8xbf16>
    %10 = vector.shape_cast %9 : vector<1x8x8xbf16> to vector<8x8xbf16>
    %cst_12 = arith.constant dense<0.000000e+00> : vector<64x8xf32>
    %11 = tpu.matmul %8, %10, %cst_12 {dimension_numbers = #tpu.dot_dimension_numbers<[1], [0], [0], [1], [0, 0, 1, 1], [], []>} : vector<64x8xbf16>, vector<8x8xbf16>, vector<64x8xf32> -> vector<64x8xf32>
    %12 = arith.addf %5, %11 : vector<64x8xf32>
    %c0_13 = arith.constant 0 : index
    %c0_14 = arith.constant 0 : index
    %c2 = arith.constant 2 : index
    %c0_15 = arith.constant 0 : index
    %13 = vector.load %arg1[%c0_13, %c0_14, %c2, %c0_15] : memref<1x10x10x8xbf16, #tpu.memory_space<vmem>>, vector<1x8x8x8xbf16>
    %14 = vector.shape_cast %13 : vector<1x8x8x8xbf16> to vector<8x8x8xbf16>
    %15 = vector.shape_cast %14 : vector<8x8x8xbf16> to vector<64x8xbf16>
    %c2_16 = arith.constant 2 : index
    %c0_17 = arith.constant 0 : index
    %c0_18 = arith.constant 0 : index
    %16 = vector.load %arg2[%c2_16, %c0_17, %c0_18] : memref<9x8x8xbf16, #tpu.memory_space<vmem>>, vector<1x8x8xbf16>
    %17 = vector.shape_cast %16 : vector<1x8x8xbf16> to vector<8x8xbf16>
    %cst_19 = arith.constant dense<0.000000e+00> : vector<64x8xf32>
    %18 = tpu.matmul %15, %17, %cst_19 {dimension_numbers = #tpu.dot_dimension_numbers<[1], [0], [0], [1], [0, 0, 1, 1], [], []>} : vector<64x8xbf16>, vector<8x8xbf16>, vector<64x8xf32> -> vector<64x8xf32>
    %19 = arith.addf %12, %18 : vector<64x8xf32>
    %c0_20 = arith.constant 0 : index
    %c1_21 = arith.constant 1 : index
    %c0_22 = arith.constant 0 : index
    %c0_23 = arith.constant 0 : index
    %20 = vector.load %arg1[%c0_20, %c1_21, %c0_22, %c0_23] : memref<1x10x10x8xbf16, #tpu.memory_space<vmem>>, vector<1x8x8x8xbf16>
    %21 = vector.shape_cast %20 : vector<1x8x8x8xbf16> to vector<8x8x8xbf16>
    %22 = vector.shape_cast %21 : vector<8x8x8xbf16> to vector<64x8xbf16>
    %c3 = arith.constant 3 : index
    %c0_24 = arith.constant 0 : index
    %c0_25 = arith.constant 0 : index
    %23 = vector.load %arg2[%c3, %c0_24, %c0_25] : memref<9x8x8xbf16, #tpu.memory_space<vmem>>, vector<1x8x8xbf16>
    %24 = vector.shape_cast %23 : vector<1x8x8xbf16> to vector<8x8xbf16>
    %cst_26 = arith.constant dense<0.000000e+00> : vector<64x8xf32>
    %25 = tpu.matmul %22, %24, %cst_26 {dimension_numbers = #tpu.dot_dimension_numbers<[1], [0], [0], [1], [0, 0, 1, 1], [], []>} : vector<64x8xbf16>, vector<8x8xbf16>, vector<64x8xf32> -> vector<64x8xf32>
    %26 = arith.addf %19, %25 : vector<64x8xf32>
    %c0_27 = arith.constant 0 : index
    %c1_28 = arith.constant 1 : index
    %c1_29 = arith.constant 1 : index
    %c0_30 = arith.constant 0 : index
    %27 = vector.load %arg1[%c0_27, %c1_28, %c1_29, %c0_30] : memref<1x10x10x8xbf16, #tpu.memory_space<vmem>>, vector<1x8x8x8xbf16>
    %28 = vector.shape_cast %27 : vector<1x8x8x8xbf16> to vector<8x8x8xbf16>
    %29 = vector.shape_cast %28 : vector<8x8x8xbf16> to vector<64x8xbf16>
    %c4 = arith.constant 4 : index
    %c0_31 = arith.constant 0 : index
    %c0_32 = arith.constant 0 : index
    %30 = vector.load %arg2[%c4, %c0_31, %c0_32] : memref<9x8x8xbf16, #tpu.memory_space<vmem>>, vector<1x8x8xbf16>
    %31 = vector.shape_cast %30 : vector<1x8x8xbf16> to vector<8x8xbf16>
    %cst_33 = arith.constant dense<0.000000e+00> : vector<64x8xf32>
    %32 = tpu.matmul %29, %31, %cst_33 {dimension_numbers = #tpu.dot_dimension_numbers<[1], [0], [0], [1], [0, 0, 1, 1], [], []>} : vector<64x8xbf16>, vector<8x8xbf16>, vector<64x8xf32> -> vector<64x8xf32>
    %33 = arith.addf %26, %32 : vector<64x8xf32>
    %c0_34 = arith.constant 0 : index
    %c1_35 = arith.constant 1 : index
    %c2_36 = arith.constant 2 : index
    %c0_37 = arith.constant 0 : index
    %34 = vector.load %arg1[%c0_34, %c1_35, %c2_36, %c0_37] : memref<1x10x10x8xbf16, #tpu.memory_space<vmem>>, vector<1x8x8x8xbf16>
    %35 = vector.shape_cast %34 : vector<1x8x8x8xbf16> to vector<8x8x8xbf16>
    %36 = vector.shape_cast %35 : vector<8x8x8xbf16> to vector<64x8xbf16>
    %c5 = arith.constant 5 : index
    %c0_38 = arith.constant 0 : index
    %c0_39 = arith.constant 0 : index
    %37 = vector.load %arg2[%c5, %c0_38, %c0_39] : memref<9x8x8xbf16, #tpu.memory_space<vmem>>, vector<1x8x8xbf16>
    %38 = vector.shape_cast %37 : vector<1x8x8xbf16> to vector<8x8xbf16>
    %cst_40 = arith.constant dense<0.000000e+00> : vector<64x8xf32>
    %39 = tpu.matmul %36, %38, %cst_40 {dimension_numbers = #tpu.dot_dimension_numbers<[1], [0], [0], [1], [0, 0, 1, 1], [], []>} : vector<64x8xbf16>, vector<8x8xbf16>, vector<64x8xf32> -> vector<64x8xf32>
    %40 = arith.addf %33, %39 : vector<64x8xf32>
    %c0_41 = arith.constant 0 : index
    %c2_42 = arith.constant 2 : index
    %c0_43 = arith.constant 0 : index
    %c0_44 = arith.constant 0 : index
    %41 = vector.load %arg1[%c0_41, %c2_42, %c0_43, %c0_44] : memref<1x10x10x8xbf16, #tpu.memory_space<vmem>>, vector<1x8x8x8xbf16>
    %42 = vector.shape_cast %41 : vector<1x8x8x8xbf16> to vector<8x8x8xbf16>
    %43 = vector.shape_cast %42 : vector<8x8x8xbf16> to vector<64x8xbf16>
    %c6 = arith.constant 6 : index
    %c0_45 = arith.constant 0 : index
    %c0_46 = arith.constant 0 : index
    %44 = vector.load %arg2[%c6, %c0_45, %c0_46] : memref<9x8x8xbf16, #tpu.memory_space<vmem>>, vector<1x8x8xbf16>
    %45 = vector.shape_cast %44 : vector<1x8x8xbf16> to vector<8x8xbf16>
    %cst_47 = arith.constant dense<0.000000e+00> : vector<64x8xf32>
    %46 = tpu.matmul %43, %45, %cst_47 {dimension_numbers = #tpu.dot_dimension_numbers<[1], [0], [0], [1], [0, 0, 1, 1], [], []>} : vector<64x8xbf16>, vector<8x8xbf16>, vector<64x8xf32> -> vector<64x8xf32>
    %47 = arith.addf %40, %46 : vector<64x8xf32>
    %c0_48 = arith.constant 0 : index
    %c2_49 = arith.constant 2 : index
    %c1_50 = arith.constant 1 : index
    %c0_51 = arith.constant 0 : index
    %48 = vector.load %arg1[%c0_48, %c2_49, %c1_50, %c0_51] : memref<1x10x10x8xbf16, #tpu.memory_space<vmem>>, vector<1x8x8x8xbf16>
    %49 = vector.shape_cast %48 : vector<1x8x8x8xbf16> to vector<8x8x8xbf16>
    %50 = vector.shape_cast %49 : vector<8x8x8xbf16> to vector<64x8xbf16>
    %c7 = arith.constant 7 : index
    %c0_52 = arith.constant 0 : index
    %c0_53 = arith.constant 0 : index
    %51 = vector.load %arg2[%c7, %c0_52, %c0_53] : memref<9x8x8xbf16, #tpu.memory_space<vmem>>, vector<1x8x8xbf16>
    %52 = vector.shape_cast %51 : vector<1x8x8xbf16> to vector<8x8xbf16>
    %cst_54 = arith.constant dense<0.000000e+00> : vector<64x8xf32>
    %53 = tpu.matmul %50, %52, %cst_54 {dimension_numbers = #tpu.dot_dimension_numbers<[1], [0], [0], [1], [0, 0, 1, 1], [], []>} : vector<64x8xbf16>, vector<8x8xbf16>, vector<64x8xf32> -> vector<64x8xf32>
    %54 = arith.addf %47, %53 : vector<64x8xf32>
    %c0_55 = arith.constant 0 : index
    %c2_56 = arith.constant 2 : index
    %c2_57 = arith.constant 2 : index
    %c0_58 = arith.constant 0 : index
    %55 = vector.load %arg1[%c0_55, %c2_56, %c2_57, %c0_58] : memref<1x10x10x8xbf16, #tpu.memory_space<vmem>>, vector<1x8x8x8xbf16>
    %56 = vector.shape_cast %55 : vector<1x8x8x8xbf16> to vector<8x8x8xbf16>
    %57 = vector.shape_cast %56 : vector<8x8x8xbf16> to vector<64x8xbf16>
    %c8 = arith.constant 8 : index
    %c0_59 = arith.constant 0 : index
    %c0_60 = arith.constant 0 : index
    %58 = vector.load %arg2[%c8, %c0_59, %c0_60] : memref<9x8x8xbf16, #tpu.memory_space<vmem>>, vector<1x8x8xbf16>
    %59 = vector.shape_cast %58 : vector<1x8x8xbf16> to vector<8x8xbf16>
    %cst_61 = arith.constant dense<0.000000e+00> : vector<64x8xf32>
    %60 = tpu.matmul %57, %59, %cst_61 {dimension_numbers = #tpu.dot_dimension_numbers<[1], [0], [0], [1], [0, 0, 1, 1], [], []>} : vector<64x8xbf16>, vector<8x8xbf16>, vector<64x8xf32> -> vector<64x8xf32>
    %61 = arith.addf %54, %60 : vector<64x8xf32>
    %c0_62 = arith.constant 0 : index
    %c0_63 = arith.constant 0 : index
    %c0_64 = arith.constant 0 : index
    %c0_65 = arith.constant 0 : index
    %62 = vector.load %arg3[%c0_62, %c0_63, %c0_64, %c0_65] : memref<4x9x9x4xbf16, #tpu.memory_space<vmem>>, vector<1x8x8x4xbf16>
    %63 = vector.shape_cast %62 : vector<1x8x8x4xbf16> to vector<8x8x4xbf16>
    %64 = vector.shape_cast %63 : vector<8x8x4xbf16> to vector<64x4xbf16>
    %c0_66 = arith.constant 0 : index
    %c0_67 = arith.constant 0 : index
    %c0_68 = arith.constant 0 : index
    %65 = vector.load %arg4[%c0_66, %c0_67, %c0_68] : memref<9x4x8xbf16, #tpu.memory_space<vmem>>, vector<1x4x8xbf16>
    %66 = vector.shape_cast %65 : vector<1x4x8xbf16> to vector<4x8xbf16>
    %cst_69 = arith.constant dense<0.000000e+00> : vector<64x8xf32>
    %67 = tpu.matmul %64, %66, %cst_69 {dimension_numbers = #tpu.dot_dimension_numbers<[1], [0], [0], [1], [0, 0, 1, 1], [], []>} : vector<64x4xbf16>, vector<4x8xbf16>, vector<64x8xf32> -> vector<64x8xf32>
    %c1_70 = arith.constant 1 : index
    %c0_71 = arith.constant 0 : index
    %c0_72 = arith.constant 0 : index
    %c0_73 = arith.constant 0 : index
    %68 = vector.load %arg3[%c1_70, %c0_71, %c0_72, %c0_73] : memref<4x9x9x4xbf16, #tpu.memory_space<vmem>>, vector<1x8x8x4xbf16>
    %69 = vector.shape_cast %68 : vector<1x8x8x4xbf16> to vector<8x8x4xbf16>
    %70 = vector.shape_cast %69 : vector<8x8x4xbf16> to vector<64x4xbf16>
    %c1_74 = arith.constant 1 : index
    %c0_75 = arith.constant 0 : index
    %c0_76 = arith.constant 0 : index
    %71 = vector.load %arg4[%c1_74, %c0_75, %c0_76] : memref<9x4x8xbf16, #tpu.memory_space<vmem>>, vector<1x4x8xbf16>
    %72 = vector.shape_cast %71 : vector<1x4x8xbf16> to vector<4x8xbf16>
    %cst_77 = arith.constant dense<0.000000e+00> : vector<64x8xf32>
    %73 = tpu.matmul %70, %72, %cst_77 {dimension_numbers = #tpu.dot_dimension_numbers<[1], [0], [0], [1], [0, 0, 1, 1], [], []>} : vector<64x4xbf16>, vector<4x8xbf16>, vector<64x8xf32> -> vector<64x8xf32>
    %74 = arith.addf %67, %73 : vector<64x8xf32>
    %c0_78 = arith.constant 0 : index
    %c0_79 = arith.constant 0 : index
    %c1_80 = arith.constant 1 : index
    %c0_81 = arith.constant 0 : index
    %75 = vector.load %arg3[%c0_78, %c0_79, %c1_80, %c0_81] : memref<4x9x9x4xbf16, #tpu.memory_space<vmem>>, vector<1x8x8x4xbf16>
    %76 = vector.shape_cast %75 : vector<1x8x8x4xbf16> to vector<8x8x4xbf16>
    %77 = vector.shape_cast %76 : vector<8x8x4xbf16> to vector<64x4xbf16>
    %c2_82 = arith.constant 2 : index
    %c0_83 = arith.constant 0 : index
    %c0_84 = arith.constant 0 : index
    %78 = vector.load %arg4[%c2_82, %c0_83, %c0_84] : memref<9x4x8xbf16, #tpu.memory_space<vmem>>, vector<1x4x8xbf16>
    %79 = vector.shape_cast %78 : vector<1x4x8xbf16> to vector<4x8xbf16>
    %cst_85 = arith.constant dense<0.000000e+00> : vector<64x8xf32>
    %80 = tpu.matmul %77, %79, %cst_85 {dimension_numbers = #tpu.dot_dimension_numbers<[1], [0], [0], [1], [0, 0, 1, 1], [], []>} : vector<64x4xbf16>, vector<4x8xbf16>, vector<64x8xf32> -> vector<64x8xf32>
    %81 = arith.addf %74, %80 : vector<64x8xf32>
    %c2_86 = arith.constant 2 : index
    %c0_87 = arith.constant 0 : index
    %c0_88 = arith.constant 0 : index
    %c0_89 = arith.constant 0 : index
    %82 = vector.load %arg3[%c2_86, %c0_87, %c0_88, %c0_89] : memref<4x9x9x4xbf16, #tpu.memory_space<vmem>>, vector<1x8x8x4xbf16>
    %83 = vector.shape_cast %82 : vector<1x8x8x4xbf16> to vector<8x8x4xbf16>
    %84 = vector.shape_cast %83 : vector<8x8x4xbf16> to vector<64x4xbf16>
    %c3_90 = arith.constant 3 : index
    %c0_91 = arith.constant 0 : index
    %c0_92 = arith.constant 0 : index
    %85 = vector.load %arg4[%c3_90, %c0_91, %c0_92] : memref<9x4x8xbf16, #tpu.memory_space<vmem>>, vector<1x4x8xbf16>
    %86 = vector.shape_cast %85 : vector<1x4x8xbf16> to vector<4x8xbf16>
    %cst_93 = arith.constant dense<0.000000e+00> : vector<64x8xf32>
    %87 = tpu.matmul %84, %86, %cst_93 {dimension_numbers = #tpu.dot_dimension_numbers<[1], [0], [0], [1], [0, 0, 1, 1], [], []>} : vector<64x4xbf16>, vector<4x8xbf16>, vector<64x8xf32> -> vector<64x8xf32>
    %88 = arith.addf %81, %87 : vector<64x8xf32>
    %c3_94 = arith.constant 3 : index
    %c0_95 = arith.constant 0 : index
    %c0_96 = arith.constant 0 : index
    %c0_97 = arith.constant 0 : index
    %89 = vector.load %arg3[%c3_94, %c0_95, %c0_96, %c0_97] : memref<4x9x9x4xbf16, #tpu.memory_space<vmem>>, vector<1x8x8x4xbf16>
    %90 = vector.shape_cast %89 : vector<1x8x8x4xbf16> to vector<8x8x4xbf16>
    %91 = vector.shape_cast %90 : vector<8x8x4xbf16> to vector<64x4xbf16>
    %c4_98 = arith.constant 4 : index
    %c0_99 = arith.constant 0 : index
    %c0_100 = arith.constant 0 : index
    %92 = vector.load %arg4[%c4_98, %c0_99, %c0_100] : memref<9x4x8xbf16, #tpu.memory_space<vmem>>, vector<1x4x8xbf16>
    %93 = vector.shape_cast %92 : vector<1x4x8xbf16> to vector<4x8xbf16>
    %cst_101 = arith.constant dense<0.000000e+00> : vector<64x8xf32>
    %94 = tpu.matmul %91, %93, %cst_101 {dimension_numbers = #tpu.dot_dimension_numbers<[1], [0], [0], [1], [0, 0, 1, 1], [], []>} : vector<64x4xbf16>, vector<4x8xbf16>, vector<64x8xf32> -> vector<64x8xf32>
    %95 = arith.addf %88, %94 : vector<64x8xf32>
    %c2_102 = arith.constant 2 : index
    %c0_103 = arith.constant 0 : index
    %c1_104 = arith.constant 1 : index
    %c0_105 = arith.constant 0 : index
    %96 = vector.load %arg3[%c2_102, %c0_103, %c1_104, %c0_105] : memref<4x9x9x4xbf16, #tpu.memory_space<vmem>>, vector<1x8x8x4xbf16>
    %97 = vector.shape_cast %96 : vector<1x8x8x4xbf16> to vector<8x8x4xbf16>
    %98 = vector.shape_cast %97 : vector<8x8x4xbf16> to vector<64x4xbf16>
    %c5_106 = arith.constant 5 : index
    %c0_107 = arith.constant 0 : index
    %c0_108 = arith.constant 0 : index
    %99 = vector.load %arg4[%c5_106, %c0_107, %c0_108] : memref<9x4x8xbf16, #tpu.memory_space<vmem>>, vector<1x4x8xbf16>
    %100 = vector.shape_cast %99 : vector<1x4x8xbf16> to vector<4x8xbf16>
    %cst_109 = arith.constant dense<0.000000e+00> : vector<64x8xf32>
    %101 = tpu.matmul %98, %100, %cst_109 {dimension_numbers = #tpu.dot_dimension_numbers<[1], [0], [0], [1], [0, 0, 1, 1], [], []>} : vector<64x4xbf16>, vector<4x8xbf16>, vector<64x8xf32> -> vector<64x8xf32>
    %102 = arith.addf %95, %101 : vector<64x8xf32>
    %c0_110 = arith.constant 0 : index
    %c1_111 = arith.constant 1 : index
    %c0_112 = arith.constant 0 : index
    %c0_113 = arith.constant 0 : index
    %103 = vector.load %arg3[%c0_110, %c1_111, %c0_112, %c0_113] : memref<4x9x9x4xbf16, #tpu.memory_space<vmem>>, vector<1x8x8x4xbf16>
    %104 = vector.shape_cast %103 : vector<1x8x8x4xbf16> to vector<8x8x4xbf16>
    %105 = vector.shape_cast %104 : vector<8x8x4xbf16> to vector<64x4xbf16>
    %c6_114 = arith.constant 6 : index
    %c0_115 = arith.constant 0 : index
    %c0_116 = arith.constant 0 : index
    %106 = vector.load %arg4[%c6_114, %c0_115, %c0_116] : memref<9x4x8xbf16, #tpu.memory_space<vmem>>, vector<1x4x8xbf16>
    %107 = vector.shape_cast %106 : vector<1x4x8xbf16> to vector<4x8xbf16>
    %cst_117 = arith.constant dense<0.000000e+00> : vector<64x8xf32>
    %108 = tpu.matmul %105, %107, %cst_117 {dimension_numbers = #tpu.dot_dimension_numbers<[1], [0], [0], [1], [0, 0, 1, 1], [], []>} : vector<64x4xbf16>, vector<4x8xbf16>, vector<64x8xf32> -> vector<64x8xf32>
    %109 = arith.addf %102, %108 : vector<64x8xf32>
    %c1_118 = arith.constant 1 : index
    %c1_119 = arith.constant 1 : index
    %c0_120 = arith.constant 0 : index
    %c0_121 = arith.constant 0 : index
    %110 = vector.load %arg3[%c1_118, %c1_119, %c0_120, %c0_121] : memref<4x9x9x4xbf16, #tpu.memory_space<vmem>>, vector<1x8x8x4xbf16>
    %111 = vector.shape_cast %110 : vector<1x8x8x4xbf16> to vector<8x8x4xbf16>
    %112 = vector.shape_cast %111 : vector<8x8x4xbf16> to vector<64x4xbf16>
    %c7_122 = arith.constant 7 : index
    %c0_123 = arith.constant 0 : index
    %c0_124 = arith.constant 0 : index
    %113 = vector.load %arg4[%c7_122, %c0_123, %c0_124] : memref<9x4x8xbf16, #tpu.memory_space<vmem>>, vector<1x4x8xbf16>
    %114 = vector.shape_cast %113 : vector<1x4x8xbf16> to vector<4x8xbf16>
    %cst_125 = arith.constant dense<0.000000e+00> : vector<64x8xf32>
    %115 = tpu.matmul %112, %114, %cst_125 {dimension_numbers = #tpu.dot_dimension_numbers<[1], [0], [0], [1], [0, 0, 1, 1], [], []>} : vector<64x4xbf16>, vector<4x8xbf16>, vector<64x8xf32> -> vector<64x8xf32>
    %116 = arith.addf %109, %115 : vector<64x8xf32>
    %c0_126 = arith.constant 0 : index
    %c1_127 = arith.constant 1 : index
    %c1_128 = arith.constant 1 : index
    %c0_129 = arith.constant 0 : index
    %117 = vector.load %arg3[%c0_126, %c1_127, %c1_128, %c0_129] : memref<4x9x9x4xbf16, #tpu.memory_space<vmem>>, vector<1x8x8x4xbf16>
    %118 = vector.shape_cast %117 : vector<1x8x8x4xbf16> to vector<8x8x4xbf16>
    %119 = vector.shape_cast %118 : vector<8x8x4xbf16> to vector<64x4xbf16>
    %c8_130 = arith.constant 8 : index
    %c0_131 = arith.constant 0 : index
    %c0_132 = arith.constant 0 : index
    %120 = vector.load %arg4[%c8_130, %c0_131, %c0_132] : memref<9x4x8xbf16, #tpu.memory_space<vmem>>, vector<1x4x8xbf16>
    %121 = vector.shape_cast %120 : vector<1x4x8xbf16> to vector<4x8xbf16>
    %cst_133 = arith.constant dense<0.000000e+00> : vector<64x8xf32>
    %122 = tpu.matmul %119, %121, %cst_133 {dimension_numbers = #tpu.dot_dimension_numbers<[1], [0], [0], [1], [0, 0, 1, 1], [], []>} : vector<64x4xbf16>, vector<4x8xbf16>, vector<64x8xf32> -> vector<64x8xf32>
    %123 = arith.addf %116, %122 : vector<64x8xf32>
    %124 = arith.addf %61, %123 : vector<64x8xf32>
    %c0_134 = arith.constant 0 : index
    %c0_135 = arith.constant 0 : index
    %125 = vector.load %arg5[%c0_134, %c0_135] : memref<1x8xf32, #tpu.memory_space<vmem>>, vector<1x8xf32>
    %126 = vector.broadcast %125 : vector<1x8xf32> to vector<64x8xf32>
    %127 = arith.addf %124, %126 : vector<64x8xf32>
    %c0_136 = arith.constant 0 : index
    %c0_137 = arith.constant 0 : index
    %c0_138 = arith.constant 0 : index
    %128 = vector.load %arg6[%c0_136, %c0_137, %c0_138] : memref<1x64x8xf32, #tpu.memory_space<vmem>>, vector<1x64x8xf32>
    %129 = vector.shape_cast %128 : vector<1x64x8xf32> to vector<64x8xf32>
    %130 = vector.shape_cast %127 : vector<64x8xf32> to vector<1x64x8xf32>
    tpu.vector_store %arg6[%c0_136, %c0_137, %c0_138], %130 {strides = array<i32>} : memref<1x64x8xf32, #tpu.memory_space<vmem>>, vector<1x64x8xf32>,
    %cst_139 = arith.constant dense<0.000000e+00> : vector<8xf32>
    %131 = vector.multi_reduction <add>, %127, %cst_139 [0] : vector<64x8xf32> to vector<8xf32>
    %132 = vector.shape_cast %131 : vector<8xf32> to vector<1x8xf32>
    %c0_140 = arith.constant 0 : index
    %c0_141 = arith.constant 0 : index
    %c0_142 = arith.constant 0 : index
    %133 = vector.load %arg7[%c0_140, %c0_141, %c0_142] : memref<1x1x8xf32, #tpu.memory_space<vmem>>, vector<1x1x8xf32>
    %134 = vector.shape_cast %133 : vector<1x1x8xf32> to vector<1x8xf32>
    %135 = vector.shape_cast %132 : vector<1x8xf32> to vector<1x1x8xf32>
    tpu.vector_store %arg7[%c0_140, %c0_141, %c0_142], %135 {strides = array<i32>} : memref<1x1x8xf32, #tpu.memory_space<vmem>>, vector<1x1x8xf32>,
    %136 = arith.mulf %127, %127 : vector<64x8xf32>
    %cst_143 = arith.constant dense<0.000000e+00> : vector<8xf32>
    %137 = vector.multi_reduction <add>, %136, %cst_143 [0] : vector<64x8xf32> to vector<8xf32>
    %138 = vector.shape_cast %137 : vector<8xf32> to vector<1x8xf32>
    %c0_144 = arith.constant 0 : index
    %c0_145 = arith.constant 0 : index
    %c0_146 = arith.constant 0 : index
    %139 = vector.load %arg8[%c0_144, %c0_145, %c0_146] : memref<1x1x8xf32, #tpu.memory_space<vmem>>, vector<1x1x8xf32>
    %140 = vector.shape_cast %139 : vector<1x1x8xf32> to vector<1x8xf32>
    %141 = vector.shape_cast %138 : vector<1x8xf32> to vector<1x1x8xf32>
    tpu.vector_store %arg8[%c0_144, %c0_145, %c0_146], %141 {strides = array<i32>} : memref<1x1x8xf32, #tpu.memory_space<vmem>>, vector<1x1x8xf32>,
    return
  }
  func.func @transform_0(%arg0: i32) -> (i32, i32, i32, i32) {
    %c0_i32 = arith.constant 0 : i32
    %c0_i32_0 = arith.constant 0 : i32
    %c0_i32_1 = arith.constant 0 : i32
    %c0_i32_2 = arith.constant 0 : i32
    return %arg0, %c0_i32, %c0_i32_0, %c0_i32_1 : i32, i32, i32, i32
  }
  func.func @transform_1(%arg0: i32) -> (i32, i32, i32) {
    %c0_i32 = arith.constant 0 : i32
    %c0_i32_0 = arith.constant 0 : i32
    %c0_i32_1 = arith.constant 0 : i32
    %c0_i32_2 = arith.constant 0 : i32
    return %c0_i32, %c0_i32_0, %c0_i32_1 : i32, i32, i32
  }
  func.func @transform_2(%arg0: i32) -> (i32, i32, i32, i32) {
    %c0_i32 = arith.constant 0 : i32
    %c0_i32_0 = arith.constant 0 : i32
    %c0_i32_1 = arith.constant 0 : i32
    %c0_i32_2 = arith.constant 0 : i32
    return %arg0, %c0_i32, %c0_i32_0, %c0_i32_1 : i32, i32, i32, i32
  }
  func.func @transform_3(%arg0: i32) -> (i32, i32, i32) {
    %c0_i32 = arith.constant 0 : i32
    %c0_i32_0 = arith.constant 0 : i32
    %c0_i32_1 = arith.constant 0 : i32
    %c0_i32_2 = arith.constant 0 : i32
    return %c0_i32, %c0_i32_0, %c0_i32_1 : i32, i32, i32
  }
  func.func @transform_4(%arg0: i32) -> (i32, i32) {
    %c0_i32 = arith.constant 0 : i32
    %c0_i32_0 = arith.constant 0 : i32
    %c0_i32_1 = arith.constant 0 : i32
    return %c0_i32, %c0_i32_0 : i32, i32
  }
  func.func @transform_5(%arg0: i32) -> (i32, i32, i32) {
    %c0_i32 = arith.constant 0 : i32
    %c0_i32_0 = arith.constant 0 : i32
    %c0_i32_1 = arith.constant 0 : i32
    return %arg0, %c0_i32, %c0_i32_0 : i32, i32, i32
  }
  func.func @transform_6(%arg0: i32) -> (i32, i32, i32) {
    %c0_i32 = arith.constant 0 : i32
    %c0_i32_0 = arith.constant 0 : i32
    %c0_i32_1 = arith.constant 0 : i32
    return %arg0, %c0_i32, %c0_i32_0 : i32, i32, i32
  }
  func.func @transform_7(%arg0: i32) -> (i32, i32, i32) {
    %c0_i32 = arith.constant 0 : i32
    %c0_i32_0 = arith.constant 0 : i32
    %c0_i32_1 = arith.constant 0 : i32
    return %arg0, %c0_i32, %c0_i32_0 : i32, i32, i32
  }
}

module attributes {stable_mosaic.version = 11 : i64} {
  func.func @_affine_kernel(%arg0: i32, %arg1: memref<8x128xf32, #tpu.memory_space<vmem>>, %arg2: memref<1x128xf32, #tpu.memory_space<vmem>>, %arg3: memref<1x128xf32, #tpu.memory_space<vmem>>, %arg4: memref<8x128xf32, #tpu.memory_space<vmem>>) attributes {dimension_semantics = [#tpu.dimension_semantics<parallel>], iteration_bounds = array<i64: 1>, scalar_prefetch = 0 : i64, scratch_operands = 0 : i64, tpu.core_type = #tpu.core_type<tc>, window_params = [{transform_indices = @transform_0, window_bounds = array<i64: 8, 128>}, {pipeline_mode = #tpu.pipeline_mode<synchronous>, transform_indices = @transform_1, window_bounds = array<i64: 1, 128>}, {pipeline_mode = #tpu.pipeline_mode<synchronous>, transform_indices = @transform_2, window_bounds = array<i64: 1, 128>}, {transform_indices = @transform_3, window_bounds = array<i64: 8, 128>}]} {
    %c0 = arith.constant 0 : index
    %c0_0 = arith.constant 0 : index
    %0 = vector.load %arg1[%c0, %c0_0] : memref<8x128xf32, #tpu.memory_space<vmem>>, vector<8x128xf32>
    %c0_1 = arith.constant 0 : index
    %c0_2 = arith.constant 0 : index
    %1 = vector.load %arg2[%c0_1, %c0_2] : memref<1x128xf32, #tpu.memory_space<vmem>>, vector<1x128xf32>
    %2 = vector.broadcast %1 : vector<1x128xf32> to vector<8x128xf32>
    %3 = arith.mulf %0, %2 : vector<8x128xf32>
    %c0_3 = arith.constant 0 : index
    %c0_4 = arith.constant 0 : index
    %4 = vector.load %arg3[%c0_3, %c0_4] : memref<1x128xf32, #tpu.memory_space<vmem>>, vector<1x128xf32>
    %5 = vector.broadcast %4 : vector<1x128xf32> to vector<8x128xf32>
    %6 = arith.addf %3, %5 : vector<8x128xf32>
    %c0_5 = arith.constant 0 : index
    %c0_6 = arith.constant 0 : index
    %7 = vector.load %arg4[%c0_5, %c0_6] : memref<8x128xf32, #tpu.memory_space<vmem>>, vector<8x128xf32>
    tpu.vector_store %arg4[%c0_5, %c0_6], %6 {strides = array<i32>} : memref<8x128xf32, #tpu.memory_space<vmem>>, vector<8x128xf32>,
    return
  }
  func.func @transform_0(%arg0: i32) -> (i32, i32) {
    %c0_i32 = arith.constant 0 : i32
    %c0_i32_0 = arith.constant 0 : i32
    return %arg0, %c0_i32 : i32, i32
  }
  func.func @transform_1(%arg0: i32) -> (i32, i32) {
    %c0_i32 = arith.constant 0 : i32
    %c0_i32_0 = arith.constant 0 : i32
    %c0_i32_1 = arith.constant 0 : i32
    return %c0_i32, %c0_i32_0 : i32, i32
  }
  func.func @transform_2(%arg0: i32) -> (i32, i32) {
    %c0_i32 = arith.constant 0 : i32
    %c0_i32_0 = arith.constant 0 : i32
    %c0_i32_1 = arith.constant 0 : i32
    return %c0_i32, %c0_i32_0 : i32, i32
  }
  func.func @transform_3(%arg0: i32) -> (i32, i32) {
    %c0_i32 = arith.constant 0 : i32
    %c0_i32_0 = arith.constant 0 : i32
    return %arg0, %c0_i32 : i32, i32
  }
}

</mosaic_0001>

<bundles_post_ra>
// kernel: tile.13
= control target key start
LH: loop header
LB: loop body
LE: loop exit
PB: predicated region body
PF: predicated region fallthrough
CT: control target
= control target key end

     0   :  { %s28_s0 = inlined_call_operand.vmem [shape: f32[8], index: 0, kind: input, shape index: {}]   ;;  %s29_s1 = inlined_call_operand.vmem [shape: f32[16,8], index: 1, kind: output, shape index: {}]  }
   0x1   :  { %v4_v0 = vld [vmem:[%s28_s0] ss:$0 sm:$0xff] }
   0x2   :  { %5 = vst [vmem:[%s29_s1] sm:$0xff] %v4_v0 }
   0x3   :  { %8 = vst [vmem:[%s29_s1 + $0x8] sm:$0xff] %v4_v0 }

// kernel: tile.14
= control target key start
LH: loop header
LB: loop body
LE: loop exit
PB: predicated region body
PF: predicated region fallthrough
CT: control target
= control target key end

     0   :  { %s131_s10 = smov 120   ;;  %s132_s11 = smov 104   ;;  %vm3_vm0 = vcmask 64512   ;;  %vm9_vm1 = vcmask 1048512   ;;  %vm15_vm2 = vcmask 982912   ;;  %vm21_vm3 = vcmask 917312   ;;  %s207_s0 = inlined_call_operand.vmem [shape: f32[16,8], index: 0, kind: input, shape index: {}]   ;;  %s208_s1 = inlined_call_operand.vmem [shape: f32[1,128], index: 1, kind: output, shape index: {}]  }
   0x1   :  { %v101_v0 = vld [vmem:[%s207_s0 + $0xf] sm:$0x1]   ;;  %v103_v1 = vld [vmem:[%s207_s0 + $0xd] sm:$0x1]   ;;  %v105_v2 = vld [vmem:[%s207_s0 + $0xb] sm:$0x1]  }
   0x2   :  { %7 = vrot.lane.b32.xlu0 %v101_v0, %s131_s10  ;;  %19 = vrot.lane.b32.xlu1 %v103_v1, %s132_s11  ;;  %s133_s14 = smov 88   ;;  %v102_v3 = vld [vmem:[%s207_s0 + $0xe] sm:$0x1]   ;;  %v104_v4 = vld [vmem:[%s207_s0 + $0xc] sm:$0x1]   ;;  %s134_s19 = smov 112  }
   0x3   :  { %31 = vrot.lane.b32.xlu2 %v105_v2, %s133_s14  ;;  %s135_s20 = smov 96   ;;  %v106_v5 = vld [vmem:[%s207_s0 + $0xa] sm:$0x1]   ;;  %s136_s23 = smov 80   ;;  %v107_v6 = vld [vmem:[%s207_s0 + $0x9] sm:$0x1]  }
   0x4   :  { %v108_v7 = vld [vmem:[%s207_s0 + $0x8] sm:$0x1]   ;;  %s137_s28 = smov 72   ;;  %s138_s29 = smov 64   ;;  %v109_v8 = vld [vmem:[%s207_s0 + $0x7] sm:$0x1]  }
   0x5   :  { %s139_s3 = smov 56   ;;  %v110_v9 = vld [vmem:[%s207_s0 + $0x6] sm:$0x1]   ;;  %v111_v10 = vld [vmem:[%s207_s0 + $0x5] sm:$0x1]   ;;  %s140_s8 = smov 48  }
   0x6   :  { %s141_s9 = smov 40   ;;  %v112_v11 = vld [vmem:[%s207_s0 + $0x4] sm:$0x1]   ;;  %s142_s12 = smov 32   ;;  %v113_v12 = vld [vmem:[%s207_s0 + $0x3] sm:$0x1]  }
   0x7   :  { %v114_v13 = vld [vmem:[%s207_s0 + $0x2] sm:$0x1]   ;;  %s143_s17 = smov 24   ;;  %s144_s18 = smov 16   ;;  %v115_v14 = vld [vmem:[%s207_s0 + $0x1] sm:$0x1]  }
   0x8   :  { %s145_s21 = smov 8   ;;  %v2_v15 = vld [vmem:[%s207_s0] sm:$0x1]   ;;  %vm27_vm4 = vcmask 851712   ;;  %vm33_vm5 = vcmask 786112   ;;  %vm39_vm6 = vcmask 720512  }
   0x9   :  { %4 = vst.msk [vmem:[#allocation0] sm:$0x1] %vm3_vm0, %v2_v15   ;;  %vm45_vm7 = vcmask 654912   ;;  %vm51_vm8 = vcmask 589312   ;;  %vm57_vm9 = vcmask 523712   ;;  %vm63_vm10 = vcmask 458112  }
   0xa   :  { %13 = vrot.lane.b32.xlu0 %v102_v3, %s134_s19  ;;  %25 = vrot.lane.b32.xlu1 %v104_v4, %s135_s20  ;;  %vm69_vm11 = vcmask 392512   ;;  %vm75_vm12 = vcmask 326912   ;;  %vm81_vm13 = vcmask 261312   ;;  %vm87_vm14 = vcmask 195712  }
   0xb   :  { %37 = vrot.lane.b32.xlu2 %v106_v5, %s136_s23  ;;  %vm93_vm15 = vcmask 130112  }
  0x12   :  { %43 = vrot.lane.b32.xlu0 %v107_v6, %s137_s28  ;;  %49 = vrot.lane.b32.xlu1 %v108_v7, %s138_s29 }
  0x13   :  { %55 = vrot.lane.b32.xlu2 %v109_v8, %s139_s3 }
  0x1a   :  { %61 = vrot.lane.b32.xlu0 %v110_v9, %s140_s8  ;;  %67 = vrot.lane.b32.xlu1 %v111_v10, %s141_s9 }
  0x1b   :  { %73 = vrot.lane.b32.xlu2 %v112_v11, %s142_s12 }
  0x22   :  { %79 = vrot.lane.b32.xlu0 %v113_v12, %s143_s17  ;;  %85 = vrot.lane.b32.xlu1 %v114_v13, %s144_s18 }
  0x23   :  { %91 = vrot.lane.b32.xlu2 %v115_v14, %s145_s21 }
  0x5d   :  { %v32_v16 = vpop.permute.xlu2 %31  }
  0x65   :  { %v38_v17 = vpop.permute.xlu2 %37  }
  0x6d   :  { %v56_v18 = vpop.permute.xlu2 %55  }
  0x74   :  { %v8_v19 = vpop.permute.xlu0 %7   ;;  %v20_v20 = vpop.permute.xlu1 %19  }
  0x75   :  { %10 = vst.msk [vmem:[#allocation0] sm:$0x1] %vm9_vm1, %v8_v19   ;;  %v74_v21 = vpop.permute.xlu2 %73  }
  0x7c   :  { %v14_v22 = vpop.permute.xlu0 %13   ;;  %v26_v23 = vpop.permute.xlu1 %25  }
  0x7d   :  { %16 = vst.msk [vmem:[#allocation0] sm:$0x1] %vm15_vm2, %v14_v22   ;;  %v92_v24 = vpop.permute.xlu2 %91  }
  0x7e   :  { %22 = vst.msk [vmem:[#allocation0] sm:$0x1] %vm21_vm3, %v20_v20  }
  0x7f   :  { %28 = vst.msk [vmem:[#allocation0] sm:$0x1] %vm27_vm4, %v26_v23  }
  0x80   :  { %34 = vst.msk [vmem:[#allocation0] sm:$0x1] %vm33_vm5, %v32_v16  }
  0x81   :  { %40 = vst.msk [vmem:[#allocation0] sm:$0x1] %vm39_vm6, %v38_v17  }
  0x84   :  { %v44_v25 = vpop.permute.xlu0 %43   ;;  %v50_v26 = vpop.permute.xlu1 %49  }
  0x85   :  { %46 = vst.msk [vmem:[#allocation0] sm:$0x1] %vm45_vm7, %v44_v25  }
  0x86   :  { %52 = vst.msk [vmem:[#allocation0] sm:$0x1] %vm51_vm8, %v50_v26  }
  0x87   :  { %58 = vst.msk [vmem:[#allocation0] sm:$0x1] %vm57_vm9, %v56_v18  }
  0x8c   :  { %v62_v27 = vpop.permute.xlu0 %61   ;;  %v68_v28 = vpop.permute.xlu1 %67  }
  0x8d   :  { %64 = vst.msk [vmem:[#allocation0] sm:$0x1] %vm63_vm10, %v62_v27  }
  0x8e   :  { %70 = vst.msk [vmem:[#allocation0] sm:$0x1] %vm69_vm11, %v68_v28  }
  0x8f   :  { %76 = vst.msk [vmem:[#allocation0] sm:$0x1] %vm75_vm12, %v74_v21  }
  0x94   :  { %v80_v29 = vpop.permute.xlu0 %79   ;;  %v86_v30 = vpop.permute.xlu1 %85  }
  0x95   :  { %82 = vst.msk [vmem:[#allocation0] sm:$0x1] %vm81_vm13, %v80_v29  }
  0x96   :  { %88 = vst.msk [vmem:[#allocation0] sm:$0x1] %vm87_vm14, %v86_v30  }
  0x97   :  { %94 = vst.msk [vmem:[#allocation0] sm:$0x1] %vm93_vm15, %v92_v24  }
  0x9e   :  { %v97_v31 = vld [vmem:[#allocation0] sm:$0x1] }
  0x9f   :  { %100 = vst [vmem:[%s208_s1] sm:$0x1] %v97_v31 }

// kernel: resblock_forward.5
= control target key start
LH: loop header
LB: loop body
LE: loop exit
PB: predicated region body
PF: predicated region fallthrough
CT: control target
= control target key end

     0   :  { %s64_s0 = inlined_call_operand.vmem [shape: f32[8,128], index: 0, kind: input, shape index: {}]   ;;  %s65_s1 = inlined_call_operand.vmem [shape: f32[1,128], index: 1, kind: input, shape index: {}]   ;;  %s66_s2 = inlined_call_operand.vmem [shape: f32[1,128], index: 2, kind: input, shape index: {}]   ;;  %s67_s3 = inlined_call_operand.vmem [shape: f32[8,128], index: 3, kind: output, shape index: {}]  }
   0x1   :  { %v14_v0 = vld [vmem:[%s64_s0] sm:$0xff] }
   0x2   :  { %v30_v1 = vld [vmem:[%s65_s1] ss:$0 sm:$0xff] }
   0x3   :  { %v31_v2 = vld [vmem:[%s66_s2] ss:$0 sm:$0xff]  ;;  %v19_v3 = vmul.f32 %v30_v1, %v14_v0 }
   0x5   :  { %v24_v4 = vadd.f32 %v31_v2, %v19_v3 }
   0x7   :  { %25 = vst [vmem:[%s67_s3] sm:$0xff] %v24_v4 }

// kernel: resblock_forward.3
= control target key start
LH: loop header
LB: loop body
LE: loop exit
PB: predicated region body
PF: predicated region fallthrough
CT: control target
= control target key end

     0   :  { %s1658_s12 = smov 0   ;;  %s1946_s0 = inlined_call_operand.vmem [shape: bf16[8,9,9,4], index: 0, kind: input, shape index: {}]   ;;  %s1947_s1 = inlined_call_operand.vmem [shape: bf16[9,4,8], index: 1, kind: input, shape index: {}]   ;;  %s1948_s2 = inlined_call_operand.vmem [shape: bf16[8,8], index: 2, kind: input, shape index: {}]   ;;  %s1949_s3 = inlined_call_operand.vmem [shape: bf16[2,64,8], index: 3, kind: output, shape index: {}]  }
   0x1 LB: > { %s1664_s13 = sadd.s32 4294967295, %s1636_s12   ;;  %p1371_p0 = scmp.ge.s32.totalorder %s1636_s12, 1  ;;  %s1636_s12 = sphi %s1658_s12, %s13_s12  }
   0x2   : > { %p139_p1 = scmp.lt.s32.totalorder %s1636_s12, 3 }
   0x4   : > { %p140_p2 = pnand %p1371_p0, %p139_p1 }
   0x5   : > { %s1372_s18 = sshll.u32 (!%p140_p2), %s1664_s13, 2  ;;  %p171_p4 = scmp.lt.s32.totalorder (!%p140_p2), %s1664_s13, 1 }
   0x6   : > { %143 = sbr.rel (%p140_p2) target bundleno = 448 (0x1c0), region = 32  ;;  %p165_p3 = scmp.lt.s32.totalorder (!%p140_p2), %s1372_s18, 7 }
   0xb   : > { %v1384_v0 = vld [vmem:[%s1947_s1 + $0x2] sm:$0x3]  ;;  %vm230_vm0 = vcmask 1041408   ;;  %v185_v1 = vld [vmem:[%s1947_s1] sm:$0x3]  ;;  %s1953_s18 = smov (!%p165_p3, %s1372_s18), 7 }
   0xc   : > { %v232_v2 = vsel %vm230_vm0, %v1384_v0, 0  ;;  %v296_v3 = vsel %vm230_vm0, %v185_v1, 0  ;;  %v1425_v4 = vld [vmem:[%s1947_s1 + $0x4] sm:$0x3]  ;;  %v1438_v6 = vld [vmem:[%s1947_s1 + $0x6] sm:$0x3] }
   0xd   : > { %1619 = vmatpush.bf16.msra.mxu2 %v232_v2  ;;  %1620 = vmatpush.bf16.msra.mxu3 %v296_v3  ;;  %v485_v5 = vsel %vm230_vm0, %v1425_v4, 0  ;;  %v1467_v7 = vld [vmem:[%s1947_s1 + $0x8] sm:$0x3]  ;;  %v568_v8 = vsel %vm230_vm0, %v1438_v6, 0  ;;  %s1621_s25 = smul.u32 72, %s1953_s18  ;;  %vm217_vm1 = vcmask 31744  }
   0xe   : > { %241 = vmatpush.bf16.msra.mxu0 %v232_v2  ;;  %305 = vmatpush.bf16.msra.mxu1 %v296_v3  ;;  %v651_v9 = vsel %vm230_vm0, %v1467_v7, 0  ;;  %v1517_v30 = vld [vmem:[%s1947_s1 + $0xc] sm:$0x3]  ;;  %vm343_vm2 = vsmask.f32 3328  ;;  %vm1262_vm5 = vcmask 1043456  }
   0xf   : > { %s1692_s28 = scalar_lea.vmem %s1946_s0, %s1621_s25  ;;  %v928_v38 = vsel %vm230_vm0, %v1517_v30, 0  ;;  %v1546_v39 = vld [vmem:[%s1947_s1 + $0xe] sm:$0x3]  ;;  %v1504_v42 = vld [vmem:[%s1947_s1 + $0xa] sm:$0x3]  ;;  %vm1249_vm6 = vcmask 64512  }
  0x10   : > { %v1395_v10 = vld [vmem:[%s1692_s28 + $0x68] sm:$0xf]  ;;  %v1601_v11 = vld [vmem:[%s1692_s28 + $0x6c] sm:$0xf0]  ;;  %v1415_v12 = vld [vmem:[%s1692_s28 + $0x20] sm:$0xf] }
  0x11   : > { %494 = vmatpush.bf16.msrb.mxu2 %v485_v5  ;;  %577 = vmatpush.bf16.msrb.mxu3 %v568_v8  ;;  %v1396_v13 = vor.u32 %v1601_v11, %v1395_v10  ;;  %v1597_v14 = vld [vmem:[%s1692_s28 + $0x24] sm:$0xf0]  ;;  %v1599_v16 = vld [vmem:[%s1692_s28 + $0x4c] sm:$0xf0]  ;;  %v1407_v19 = vld [vmem:[%s1692_s28] sm:$0xf] }
  0x12   : > { %660 = vmatpush.bf16.msrb.mxu0 %v651_v9  ;;  %v1387_v15 = vld [vmem:[%s1692_s28 + $0x48] sm:$0xf]  ;;  %v1416_v17 = vor.u32 %v1597_v14, %v1415_v12  ;;  %v327_v22 = vld [vmem:[%s1692_s28] sm:$0xf]  ;;  %v1399_v26 = vld [vmem:[%s1692_s28 + $0x78] sm:$0xf] }
  0x13   : > { %v1388_v18 = vor.u32 %v1599_v16, %v1387_v15  ;;  %v1595_v20 = vld [vmem:[%s1692_s28 + $0x4] sm:$0xf0]  ;;  %1403 = vmatmul.msk.bf16.vlgmr.msra.gmra.mxu2 %vm217_vm1, %v1396_v13  ;;  %v347_v24 = vshrl.u32 %v327_v22, 16  ;;  %v350_v25 = vshll.u32 %v327_v22, 16  ;;  %v1602_v27 = vld [vmem:[%s1692_s28 + $0x7c] sm:$0xf0] }
  0x14   : > { %v1408_v21 = vor.u32 %v1595_v20, %v1407_v19  ;;  %1423 = vmatmul.msk.bf16.vlgmr.msra.gmra.mxu3 %vm217_vm1, %v1416_v17  ;;  %v329_v23 = vld [vmem:[%s1692_s28 + $0x8] sm:$0xf]  ;;  %v1419_v31 = vld [vmem:[%s1692_s28 + $0x30] sm:$0xf]  ;;  %v1598_v32 = vld [vmem:[%s1692_s28 + $0x34] sm:$0xf0]  ;;  %v1400_v49 = vor.u32 %v1602_v27, %v1399_v26 }
  0x15   : > { %1401 = vmatmul.msk.bf16.vlgmr.msra.gmra.mxu0 %vm217_vm1, %v1388_v18  ;;  %v361_v28 = vshrl.u32 %v329_v23, 16  ;;  %v364_v29 = vshll.u32 %v329_v23, 16  ;;  %v1391_v33 = vld [vmem:[%s1692_s28 + $0x58] sm:$0xf]  ;;  %v1600_v34 = vld [vmem:[%s1692_s28 + $0x5c] sm:$0xf0]  ;;  %937 = vmatpush.bf16.msra.mxu2 %v928_v38  ;;  %v1420_v53 = vor.u32 %v1598_v32, %v1419_v31 }
  0x16   : > { %1421 = vmatmul.msk.bf16.vlgmr.msra.gmra.mxu1 %vm217_vm1, %v1408_v21  ;;  %v328_v35 = vld [vmem:[%s1692_s28 + $0x4] sm:$0x1]  ;;  %v330_v36 = vld [vmem:[%s1692_s28 + $0xc] sm:$0x1]  ;;  %v349_v37 = vrot.slane %v347_v24, 4  ;;  %v352_v40 = vrot.slane %v350_v25, 5  ;;  %v1392_v54 = vor.u32 %v1600_v34, %v1391_v33 }
  0x17   : > { %v1011_v41 = vsel %vm230_vm0, %v1546_v39, 0  ;;  %v1583_v43 = vld [vmem:[%s1947_s1 + $0x10] sm:$0x3]  ;;  %v363_v44 = vrot.slane %v361_v28, 4  ;;  %v366_v45 = vrot.slane %v364_v29, 5  ;;  %v845_v46 = vsel %vm230_vm0, %v1504_v42, 0 }
  0x18   : > { %1020 = vmatpush.bf16.msra.mxu3 %v1011_v41  ;;  %v1205_v47 = vsel %vm230_vm0, %v1583_v43, 0  ;;  %v1488_v48 = vld [vmem:[%s1692_s28 + $0x90] sm:$0xf]  ;;  %854 = vmatpush.bf16.msrb.mxu1 %v845_v46  ;;  %v1490_v51 = vld [vmem:[%s1692_s28 + $0x98] sm:$0xf]  ;;  %v356_v59 = vshll.u32 %v328_v35, 16  ;;  %v353_v0 = vor.u32 %v352_v40, %v349_v37 }
  0x19   : > { %v1411_v50 = vld [vmem:[%s1692_s28 + $0x10] sm:$0xf]  ;;  %1214 = vmatpush.bf16.msra.mxu0 %v1205_v47  ;;  %v707_v52 = vshrl.u32 %v1488_v48, 16  ;;  %v1596_v55 = vld [vmem:[%s1692_s28 + $0x14] sm:$0xf0]  ;;  %v710_v57 = vshll.u32 %v1488_v48, 16  ;;  %v367_v1 = vor.u32 %v366_v45, %v363_v44 }
  0x1a   : > { %v1489_v56 = vld [vmem:[%s1692_s28 + $0x94] sm:$0x1]  ;;  %v721_v58 = vshrl.u32 %v1490_v51, 16  ;;  %v370_v60 = vshll.u32 %v330_v36, 16  ;;  %v1491_v61 = vld [vmem:[%s1692_s28 + $0x9c] sm:$0x1]  ;;  %v1412_v4 = vor.u32 %v1596_v55, %v1411_v50 }
  0x1b   : > { %v709_v62 = vrot.slane %v707_v52, 4  ;;  %v724_v63 = vshll.u32 %v1490_v51, 16  ;;  %v712_v2 = vrot.slane %v710_v57, 5  ;;  %vm344_vm3 = vsmask.f32 7440  ;;  %s1955_s13 = smov (!%p171_p4, %s1664_s13), 1 }
  0x1c   : > { %v723_v3 = vrot.slane %v721_v58, 4  ;;  %v716_v5 = vshll.u32 %v1489_v56, 16  ;;  %v730_v8 = vshll.u32 %v1491_v61, 16  ;;  %v331_v9 = vld [vmem:[%s1692_s28 + $0x10] sm:$0xf]  ;;  %v354_v12 = vrot.slane %v353_v0, 4  ;;  %vm1746_vm4 = vmor %vm343_vm2, %vm344_vm3 }
  0x1d   : > { %v726_v6 = vrot.slane %v724_v63, 5  ;;  %v713_v7 = vor.u32 %v712_v2, %v709_v62  ;;  %v333_v10 = vld [vmem:[%s1692_s28 + $0x18] sm:$0xf]  ;;  %v358_v13 = vrot.slane %v356_v59, 5  ;;  %v368_v14 = vrot.slane %v367_v1, 4  ;;  %s1594_s14 = sshll.u32 %s1955_s13, 5 }
  0x1e   : > { %v372_v15 = vrot.slane %v370_v60, 5  ;;  %v718_v17 = vrot.slane %v716_v5, 5  ;;  %v375_v18 = vshrl.u32 %v331_v9, 16  ;;  %v378_v19 = vshll.u32 %v331_v9, 16  ;;  %v1492_v21 = vld [vmem:[%s1692_s28 + $0xa0] sm:$0xf]  ;;  %s175_s17 = scalar_lea.vmem %s1949_s3, %s1594_s14 }
  0x1f   : > { %v727_v11 = vor.u32 %v726_v6, %v723_v3  ;;  %v389_v20 = vshrl.u32 %v333_v10, 16  ;;  %v714_v22 = vrot.slane %v713_v7, 4  ;;  %v732_v24 = vrot.slane %v730_v8, 5  ;;  %v1494_v26 = vld [vmem:[%s1692_s28 + $0xa8] sm:$0xf] }
  0x20   : > { %v392_v25 = vshll.u32 %v333_v10, 16  ;;  %v359_v27 = vsel %vm1746_vm4, %v354_v12, %v358_v13  ;;  %v373_v28 = vsel %vm1746_vm4, %v368_v14, %v372_v15  ;;  %v735_v29 = vshrl.u32 %v1492_v21, 16  ;;  %v1441_v35 = vld [vmem:[%s1692_s28 + $0x90] sm:$0xf]  ;;  %v1603_v36 = vld [vmem:[%s1692_s28 + $0x94] sm:$0xf0] }
  0x21   : > { %v728_v23 = vrot.slane %v727_v11, 4  ;;  %v738_v30 = vshll.u32 %v1492_v21, 16  ;;  %v377_v31 = vrot.slane %v375_v18, 4  ;;  %v380_v32 = vrot.slane %v378_v19, 5  ;;  %v1470_v43 = vld [vmem:[%s1692_s28 + $0xd8] sm:$0xf] }
  0x22   : > { %v749_v33 = vshrl.u32 %v1494_v26, 16  ;;  %v752_v34 = vshll.u32 %v1494_v26, 16  ;;  %v719_v37 = vsel %vm1746_vm4, %v714_v22, %v718_v17  ;;  %v391_v39 = vrot.slane %v389_v20, 4  ;;  %v332_v44 = vld [vmem:[%s1692_s28 + $0x14] sm:$0x1] }
  0x23   : > { %1404 = vmatmul.msk.bf16.gmra.mxu2 %vm217_vm1, %v1400_v49  ;;  %v733_v38 = vsel %vm1746_vm4, %v728_v23, %v732_v24  ;;  %v394_v40 = vrot.slane %v392_v25, 5  ;;  %v460_v41 = vunpack.c.l.b16 %v359_v27  ;;  %v461_v42 = vunpack.c.l.b16 %v373_v28  ;;  %v334_v45 = vld [vmem:[%s1692_s28 + $0x1c] sm:$0x1]  ;;  %v1607_v46 = vld [vmem:[%s1692_s28 + $0xdc] sm:$0xf0] }
  0x24   : > { %1424 = vmatmul.msk.bf16.gmra.mxu3 %vm217_vm1, %v1420_v53  ;;  %v737_v47 = vrot.slane %v735_v29, 4  ;;  %v740_v48 = vrot.slane %v738_v30, 5  ;;  %v751_v49 = vrot.slane %v749_v33, 4  ;;  %v754_v50 = vrot.slane %v752_v34, 5  ;;  %v1493_v53 = vld [vmem:[%s1692_s28 + $0xa4] sm:$0x1] }
  0x25   : > { %1402 = vmatmul.msk.bf16.gmra.mxu0 %vm217_vm1, %v1392_v54  ;;  %v820_v51 = vunpack.c.l.b16 %v719_v37  ;;  %v821_v52 = vunpack.c.l.b16 %v733_v38  ;;  %v1495_v54 = vld [vmem:[%s1692_s28 + $0xac] sm:$0x1]  ;;  %v381_v55 = vor.u32 %v380_v32, %v377_v31  ;;  %v384_v56 = vshll.u32 %v332_v44, 16  ;;  %v335_v7 = vld [vmem:[%s1692_s28 + $0x20] sm:$0xf] }
  0x26   : > { %1422 = vmatmul.msk.bf16.gmra.mxu1 %vm217_vm1, %v1412_v4  ;;  %v395_v57 = vor.u32 %v394_v40, %v391_v39  ;;  %v398_v58 = vshll.u32 %v334_v45, 16  ;;  %v468_v59 = vpack.c.b16 %v461_v42, %v460_v41  ;;  %v1442_v60 = vor.u32 %v1603_v36, %v1441_v35  ;;  %v337_v12 = vld [vmem:[%s1692_s28 + $0x28] sm:$0xf]  ;;  %v1496_v15 = vld [vmem:[%s1692_s28 + $0xb0] sm:$0xf] }
  0x27   : > { %v1471_v61 = vor.u32 %v1607_v46, %v1470_v43  ;;  %v741_v62 = vor.u32 %v740_v48, %v737_v47  ;;  %v744_v63 = vshll.u32 %v1493_v53, 16  ;;  %v755_v0 = vor.u32 %v754_v50, %v751_v49  ;;  %v1498_v17 = vld [vmem:[%s1692_s28 + $0xb8] sm:$0xf]  ;;  %v1445_v30 = vld [vmem:[%s1692_s28 + $0xa0] sm:$0xf] }
  0x28   : > { %v758_v1 = vshll.u32 %v1495_v54, 16  ;;  %v828_v2 = vpack.c.b16 %v821_v52, %v820_v51  ;;  %v382_v3 = vrot.slane %v381_v55, 4  ;;  %v386_v4 = vrot.slane %v384_v56, 5  ;;  %v336_v31 = vld [vmem:[%s1692_s28 + $0x24] sm:$0x1] }
  0x29   : > { %v396_v5 = vrot.slane %v395_v57, 4  ;;  %v400_v6 = vrot.slane %v398_v58, 5  ;;  %v742_v8 = vrot.slane %v741_v62, 4  ;;  %v746_v9 = vrot.slane %v744_v63, 5  ;;  %v1604_v36 = vld [vmem:[%s1692_s28 + $0xa4] sm:$0xf0] }
  0x2a   : > { %v756_v10 = vrot.slane %v755_v0, 4  ;;  %v760_v11 = vrot.slane %v758_v1, 5  ;;  %v387_v13 = vsel %vm1746_vm4, %v382_v3, %v386_v4  ;;  %v403_v18 = vshrl.u32 %v335_v7, 16  ;;  %v1474_v37 = vld [vmem:[%s1692_s28 + $0xe8] sm:$0xf] }
  0x2b   : > { %v401_v14 = vsel %vm1746_vm4, %v396_v5, %v400_v6  ;;  %v406_v19 = vshll.u32 %v335_v7, 16  ;;  %v417_v20 = vshrl.u32 %v337_v12, 16  ;;  %v420_v21 = vshll.u32 %v337_v12, 16  ;;  %v338_v40 = vld [vmem:[%s1692_s28 + $0x2c] sm:$0x1] }
  0x2c   : > { %v747_v22 = vsel %vm1746_vm4, %v742_v8, %v746_v9  ;;  %v761_v23 = vsel %vm1746_vm4, %v756_v10, %v760_v11  ;;  %v763_v24 = vshrl.u32 %v1496_v15, 16  ;;  %v766_v25 = vshll.u32 %v1496_v15, 16  ;;  %v1608_v41 = vld [vmem:[%s1692_s28 + $0xec] sm:$0xf0]  ;;  %v1497_v47 = vld [vmem:[%s1692_s28 + $0xb4] sm:$0x1] }
  0x2d   : > { %v777_v26 = vshrl.u32 %v1498_v17, 16  ;;  %v780_v27 = vshll.u32 %v1498_v17, 16  ;;  %v462_v28 = vunpack.c.l.b16 %v387_v13  ;;  %v463_v29 = vunpack.c.l.b16 %v401_v14  ;;  %v1499_v48 = vld [vmem:[%s1692_s28 + $0xbc] sm:$0x1]  ;;  %v339_v0 = vld [vmem:[%s1692_s28 + $0x30] sm:$0xf] }
  0x2e   : > { %v405_v32 = vrot.slane %v403_v18, 4  ;;  %v408_v33 = vrot.slane %v406_v19, 5  ;;  %v419_v34 = vrot.slane %v417_v20, 4  ;;  %v422_v35 = vrot.slane %v420_v21, 5  ;;  %v341_v5 = vld [vmem:[%s1692_s28 + $0x38] sm:$0xf] }
  0x2f   : > { %v822_v38 = vunpack.c.l.b16 %v747_v22  ;;  %v823_v39 = vunpack.c.l.b16 %v761_v23  ;;  %v765_v42 = vrot.slane %v763_v24, 4  ;;  %v768_v43 = vrot.slane %v766_v25, 5  ;;  %v1500_v8 = vld [vmem:[%s1692_s28 + $0xc0] sm:$0xf]  ;;  %v1502_v9 = vld [vmem:[%s1692_s28 + $0xc8] sm:$0xf] }
  0x30   : > { %v779_v44 = vrot.slane %v777_v26, 4  ;;  %v782_v45 = vrot.slane %v780_v27, 5  ;;  %v412_v46 = vshll.u32 %v336_v31, 16  ;;  %v469_v49 = vpack.c.b16 %v463_v29, %v462_v28  ;;  %v1449_v23 = vld [vmem:[%s1692_s28 + $0xb0] sm:$0xf] }
  0x31   : > { %v409_v50 = vor.u32 %v408_v33, %v405_v32  ;;  %v423_v51 = vor.u32 %v422_v35, %v419_v34  ;;  %v426_v52 = vshll.u32 %v338_v40, 16  ;;  %v1446_v53 = vor.u32 %v1604_v36, %v1445_v30  ;;  %v1605_v24 = vld [vmem:[%s1692_s28 + $0xb4] sm:$0xf0]  ;;  %v1609_v26 = vld [vmem:[%s1692_s28 + $0xfc] sm:$0xf0] }
  0x32   : > { %v1475_v54 = vor.u32 %v1608_v41, %v1474_v37  ;;  %v829_v55 = vpack.c.b16 %v823_v39, %v822_v38  ;;  %v769_v56 = vor.u32 %v768_v43, %v765_v42  ;;  %v772_v57 = vshll.u32 %v1497_v47, 16  ;;  %v1478_v25 = vld [vmem:[%s1692_s28 + $0xf8] sm:$0xf]  ;;  %v340_v33 = vld [vmem:[%s1692_s28 + $0x34] sm:$0x1] }
  0x33   : > { %1426 = vmatmul.msk.bf16.vlgmr.msrb.gmra.mxu2 %vm217_vm1, %v468_v59  ;;  %v783_v58 = vor.u32 %v782_v45, %v779_v44  ;;  %v786_v59 = vshll.u32 %v1499_v48, 16  ;;  %v424_v62 = vrot.slane %v423_v51, 4  ;;  %v428_v63 = vrot.slane %v426_v52, 5  ;;  %v342_v34 = vld [vmem:[%s1692_s28 + $0x3c] sm:$0x1] }
  0x34   : > { %1455 = vmatmul.msk.bf16.vlgmr.msrb.gmra.mxu3 %vm217_vm1, %v1442_v60  ;;  %v410_v60 = vrot.slane %v409_v50, 4  ;;  %v770_v1 = vrot.slane %v769_v56, 4  ;;  %v431_v10 = vshrl.u32 %v339_v0, 16  ;;  %v434_v11 = vshll.u32 %v339_v0, 16  ;;  %v1501_v42 = vld [vmem:[%s1692_s28 + $0xc4] sm:$0x1] }
  0x35   : > { %1484 = vmatmul.msk.bf16.vlgmr.msrb.gmra.mxu0 %vm217_vm1, %v1471_v61  ;;  %v414_v61 = vrot.slane %v412_v46, 5  ;;  %v784_v3 = vrot.slane %v783_v58, 4  ;;  %v788_v4 = vrot.slane %v786_v59, 5  ;;  %v429_v7 = vsel %vm1746_vm4, %v424_v62, %v428_v63  ;;  %v1503_v43 = vld [vmem:[%s1692_s28 + $0xcc] sm:$0x1] }
  0x36   : > { %1505 = vmatmul.msk.bf16.vlgmr.msrb.gmra.mxu1 %vm217_vm1, %v828_v2  ;;  %v774_v2 = vrot.slane %v772_v57, 5  ;;  %v445_v12 = vshrl.u32 %v341_v5, 16  ;;  %v448_v13 = vshll.u32 %v341_v5, 16  ;;  %v791_v17 = vshrl.u32 %v1500_v8, 16  ;;  %v1567_v57 = vld [vmem:[%s1692_s28 + $0x8] sm:$0xf] }
  0x37   : > { %v415_v6 = vsel %vm1746_vm4, %v410_v60, %v414_v61  ;;  %v789_v15 = vsel %vm1746_vm4, %v784_v3, %v788_v4  ;;  %v794_v18 = vshll.u32 %v1500_v8, 16  ;;  %v805_v19 = vshrl.u32 %v1502_v9, 16  ;;  %v1569_v62 = vld [vmem:[%s1692_s28 + $0x10] sm:$0xf] }
  0x38   : > { %v775_v14 = vsel %vm1746_vm4, %v770_v1, %v774_v2  ;;  %v808_v20 = vshll.u32 %v1502_v9, 16  ;;  %v464_v21 = vunpack.c.l.b16 %v415_v6  ;;  %v465_v22 = vunpack.c.l.b16 %v429_v7  ;;  %v1453_v9 = vld [vmem:[%s1692_s28 + $0xc0] sm:$0xf] }
  0x39   : > { %v433_v27 = vrot.slane %v431_v10, 4  ;;  %v436_v28 = vrot.slane %v434_v11, 5  ;;  %v447_v29 = vrot.slane %v445_v12, 4  ;;  %v450_v30 = vrot.slane %v448_v13, 5  ;;  %v1606_v10 = vld [vmem:[%s1692_s28 + $0xc4] sm:$0xf0] }
  0x3a   : > { %v824_v31 = vunpack.c.l.b16 %v775_v14  ;;  %v825_v32 = vunpack.c.l.b16 %v789_v15  ;;  %v793_v35 = vrot.slane %v791_v17, 4  ;;  %v796_v36 = vrot.slane %v794_v18, 5  ;;  %v1482_v13 = vld [vmem:[%s1692_s28 + $0x108] sm:$0xf]  ;;  %v1610_v14 = vld [vmem:[%s1692_s28 + $0x10c] sm:$0xf0] }
  0x3b   : > { %v807_v37 = vrot.slane %v805_v19, 4  ;;  %v810_v38 = vrot.slane %v808_v20, 5  ;;  %v470_v39 = vpack.c.b16 %v465_v22, %v464_v21  ;;  %v1450_v40 = vor.u32 %v1605_v24, %v1449_v23  ;;  %v1568_v20 = vld [vmem:[%s1692_s28 + $0xc] sm:$0x1]  ;;  %v1570_v21 = vld [vmem:[%s1692_s28 + $0x14] sm:$0x1] }
  0x3c   : > { %v1479_v41 = vor.u32 %v1609_v26, %v1478_v25  ;;  %v437_v44 = vor.u32 %v436_v28, %v433_v27  ;;  %v440_v45 = vshll.u32 %v340_v33, 16  ;;  %v451_v46 = vor.u32 %v450_v30, %v447_v29  ;;  %v1571_v30 = vld [vmem:[%s1692_s28 + $0x18] sm:$0xf] }
  0x3d   : > { %v454_v47 = vshll.u32 %v342_v34, 16  ;;  %v830_v48 = vpack.c.b16 %v825_v32, %v824_v31  ;;  %v800_v50 = vshll.u32 %v1501_v42, 16  ;;  %v811_v51 = vor.u32 %v810_v38, %v807_v37  ;;  %v1573_v31 = vld [vmem:[%s1692_s28 + $0x20] sm:$0xf]  ;;  %v1520_v42 = vld [vmem:[%s1692_s28 + $0x8] sm:$0xf] }
  0x3e   : > { %v814_v52 = vshll.u32 %v1503_v43, 16  ;;  %v1067_v1 = vshrl.u32 %v1567_v57, 16  ;;  %v1070_v2 = vshll.u32 %v1567_v57, 16  ;;  %v1081_v3 = vshrl.u32 %v1569_v62, 16  ;;  %v1611_v43 = vld [vmem:[%s1692_s28 + $0xc] sm:$0xf0] }
  0x3f   : > { %v456_v56 = vrot.slane %v454_v47, 5  ;;  %v802_v59 = vrot.slane %v800_v50, 5  ;;  %v812_v60 = vrot.slane %v811_v51, 4  ;;  %v1084_v4 = vshll.u32 %v1569_v62, 16  ;;  %v1572_v50 = vld [vmem:[%s1692_s28 + $0x1c] sm:$0x1] }
  0x40   : > { %v816_v61 = vrot.slane %v814_v52, 5  ;;  %v1069_v11 = vrot.slane %v1067_v1, 4  ;;  %v1072_v12 = vrot.slane %v1070_v2, 5  ;;  %v1083_v18 = vrot.slane %v1081_v3, 4  ;;  %v1574_v51 = vld [vmem:[%s1692_s28 + $0x24] sm:$0x1] }
  0x41   : > { %v1086_v19 = vrot.slane %v1084_v4, 5  ;;  %v1454_v23 = vor.u32 %v1606_v10, %v1453_v9  ;;  %v1483_v24 = vor.u32 %v1610_v14, %v1482_v13  ;;  %v1076_v27 = vshll.u32 %v1568_v20, 16  ;;  %v1549_v52 = vld [vmem:[%s1692_s28 + $0x50] sm:$0xf]  ;;  %v1575_v1 = vld [vmem:[%s1692_s28 + $0x28] sm:$0xf] }
  0x42   : > { %v817_v6 = vsel %vm1746_vm4, %v812_v60, %v816_v61  ;;  %v1073_v25 = vor.u32 %v1072_v12, %v1069_v11  ;;  %v1090_v29 = vshll.u32 %v1570_v21, 16  ;;  %v1098_v37 = vshll.u32 %v1571_v30, 16  ;;  %v1577_v2 = vld [vmem:[%s1692_s28 + $0x30] sm:$0xf]  ;;  %v1524_v9 = vld [vmem:[%s1692_s28 + $0x18] sm:$0xf] }
  0x43   : > { %1427 = vmatmul.msk.bf16.gmra.mxu2 %vm217_vm1, %v469_v49  ;;  %v797_v49 = vor.u32 %v796_v36, %v793_v35  ;;  %v827_v17 = vunpack.c.l.b16 %v817_v6  ;;  %v1087_v28 = vor.u32 %v1086_v19, %v1083_v18  ;;  %v1078_v33 = vrot.slane %v1076_v27, 5  ;;  %v1612_v10 = vld [vmem:[%s1692_s28 + $0x1c] sm:$0xf0]  ;;  %v1616_v14 = vld [vmem:[%s1692_s28 + $0x64] sm:$0xf0] }
  0x44   : > { %1456 = vmatmul.msk.bf16.gmra.mxu3 %vm217_vm1, %v1446_v53  ;;  %v438_v53 = vrot.slane %v437_v44, 4  ;;  %v1074_v32 = vrot.slane %v1073_v25, 4  ;;  %v1092_v35 = vrot.slane %v1090_v29, 5  ;;  %v1095_v36 = vshrl.u32 %v1571_v30, 16  ;;  %v1553_v11 = vld [vmem:[%s1692_s28 + $0x60] sm:$0xf] }
  0x45   : > { %1485 = vmatmul.msk.bf16.gmra.mxu0 %vm217_vm1, %v1475_v54  ;;  %v442_v54 = vrot.slane %v440_v45, 5  ;;  %v798_v58 = vrot.slane %v797_v49, 4  ;;  %v1088_v34 = vrot.slane %v1087_v28, 4  ;;  %v1109_v38 = vshrl.u32 %v1573_v31, 16  ;;  %v1576_v20 = vld [vmem:[%s1692_s28 + $0x2c] sm:$0x1] }
  0x46   : > { %1506 = vmatmul.msk.bf16.gmra.mxu1 %vm217_vm1, %v829_v55  ;;  %v452_v55 = vrot.slane %v451_v46, 4  ;;  %v1097_v44 = vrot.slane %v1095_v36, 4  ;;  %v1100_v45 = vrot.slane %v1098_v37, 5  ;;  %v1126_v6 = vshll.u32 %v1575_v1, 16  ;;  %v1578_v21 = vld [vmem:[%s1692_s28 + $0x34] sm:$0x1] }
  0x47   : > { %v443_v63 = vsel %vm1746_vm4, %v438_v53, %v442_v54  ;;  %v803_v5 = vsel %vm1746_vm4, %v798_v58, %v802_v59  ;;  %v1111_v46 = vrot.slane %v1109_v38, 4  ;;  %v1615_v53 = vld [vmem:[%s1692_s28 + $0x54] sm:$0xf0]  ;;  %v1521_v54 = vor.u32 %v1611_v43, %v1520_v42  ;;  %v1613_v42 = vld [vmem:[%s1692_s28 + $0x2c] sm:$0xf0] }
  0x48   : > { %v457_v0 = vsel %vm1746_vm4, %v452_v55, %v456_v56  ;;  %v466_v7 = vunpack.c.l.b16 %v443_v63  ;;  %v826_v15 = vunpack.c.l.b16 %v803_v5  ;;  %v1101_v55 = vor.u32 %v1100_v45, %v1097_v44  ;;  %v1557_v43 = vld [vmem:[%s1692_s28 + $0x70] sm:$0xf] }
  0x49   : > { %v467_v8 = vunpack.c.l.b16 %v457_v0  ;;  %v1104_v56 = vshll.u32 %v1572_v50, 16  ;;  %v1118_v58 = vshll.u32 %v1574_v51, 16  ;;  %v1550_v59 = vor.u32 %v1615_v53, %v1549_v52  ;;  %v1580_v51 = vld [vmem:[%s1692_s28 + $0x3c] sm:$0x1]  ;;  %v1582_v52 = vld [vmem:[%s1692_s28 + $0x44] sm:$0x1] }
  0x4a   : > { %v831_v26 = vpack.c.b16 %v827_v17, %v826_v15  ;;  %v1102_v61 = vrot.slane %v1101_v55, 4  ;;  %v1123_v5 = vshrl.u32 %v1575_v1, 16  ;;  %v1128_v17 = vrot.slane %v1126_v6, 5 }
  0x4b   : > { %v471_v22 = vpack.c.b16 %v467_v8, %v466_v7  ;;  %v1106_v62 = vrot.slane %v1104_v56, 5  ;;  %v1120_v0 = vrot.slane %v1118_v58, 5  ;;  %v1137_v7 = vshrl.u32 %v1577_v2, 16 }
  0x4c   : > { %v1140_v8 = vshll.u32 %v1577_v2, 16  ;;  %v1125_v15 = vrot.slane %v1123_v5, 4  ;;  %v1146_v28 = vshll.u32 %v1578_v21, 16  ;;  %v1160_v58 = vshll.u32 %v1580_v51, 16 }
  0x4d   : > { %v1107_v3 = vsel %vm1746_vm4, %v1102_v61, %v1106_v62  ;;  %v1139_v18 = vrot.slane %v1137_v7, 4  ;;  %v1532_v7 = vld [vmem:[%s1692_s28 + $0x38] sm:$0xf]  ;;  %vm1303_vm7 = vcmask 60416  }
  0x4e   : > { %v1182_v12 = vunpack.c.l.b16 %v1107_v3  ;;  %v1142_v19 = vrot.slane %v1140_v8, 5  ;;  %v1129_v25 = vor.u32 %v1128_v17, %v1125_v15  ;;  %v1162_v62 = vrot.slane %v1160_v58, 5  ;;  %v1614_v8 = vld [vmem:[%s1692_s28 + $0x3c] sm:$0xf0] }
  0x4f   : > { %v1533_v15 = vor.u32 %v1614_v8, %v1532_v7 }
  0x50   : > { %v1143_v27 = vor.u32 %v1142_v19, %v1139_v18  ;;  %v1130_v29 = vrot.slane %v1129_v25, 4 }
  0x53   : > { %1428 = vmatmul.msk.bf16.gmra.mxu2 %vm217_vm1, %v470_v39  ;;  %v1112_v39 = vshll.u32 %v1573_v31, 16  ;;  %v1144_v31 = vrot.slane %v1143_v27, 4 }
  0x54   : > { %1457 = vmatmul.msk.bf16.gmra.mxu3 %vm217_vm1, %v1450_v40  ;;  %v1079_v40 = vsel %vm1746_vm4, %v1074_v32, %v1078_v33  ;;  %v1148_v32 = vrot.slane %v1146_v28, 5  ;;  %v1579_v33 = vld [vmem:[%s1692_s28 + $0x38] sm:$0xf] }
  0x55   : > { %1486 = vmatmul.msk.bf16.gmra.mxu0 %vm217_vm1, %v1479_v41  ;;  %v1093_v41 = vsel %vm1746_vm4, %v1088_v34, %v1092_v35  ;;  %v1114_v47 = vrot.slane %v1112_v39, 5  ;;  %v1581_v34 = vld [vmem:[%s1692_s28 + $0x40] sm:$0xf]  ;;  %v1151_v37 = vshrl.u32 %v1579_v33, 16  ;;  %v1154_v38 = vshll.u32 %v1579_v33, 16 }
  0x56   : > { %1507 = vmatmul.msk.bf16.gmra.mxu1 %vm217_vm1, %v830_v48  ;;  %v1180_v48 = vunpack.c.l.b16 %v1079_v40  ;;  %v1181_v49 = vunpack.c.l.b16 %v1093_v41  ;;  %v1149_v36 = vsel %vm1746_vm4, %v1144_v31, %v1148_v32  ;;  %v1165_v39 = vshrl.u32 %v1581_v34, 16  ;;  %v1528_v41 = vld [vmem:[%s1692_s28 + $0x28] sm:$0xf] }
  0x57   : > { %v1115_v57 = vor.u32 %v1114_v47, %v1111_v46  ;;  %v1168_v40 = vshll.u32 %v1581_v34, 16  ;;  %v1185_v45 = vunpack.c.l.b16 %v1149_v36  ;;  %v1617_v46 = vld [vmem:[%s1692_s28 + $0x74] sm:$0xf0]  ;;  %v1153_v47 = vrot.slane %v1151_v37, 4 }
  0x58   : > { %v1188_v60 = vpack.c.b16 %v1181_v49, %v1180_v48  ;;  %v1156_v48 = vrot.slane %v1154_v38, 5  ;;  %v1167_v49 = vrot.slane %v1165_v39, 4  ;;  %v1529_v53 = vor.u32 %v1613_v42, %v1528_v41 }
  0x59   : > { %v1116_v63 = vrot.slane %v1115_v57, 4  ;;  %v1170_v50 = vrot.slane %v1168_v40, 5 }
  0x5a   : > { %v1157_v57 = vor.u32 %v1156_v48, %v1153_v47 }
  0x5b   : > { %v1121_v4 = vsel %vm1746_vm4, %v1116_v63, %v1120_v0 }
  0x5c   : > { %v1183_v13 = vunpack.c.l.b16 %v1121_v4  ;;  %v1158_v61 = vrot.slane %v1157_v57, 4 }
  0x5e   : > { %v1163_v5 = vsel %vm1746_vm4, %v1158_v61, %v1162_v62 }
  0x63   : > { %1429 = vmatmul.msk.bf16.gmra.mxu2 %vm217_vm1, %v471_v22  ;;  %v1525_v22 = vor.u32 %v1612_v10, %v1524_v9  ;;  %v1186_v9 = vunpack.c.l.b16 %v1163_v5 }
  0x64   : > { %1458 = vmatmul.msk.bf16.gmra.mxu3 %vm217_vm1, %v1454_v23  ;;  %v1554_v23 = vor.u32 %v1616_v14, %v1553_v11  ;;  %v1561_v11 = vld [vmem:[%s1692_s28 + $0x80] sm:$0xf] }
  0x65   : > { %1487 = vmatmul.msk.bf16.gmra.mxu0 %vm217_vm1, %v1483_v24  ;;  %v1189_v24 = vpack.c.b16 %v1183_v13, %v1182_v12  ;;  %v1618_v12 = vld [vmem:[%s1692_s28 + $0x84] sm:$0xf0] }
  0x66   : > { %1508 = vmatmul.msk.bf16.gmra.mxu1 %vm217_vm1, %v831_v26  ;;  %v1132_v26 = vshll.u32 %v1576_v20, 16  ;;  %v1562_v18 = vor.u32 %v1618_v12, %v1561_v11 }
  0x68   : > { %v1134_v30 = vrot.slane %v1132_v26, 5 }
  0x6a   : > { %v1135_v35 = vsel %vm1746_vm4, %v1130_v29, %v1134_v30 }
  0x6b   : > { %v1184_v44 = vunpack.c.l.b16 %v1135_v35 }
  0x6d   : > { %v1190_v55 = vpack.c.b16 %v1185_v45, %v1184_v44 }
  0x73   : > { %1534 = vmatmul.msk.bf16.vlgmr.msra.gmra.mxu2 %vm217_vm1, %v1521_v54  ;;  %v1558_v54 = vor.u32 %v1617_v46, %v1557_v43 }
  0x74   : > { %1563 = vmatmul.msk.bf16.vlgmr.msra.gmra.mxu3 %vm217_vm1, %v1550_v59  ;;  %v1171_v59 = vor.u32 %v1170_v50, %v1167_v49 }
  0x75   : > { %1584 = vmatmul.msk.bf16.vlgmr.msra.gmra.mxu0 %vm217_vm1, %v1188_v60  ;;  %v1174_v60 = vshll.u32 %v1582_v52, 16 }
  0x76   : > { %v1172_v63 = vrot.slane %v1171_v59, 4 }
  0x77   : > { %v1176_v0 = vrot.slane %v1174_v60, 5 }
  0x79   : > { %v1177_v6 = vsel %vm1746_vm4, %v1172_v63, %v1176_v0 }
  0x7a   : > { %v1187_v10 = vunpack.c.l.b16 %v1177_v6 }
  0x7c   : > { %v1191_v19 = vpack.c.b16 %v1187_v10, %v1186_v9 }
  0x83   : > { %1535 = vmatmul.msk.bf16.gmra.mxu2 %vm217_vm1, %v1525_v22 }
  0x84   : > { %1564 = vmatmul.msk.bf16.gmra.mxu3 %vm217_vm1, %v1554_v23 }
  0x85   : > { %1585 = vmatmul.msk.bf16.gmra.mxu0 %vm217_vm1, %v1189_v24  ;;  %v1248_v24 = vld [vmem:[%s1948_s2] sm:$0xf] }
  0x86   : > { %v1264_v25 = vsel %vm1262_vm5, %v1248_v24, 0 }
  0x87   : > { %1273 = vmatpush.bf16.msra.mxu1 %v1264_v25 }
  0x92   : > { %v243_v56 = vpop.f32.mrf.mxu0 }
  0x93   : > { %1536 = vmatmul.msk.bf16.gmra.mxu2 %vm217_vm1, %v1529_v53  ;;  %v307_v28 = vpop.f32.mrf.mxu1 }
  0x94   : > { %1565 = vmatmul.msk.bf16.gmra.mxu3 %vm217_vm1, %v1558_v54  ;;  %v308_v31 = vadd.f32 %v307_v28, %v243_v56 }
  0x95   : > { %1586 = vmatmul.msk.bf16.gmra.mxu0 %vm217_vm1, %v1190_v55 }
  0x96   : > { %v253_v1 = vpop.f32.mrf.mxu2 }
  0x97   : > { %v317_v2 = vpop.f32.mrf.mxu3 }
  0x98   : > { %v318_v3 = vadd.f32 %v317_v2, %v253_v1 }
  0x9a   : > { %v1885_v4 = vpop.f32.mrf.mxu0 }
  0x9b   : > { %v309_v37 = vpop.f32.mrf.mxu1 }
  0x9c   : > { %v310_v9 = vadd.f32 %v309_v37, %v1885_v4 }
  0x9e   : > { %v255_v13 = vpop.f32.mrf.mxu2 }
  0x9f   : > { %v319_v14 = vpop.f32.mrf.mxu3 }
  0xa0   : > { %v1895_v17 = vadd.f32 %v319_v14, %v255_v13 }
  0xa2   : > { %v248_v20 = vpop.f32.mrf.mxu0 }
  0xa3   : > { %1537 = vmatmul.msk.bf16.gmra.mxu2 %vm217_vm1, %v1533_v15  ;;  %v312_v42 = vpop.f32.mrf.mxu1 }
  0xa4   : > { %1566 = vmatmul.msk.bf16.gmra.mxu3 %vm217_vm1, %v1562_v18  ;;  %v313_v43 = vadd.f32 %v312_v42, %v248_v20 }
  0xa5   : > { %1587 = vmatmul.msk.bf16.gmra.mxu0 %vm217_vm1, %v1191_v19 }
  0xa6   : > { %v258_v16 = vpop.f32.mrf.mxu2 }
  0xa7   : > { %v322_v21 = vpop.f32.mrf.mxu3 }
  0xa8   : > { %v323_v22 = vadd.f32 %v322_v21, %v258_v16 }
  0xaa   : > { %v1900_v23 = vpop.f32.mrf.mxu0 }
  0xab   : > { %v314_v59 = vpop.f32.mrf.mxu1 }
  0xac   : > { %v315_v25 = vadd.f32 %v314_v59, %v1900_v23 }
  0xae   : > { %v260_v26 = vpop.f32.mrf.mxu2 }
  0xaf   : > { %v324_v27 = vpop.f32.mrf.mxu3 }
  0xb0   : > { %v1905_v29 = vadd.f32 %v324_v27, %v260_v26 }
  0xb2   : > { %v662_v30 = vpop.f32.mrf.mxu0 }
  0xb3   : > { %v856_v63 = vpop.f32.mrf.mxu1 }
  0xb6   : > { %v496_v32 = vpop.f32.mrf.mxu2 }
  0xb7   : > { %v516_v33 = vadd.f32 %v496_v32, %v308_v31  ;;  %v579_v34 = vpop.f32.mrf.mxu3 }
  0xb9   : > { %v599_v35 = vadd.f32 %v579_v34, %v516_v33 }
  0xba   : > { %v664_v36 = vpop.f32.mrf.mxu0 }
  0xbb   : > { %v682_v38 = vadd.f32 %v662_v30, %v599_v35 }
  0xbd   : > { %v876_v19 = vadd.f32 %v856_v63, %v682_v38 }
  0xbe   : > { %v498_v39 = vpop.f32.mrf.mxu2 }
  0xbf   : > { %v581_v40 = vpop.f32.mrf.mxu3  ;;  %v517_v11 = vadd.f32 %v498_v39, %v310_v9 }
  0xc1   : > { %v600_v13 = vadd.f32 %v581_v40, %v517_v11 }
  0xc2   : > { %v667_v41 = vpop.f32.mrf.mxu0 }
  0xc3   : > { %v683_v20 = vadd.f32 %v664_v36, %v600_v13 }
  0xc6   : > { %v501_v44 = vpop.f32.mrf.mxu2 }
  0xc7   : > { %v518_v45 = vadd.f32 %v501_v44, %v313_v43  ;;  %v584_v46 = vpop.f32.mrf.mxu3 }
  0xc9   : > { %v601_v47 = vadd.f32 %v584_v46, %v518_v45 }
  0xca   : > { %v669_v48 = vpop.f32.mrf.mxu0 }
  0xcb   : > { %v684_v49 = vadd.f32 %v667_v41, %v601_v47 }
  0xce   : > { %v503_v50 = vpop.f32.mrf.mxu2 }
  0xcf   : > { %v586_v51 = vpop.f32.mrf.mxu3  ;;  %v519_v4 = vadd.f32 %v503_v50, %v315_v25 }
  0xd1   : > { %v602_v35 = vadd.f32 %v586_v51, %v519_v4 }
  0xd2   : > { %v672_v52 = vpop.f32.mrf.mxu0 }
  0xd3   : > { %v685_v40 = vadd.f32 %v669_v48, %v602_v35 }
  0xd6   : > { %v506_v53 = vpop.f32.mrf.mxu2 }
  0xd7   : > { %v520_v54 = vadd.f32 %v506_v53, %v318_v3  ;;  %v589_v55 = vpop.f32.mrf.mxu3  ;;  %v858_v3 = vpop.f32.mrf.mxu1 }
  0xd9   : > { %v603_v56 = vadd.f32 %v589_v55, %v520_v54 }
  0xda   : > { %v1907_v57 = vpop.f32.mrf.mxu0 }
  0xdb   : > { %v1909_v58 = vadd.f32 %v672_v52, %v603_v56 }
  0xde   : > { %v508_v60 = vpop.f32.mrf.mxu2 }
  0xdf   : > { %v591_v61 = vpop.f32.mrf.mxu3  ;;  %v861_v18 = vpop.f32.mrf.mxu1  ;;  %v521_v50 = vadd.f32 %v508_v60, %v1895_v17 }
  0xe0   : > { %v878_v39 = vadd.f32 %v861_v18, %v684_v49 }
  0xe1   : > { %v604_v55 = vadd.f32 %v591_v61, %v521_v50 }
  0xe2   : > { %v677_v62 = vpop.f32.mrf.mxu0 }
  0xe3   : > { %v687_v63 = vadd.f32 %v1907_v57, %v604_v55 }
  0xe6   : > { %v511_v0 = vpop.f32.mrf.mxu2 }
  0xe7   : > { %v522_v1 = vadd.f32 %v511_v0, %v323_v22  ;;  %v594_v2 = vpop.f32.mrf.mxu3  ;;  %v877_v22 = vadd.f32 %v858_v3, %v683_v20  ;;  %v863_v32 = vpop.f32.mrf.mxu1 }
  0xe8   : > { %v879_v43 = vadd.f32 %v863_v32, %v685_v40 }
  0xe9   : > { %v605_v5 = vadd.f32 %v594_v2, %v522_v1 }
  0xea   : > { %v1911_v6 = vpop.f32.mrf.mxu0 }
  0xeb   : > { %v1913_v7 = vadd.f32 %v677_v62, %v605_v5 }
  0xee   : > { %v513_v8 = vpop.f32.mrf.mxu2 }
  0xef   : > { %v1916_v10 = vpop.f32.mrf.mxu3  ;;  %v866_v42 = vpop.f32.mrf.mxu1  ;;  %v523_v61 = vadd.f32 %v513_v8, %v1905_v29 }
  0xf0   : > { %v880_v48 = vadd.f32 %v866_v42, %v1909_v58 }
  0xf2   : > { %v1216_v12 = vpop.f32.mrf.mxu0 }
  0xf6   : > { %v939_v14 = vpop.f32.mrf.mxu2 }
  0xf7   : > { %v1022_v15 = vpop.f32.mrf.mxu3  ;;  %v959_v21 = vadd.f32 %v939_v14, %v876_v19  ;;  %v868_v59 = vpop.f32.mrf.mxu1  ;;  %v606_v14 = vadd.f32 %v1916_v10, %v523_v61 }
  0xf8   : > { %v881_v1 = vadd.f32 %v868_v59, %v687_v63 }
  0xf9   : > { %v1042_v26 = vadd.f32 %v1022_v15, %v959_v21  ;;  %v689_v20 = vadd.f32 %v1911_v6, %v606_v14 }
  0xfa   : > { %v1218_v16 = vpop.f32.mrf.mxu0 }
  0xfb   : > { %v1236_v33 = vadd.f32 %v1216_v12, %v1042_v26 }
  0xfe   : > { %v941_v24 = vpop.f32.mrf.mxu2 }
  0xff   : > { %v960_v27 = vadd.f32 %v941_v24, %v877_v22  ;;  %v1024_v28 = vpop.f32.mrf.mxu3  ;;  %v871_v9 = vpop.f32.mrf.mxu1 }
 0x100   : > { %v882_v19 = vadd.f32 %v871_v9, %v1913_v7 }
 0x101   : > { %v1043_v30 = vadd.f32 %v1024_v28, %v960_v27 }
 0x102   : > { %v1221_v31 = vpop.f32.mrf.mxu0 }
 0x103   : > { %v1237_v34 = vadd.f32 %v1218_v16, %v1043_v30 }
 0x105   : > { %v1244_v37 = vpack.c.bf16 %v1237_v34, %v1236_v33 }
 0x106   : > { %v944_v38 = vpop.f32.mrf.mxu2 }
 0x107   : > { %v1027_v36 = vpop.f32.mrf.mxu3  ;;  %1588 = vmatmul.msk.bf16.vlgmr.msra.gmra.mxu1 %vm1249_vm6, %v1244_v37  ;;  %v961_v23 = vadd.f32 %v944_v38, %v878_v39  ;;  %v873_v16 = vpop.f32.mrf.mxu1 }
 0x108   : > { %v883_v29 = vadd.f32 %v873_v16, %v689_v20 }
 0x109   : > { %v1044_v45 = vadd.f32 %v1027_v36, %v961_v23 }
 0x10a   : > { %v1223_v41 = vpop.f32.mrf.mxu0 }
 0x10b   : > { %v1238_v53 = vadd.f32 %v1221_v31, %v1044_v45 }
 0x10e   : > { %v946_v44 = vpop.f32.mrf.mxu2 }
 0x10f   : > { %v962_v46 = vadd.f32 %v946_v44, %v879_v43  ;;  %v1029_v47 = vpop.f32.mrf.mxu3 }
 0x111   : > { %v1045_v52 = vadd.f32 %v1029_v47, %v962_v46 }
 0x112   : > { %v1226_v54 = vpop.f32.mrf.mxu0 }
 0x113   : > { %v1239_v51 = vadd.f32 %v1223_v41, %v1045_v52 }
 0x115   : > { %v1245_v56 = vpack.c.bf16 %v1239_v51, %v1238_v53 }
 0x116   : > { %v949_v62 = vpop.f32.mrf.mxu2 }
 0x117   : > { %v1032_v49 = vpop.f32.mrf.mxu3  ;;  %1589 = vmatmul.msk.bf16.gmra.mxu1 %vm1249_vm6, %v1245_v56  ;;  %v963_v0 = vadd.f32 %v949_v62, %v880_v48 }
 0x119   : > { %v1046_v17 = vadd.f32 %v1032_v49, %v963_v0 }
 0x11a   : > { %v1228_v2 = vpop.f32.mrf.mxu0 }
 0x11b   : > { %v1240_v12 = vadd.f32 %v1226_v54, %v1046_v17 }
 0x11e   : > { %v951_v5 = vpop.f32.mrf.mxu2 }
 0x11f   : > { %v964_v60 = vadd.f32 %v951_v5, %v881_v1  ;;  %v1034_v3 = vpop.f32.mrf.mxu3 }
 0x121   : > { %v1047_v11 = vadd.f32 %v1034_v3, %v964_v60 }
 0x122   : > { %v1231_v57 = vpop.f32.mrf.mxu0 }
 0x123   : > { %v1241_v13 = vadd.f32 %v1228_v2, %v1047_v11 }
 0x125   : > { %v1246_v15 = vpack.c.bf16 %v1241_v13, %v1240_v12 }
 0x126   : > { %v954_v18 = vpop.f32.mrf.mxu2 }
 0x127   : > { %v1037_v58 = vpop.f32.mrf.mxu3  ;;  %1590 = vmatmul.msk.bf16.gmra.mxu1 %vm1249_vm6, %v1246_v15  ;;  %v965_v21 = vadd.f32 %v954_v18, %v882_v19 }
 0x129   : > { %v1048_v22 = vadd.f32 %v1037_v58, %v965_v21 }
 0x12a   : > { %v1233_v26 = vpop.f32.mrf.mxu0 }
 0x12b   : > { %v1242_v27 = vadd.f32 %v1231_v57, %v1048_v22 }
 0x12e   : > { %v956_v8 = vpop.f32.mrf.mxu2 }
 0x12f   : > { %v966_v24 = vadd.f32 %v956_v8, %v883_v29  ;;  %v1039_v25 = vpop.f32.mrf.mxu3 }
 0x131   : > { %v1049_v10 = vadd.f32 %v1039_v25, %v966_v24 }
 0x133   : > { %v1243_v28 = vadd.f32 %v1233_v26, %v1049_v10 }
 0x135   : > { %v1247_v4 = vpack.c.bf16 %v1243_v28, %v1242_v27 }
 0x137   : > { %1591 = vmatmul.msk.bf16.gmra.mxu1 %vm1249_vm6, %v1247_v4 }
 0x184   : > { %v1275_v6 = vpop.f32.mrf.mxu1 }
 0x185   : > { %v1295_v7 = vpack.c.bf16 %v1275_v6, %v1275_v6 }
 0x187   : > { %1304 = vst.msk [vmem:[%s175_s17] sm:$0xf] %vm1303_vm7, %v1295_v7 }
 0x18c   : > { %v1277_v30 = vpop.f32.mrf.mxu1 }
 0x18d   : > { %v1296_v31 = vpack.c.bf16 %v1277_v30, %v1277_v30 }
 0x18f   : > { %1305 = vst.msk [vmem:[%s175_s17 + $0x4] sm:$0xf] %vm1303_vm7, %v1296_v31 }
 0x194   : > { %v1280_v32 = vpop.f32.mrf.mxu1 }
 0x195   : > { %v1297_v33 = vpack.c.bf16 %v1280_v32, %v1280_v32 }
 0x197   : > { %1306 = vst.msk [vmem:[%s175_s17 + $0x8] sm:$0xf] %vm1303_vm7, %v1297_v33 }
 0x19c   : > { %v1282_v34 = vpop.f32.mrf.mxu1 }
 0x19d   : > { %v1298_v35 = vpack.c.bf16 %v1282_v34, %v1282_v34 }
 0x19f   : > { %1307 = vst.msk [vmem:[%s175_s17 + $0xc] sm:$0xf] %vm1303_vm7, %v1298_v35 }
 0x1a4   : > { %v1285_v37 = vpop.f32.mrf.mxu1 }
 0x1a5   : > { %v1299_v38 = vpack.c.bf16 %v1285_v37, %v1285_v37 }
 0x1a7   : > { %1308 = vst.msk [vmem:[%s175_s17 + $0x10] sm:$0xf] %vm1303_vm7, %v1299_v38 }
 0x1ac   : > { %v1287_v36 = vpop.f32.mrf.mxu1 }
 0x1ad   : > { %v1300_v39 = vpack.c.bf16 %v1287_v36, %v1287_v36 }
 0x1af   : > { %1309 = vst.msk [vmem:[%s175_s17 + $0x14] sm:$0xf] %vm1303_vm7, %v1300_v39 }
 0x1b4   : > { %v1290_v40 = vpop.f32.mrf.mxu1 }
 0x1b5   : > { %v1301_v41 = vpack.c.bf16 %v1290_v40, %v1290_v40 }
 0x1b7   : > { %1310 = vst.msk [vmem:[%s175_s17 + $0x18] sm:$0xf] %vm1303_vm7, %v1301_v41 }
 0x1bc   : > { %v1292_v23 = vpop.f32.mrf.mxu1 }
 0x1bd   : > { %v1302_v42 = vpack.c.bf16 %v1292_v23, %v1292_v23 }
 0x1bf   : > { %1311 = vst.msk [vmem:[%s175_s17 + $0x1c] sm:$0xf] %vm1303_vm7, %v1302_v42 }
 0x1c0 PF: > { %s13_s12 = sadd.s32 1, %s1636_s12  }
 0x1c1   : > { %p10_p5 = scmp.ge.s32.totalorder %s13_s12, 4  }
 0x1c3   :  { %12 = sbr.rel (!%p10_p5) target bundleno = 1 (0x1), region = 75 }

// kernel: resblock_forward.4
= control target key start
LH: loop header
LB: loop body
LE: loop exit
PB: predicated region body
PF: predicated region fallthrough
CT: control target
= control target key end

     0   :  { %s3265_s24 = smov 0   ;;  %s4105_s0 = inlined_call_operand.vmem [shape: bf16[2,10,10,8], index: 0, kind: input, shape index: {}]   ;;  %s4106_s1 = inlined_call_operand.vmem [shape: bf16[9,8,8], index: 1, kind: input, shape index: {}]   ;;  %s4107_s2 = inlined_call_operand.vmem [shape: bf16[8,9,9,4], index: 2, kind: input, shape index: {}]   ;;  %s4108_s3 = inlined_call_operand.vmem [shape: bf16[9,4,8], index: 3, kind: input, shape index: {}]   ;;  %s4109_s4 = inlined_call_operand.vmem [shape: f32[1,8], index: 4, kind: input, shape index: {}]   ;;  %s4110_s5 = inlined_call_operand.vmem [shape: f32[2,64,8], index: 5, kind: output, shape index: {0}]   ;;  %s4111_s6 = inlined_call_operand.vmem [shape: f32[2,1,8], index: 6, kind: output, shape index: {1}]   ;;  %s4112_s7 = inlined_call_operand.vmem [shape: f32[2,1,8], index: 7, kind: output, shape index: {2}]  }
   0x1 LB: > { %s3271_s25 = sadd.s32 4294967295, %s3223_s24   ;;  %p2767_p0 = scmp.ge.s32.totalorder %s3223_s24, 1  ;;  %s3223_s24 = sphi %s3265_s24, %s18_s24  }
   0x2   : > { %p254_p1 = scmp.lt.s32.totalorder %s3223_s24, 3 }
   0x4   : > { %p255_p2 = pnand %p2767_p0, %p254_p1 }
   0x5   : > { %p298_p3 = scmp.lt.s32.totalorder (!%p255_p2), %s3271_s25, 1  ;;  %s2769_s10 = sshll.u32 (!%p255_p2), %s3271_s25, 2 }
   0x6   : > { %258 = sbr.rel (%p255_p2) target bundleno = 474 (0x1da), region = 40  ;;  %p3551_p4 = scmp.lt.s32.totalorder (!%p255_p2), %s2769_s10, 7 }
   0xb   : > { %v330_v0 = vld [vmem:[%s4106_s1] sm:$0xf]  ;;  %vm481_vm0 = vcmask 1043456   ;;  %v2773_v2 = vld [vmem:[%s4106_s1 + $0x4] sm:$0xf]  ;;  %s3284_s30 = scalar_select %p298_p3, %s3271_s25, 1 }
   0xc   : > { %v547_v1 = vsel %vm481_vm0, %v330_v0, 0  ;;  %v483_v3 = vsel %vm481_vm0, %v2773_v2, 0  ;;  %v2806_v4 = vld [vmem:[%s4106_s1 + $0x8] sm:$0xf]  ;;  %v2819_v6 = vld [vmem:[%s4106_s1 + $0xc] sm:$0xf] }
   0xd   : > { %3205 = vmatpush.bf16.msra.mxu3 %v547_v1  ;;  %556 = vmatpush.bf16.msra.mxu1 %v547_v1  ;;  %v664_v5 = vsel %vm481_vm0, %v2806_v4, 0  ;;  %v2856_v7 = vld [vmem:[%s4106_s1 + $0x10] sm:$0xf]  ;;  %s3206_s14 = smul.u32 80, %s3284_s30  ;;  %v747_v8 = vsel %vm481_vm0, %v2819_v6, 0  ;;  %vm468_vm1 = vcmask 64512   ;;  %s317_s17 = scalar_lea.vmem %s4111_s6, %s3284_s30 }
   0xe   : > { %3204 = vmatpush.bf16.msra.mxu2 %v483_v3  ;;  %492 = vmatpush.bf16.msra.mxu0 %v483_v3  ;;  %v941_v9 = vsel %vm481_vm0, %v2856_v7, 0  ;;  %v2877_v10 = vld [vmem:[%s4106_s1 + $0x14] sm:$0xf]  ;;  %vm339_vm2 = vsmask.f32 3328  ;;  %vm602_vm5 = vcmask 1042432   ;;  %s320_s20 = scalar_lea.vmem %s4112_s7, %s3284_s30 }
   0xf   : > { %v1063_v11 = vsel %vm481_vm0, %v2877_v10, 0  ;;  %s3307_s19 = scalar_lea.vmem %s4105_s0, %s3206_s14  ;;  %vm340_vm3 = vsmask.f32 7440  ;;  %vm603_vm6 = vcmask 1046532   ;;  %vm1554_vm8 = vcmask 1041408   ;;  %s4119_s10 = smov (!%p3551_p4, %s2769_s10), 7 }
  0x10   : > { %v2788_v12 = vld [vmem:[%s3307_s19 + $0x20] sm:$0xf]  ;;  %v3170_v13 = vld [vmem:[%s3307_s19 + $0x24] sm:$0xf0]  ;;  %v3314_v17 = vld [vmem:[%s3307_s19 + $0x24] sm:$0x1] }
  0x11   : > { %756 = vmatpush.bf16.msrb.mxu3 %v747_v8  ;;  %1072 = vmatpush.bf16.msrb.mxu1 %v1063_v11  ;;  %v326_v14 = vld [vmem:[%s3307_s19 + $0x20] sm:$0xf]  ;;  %v2789_v15 = vor.u32 %v3170_v13, %v2788_v12  ;;  %v327_v16 = vld [vmem:[%s3307_s19 + $0x28] sm:$0xf]  ;;  %v3317_v18 = vld [vmem:[%s3307_s19 + $0x2c] sm:$0x1] }
  0x12   : > { %673 = vmatpush.bf16.msrb.mxu2 %v664_v5  ;;  %950 = vmatpush.bf16.msrb.mxu0 %v941_v9  ;;  %v399_v19 = vshrl.u32 %v326_v14, 16  ;;  %v402_v20 = vshll.u32 %v326_v14, 16  ;;  %v408_v21 = vshll.u32 %v3314_v17, 16  ;;  %v413_v22 = vshrl.u32 %v327_v16, 16  ;;  %v322_v23 = vld [vmem:[%s3307_s19] sm:$0xf]  ;;  %vm3335_vm4 = vmor %vm339_vm2, %vm340_vm3 }
  0x13   : > { %2796 = vmatmul.msk.bf16.vlgmr.msra.gmra.mxu3 %vm468_vm1, %v2789_v15  ;;  %v416_v24 = vshll.u32 %v327_v16, 16  ;;  %v422_v25 = vshll.u32 %v3317_v18, 16  ;;  %v323_v26 = vld [vmem:[%s3307_s19 + $0x8] sm:$0xf]  ;;  %v3325_v27 = vld [vmem:[%s3307_s19 + $0x4] sm:$0x1]  ;;  %vm3413_vm7 = vmor %vm602_vm5, %vm603_vm6 }
  0x14   : > { %v401_v28 = vrot.slane %v399_v19, 4  ;;  %v404_v29 = vrot.slane %v402_v20, 5  ;;  %v410_v30 = vrot.slane %v408_v21, 5  ;;  %v415_v31 = vrot.slane %v413_v22, 4  ;;  %v3328_v32 = vld [vmem:[%s3307_s19 + $0xc] sm:$0x1] }
  0x15   : > { %v418_v33 = vrot.slane %v416_v24, 5  ;;  %v424_v34 = vrot.slane %v422_v25, 5  ;;  %v343_v35 = vshrl.u32 %v322_v23, 16  ;;  %v346_v36 = vshll.u32 %v322_v23, 16  ;;  %v2780_v37 = vld [vmem:[%s3307_s19] sm:$0xf] }
  0x16   : > { %v405_v38 = vor.u32 %v404_v29, %v401_v28  ;;  %v352_v39 = vshll.u32 %v3325_v27, 16  ;;  %v357_v40 = vshrl.u32 %v323_v26, 16  ;;  %v360_v41 = vshll.u32 %v323_v26, 16  ;;  %v3168_v42 = vld [vmem:[%s3307_s19 + $0x4] sm:$0xf0]  ;;  %s3207_s18 = smul.u32 72, %s4119_s10 }
  0x17   : > { %v419_v44 = vor.u32 %v418_v33, %v415_v31  ;;  %v345_v45 = vrot.slane %v343_v35, 4  ;;  %v348_v46 = vrot.slane %v346_v36, 5  ;;  %v366_v47 = vshll.u32 %v3328_v32, 16  ;;  %v2792_v48 = vld [vmem:[%s3307_s19 + $0x30] sm:$0xf]  ;;  %s3167_s9 = sshll.u32 %s3284_s30, 6 }
  0x18   : > { %v406_v49 = vrot.slane %v405_v38, 4  ;;  %v359_v50 = vrot.slane %v357_v40, 4  ;;  %v362_v51 = vrot.slane %v360_v41, 5  ;;  %v3171_v52 = vld [vmem:[%s3307_s19 + $0x34] sm:$0xf0]  ;;  %v354_v55 = vrot.slane %v352_v39, 5  ;;  %s3587_s21 = scalar_lea.vmem %s4107_s2, %s3207_s18  ;;  %s4025_s14 = scalar_lea.vmem %s4110_s5, %s3167_s9 }
  0x19   : > { %v420_v53 = vrot.slane %v419_v44, 4  ;;  %v349_v54 = vor.u32 %v348_v46, %v345_v45  ;;  %v328_v56 = vld [vmem:[%s3307_s19 + $0x30] sm:$0xf]  ;;  %v368_v59 = vrot.slane %v366_v47, 5  ;;  %v2781_v60 = vor.u32 %v3168_v42, %v2780_v37  ;;  %v329_v61 = vld [vmem:[%s3307_s19 + $0x38] sm:$0xf] }
  0x1a   : > { %v411_v57 = vsel %vm3335_vm4, %v406_v49, %v410_v30  ;;  %v363_v58 = vor.u32 %v362_v51, %v359_v50  ;;  %v3347_v62 = vld [vmem:[%s3307_s19 + $0x34] sm:$0x1]  ;;  %v2793_v2 = vor.u32 %v3171_v52, %v2792_v48  ;;  %v3353_v5 = vld [vmem:[%s3307_s19 + $0x3c] sm:$0x1]  ;;  %v427_v6 = vshrl.u32 %v328_v56, 16 }
  0x1b   : > { %v425_v63 = vsel %vm3335_vm4, %v420_v53, %v424_v34  ;;  %v460_v0 = vunpack.c.l.b16 %v411_v57  ;;  %v350_v1 = vrot.slane %v349_v54, 4  ;;  %2794 = vmatmul.msk.bf16.vlgmr.msra.gmra.mxu1 %vm468_vm1, %v2781_v60  ;;  %v430_v7 = vshll.u32 %v328_v56, 16  ;;  %v324_v12 = vld [vmem:[%s3307_s19 + $0x10] sm:$0xf]  ;;  %v325_v19 = vld [vmem:[%s3307_s19 + $0x18] sm:$0xf] }
  0x1c   : > { %v461_v3 = vunpack.c.l.b16 %v425_v63  ;;  %v364_v4 = vrot.slane %v363_v58, 4  ;;  %v436_v9 = vshll.u32 %v3347_v62, 16  ;;  %v441_v10 = vshrl.u32 %v329_v61, 16  ;;  %v3363_v20 = vld [vmem:[%s3307_s19 + $0x14] sm:$0x1] }
  0x1d   : > { %v355_v8 = vsel %vm3335_vm4, %v350_v1, %v354_v55  ;;  %v444_v11 = vshll.u32 %v329_v61, 16  ;;  %v429_v16 = vrot.slane %v427_v6, 4  ;;  %v432_v22 = vrot.slane %v430_v7, 5  ;;  %v3368_v33 = vld [vmem:[%s3307_s19 + $0x1c] sm:$0x1] }
  0x1e   : > { %v466_v13 = vpack.c.b16 %v461_v3, %v460_v0  ;;  %v369_v14 = vsel %vm3335_vm4, %v364_v4, %v368_v59  ;;  %v456_v15 = vunpack.c.l.b16 %v355_v8  ;;  %v438_v23 = vrot.slane %v436_v9, 5  ;;  %v2784_v44 = vld [vmem:[%s3307_s19 + $0x10] sm:$0xf]  ;;  %v3169_v49 = vld [vmem:[%s3307_s19 + $0x14] sm:$0xf0] }
  0x1f   : > { %v457_v21 = vunpack.c.l.b16 %v369_v14  ;;  %v443_v24 = vrot.slane %v441_v10, 4  ;;  %v446_v25 = vrot.slane %v444_v11, 5  ;;  %v450_v26 = vshll.u32 %v3353_v5, 16  ;;  %v2890_v52 = vld [vmem:[%s4106_s1 + $0x18] sm:$0xf] }
  0x20   : > { %2776 = vmatmul.msk.bf16.vlgmr.msra.gmra.mxu2 %vm468_vm1, %v466_v13  ;;  %v371_v28 = vshrl.u32 %v324_v12, 16  ;;  %v374_v29 = vshll.u32 %v324_v12, 16  ;;  %v433_v31 = vor.u32 %v432_v22, %v429_v16  ;;  %v380_v34 = vshll.u32 %v3363_v20, 16  ;;  %v2840_v53 = vld [vmem:[%s3307_s19 + $0x8] sm:$0xf] }
  0x21   : > { %v464_v30 = vpack.c.b16 %v457_v21, %v456_v15  ;;  %v385_v35 = vshrl.u32 %v325_v19, 16  ;;  %v447_v36 = vor.u32 %v446_v25, %v443_v24  ;;  %v452_v37 = vrot.slane %v450_v26, 5  ;;  %v3386_v57 = vld [vmem:[%s3307_s19 + $0x8] sm:$0xf]  ;;  %v3172_v58 = vld [vmem:[%s3307_s19 + $0xc] sm:$0xf0] }
  0x22   : > { %v373_v38 = vrot.slane %v371_v28, 4  ;;  %v376_v39 = vrot.slane %v374_v29, 5  ;;  %v434_v40 = vrot.slane %v433_v31, 4  ;;  %v388_v42 = vshll.u32 %v325_v19, 16  ;;  %v2842_v3 = vld [vmem:[%s3307_s19 + $0x10] sm:$0xf] }
  0x23   : > { %2774 = vmatmul.msk.bf16.vlgmr.msra.gmra.mxu0 %vm468_vm1, %v464_v30  ;;  %2797 = vmatmul.msk.bf16.gmra.mxu3 %vm468_vm1, %v2793_v2  ;;  %v387_v41 = vrot.slane %v385_v35, 4  ;;  %v448_v45 = vrot.slane %v447_v36, 4  ;;  %v382_v47 = vrot.slane %v380_v34, 5  ;;  %v394_v48 = vshll.u32 %v3368_v33, 16  ;;  %v578_v2 = vld [vmem:[%s3307_s19] sm:$0xe] }
  0x24   : > { %v377_v46 = vor.u32 %v376_v39, %v373_v38  ;;  %v439_v50 = vsel %vm3335_vm4, %v434_v40, %v438_v23  ;;  %v390_v51 = vrot.slane %v388_v42, 5  ;;  %v607_v54 = vrot.slane %v3325_v27, 5  ;;  %v579_v9 = vld [vmem:[%s3307_s19 + $0x8] sm:$0xe]  ;;  %v2841_v10 = vld [vmem:[%s3307_s19 + $0xc] sm:$0x1] }
  0x25   : > { %v453_v55 = vsel %vm3335_vm4, %v448_v45, %v452_v37  ;;  %v462_v59 = vunpack.c.l.b16 %v439_v50  ;;  %v396_v61 = vrot.slane %v394_v48, 5  ;;  %v2785_v63 = vor.u32 %v3169_v49, %v2784_v44  ;;  %v2927_v14 = vld [vmem:[%s4106_s1 + $0x1c] sm:$0xf]  ;;  %v2843_v16 = vld [vmem:[%s3307_s19 + $0x14] sm:$0x1] }
  0x26   : > { %v378_v56 = vrot.slane %v377_v46, 4  ;;  %v391_v60 = vor.u32 %v390_v51, %v387_v41  ;;  %v463_v0 = vunpack.c.l.b16 %v453_v55  ;;  %v1146_v27 = vsel %vm481_vm0, %v2890_v52, 0  ;;  %v2861_v25 = vld [vmem:[%s3307_s19 + $0x8] sm:$0xe]  ;;  %v2862_v26 = vld [vmem:[%s3307_s19 + $0x10] sm:$0xe] }
  0x27   : > { %v803_v4 = vshrl.u32 %v2840_v53, 16  ;;  %v611_v6 = vrot.slane %v3328_v32, 5  ;;  %v2823_v8 = vor.u32 %v3172_v58, %v3386_v57  ;;  %1155 = vmatpush.bf16.msra.mxu2 %v1146_v27  ;;  %v806_v13 = vshll.u32 %v2840_v53, 16  ;;  %v2948_v34 = vld [vmem:[%s4106_s1 + $0x20] sm:$0xf] }
  0x28   : > { %v383_v1 = vsel %vm3335_vm4, %v378_v56, %v382_v47  ;;  %v392_v7 = vrot.slane %v391_v60, 4  ;;  %v2798_v32 = vrot.slane %v578_v2, 9  ;;  %v817_v19 = vshrl.u32 %v2842_v3, 16  ;;  %v2961_v47 = vld [vmem:[%s4108_s3 + $0x2] sm:$0x3] }
  0x29   : > { %v458_v11 = vunpack.c.l.b16 %v383_v1  ;;  %v805_v12 = vrot.slane %v803_v4, 4  ;;  %v467_v21 = vpack.c.b16 %v463_v0, %v462_v59  ;;  %v808_v23 = vrot.slane %v806_v13, 5  ;;  %v2844_v58 = vld [vmem:[%s3307_s19 + $0x18] sm:$0xf]  ;;  %v2846_v60 = vld [vmem:[%s3307_s19 + $0x20] sm:$0xf] }
  0x2a   : > { %v397_v15 = vsel %vm3335_vm4, %v392_v7, %v396_v61  ;;  %v820_v24 = vshll.u32 %v2842_v3, 16  ;;  %v2799_v28 = vrot.slane %v579_v9, 9  ;;  %v812_v29 = vshll.u32 %v2841_v10, 16  ;;  %v2826_v0 = vld [vmem:[%s3307_s19 + $0x18] sm:$0xf] }
  0x2b   : > { %v459_v22 = vunpack.c.l.b16 %v397_v15  ;;  %2795 = vmatmul.msk.bf16.gmra.mxu1 %vm468_vm1, %v2785_v63  ;;  %v819_v30 = vrot.slane %v817_v19, 4  ;;  %v1340_v31 = vsel %vm481_vm0, %v2927_v14, 0  ;;  %v809_v36 = vor.u32 %v808_v23, %v805_v12  ;;  %v3173_v1 = vld [vmem:[%s3307_s19 + $0x1c] sm:$0xf0]  ;;  %v580_v4 = vld [vmem:[%s3307_s19 + $0x10] sm:$0xe] }
  0x2c   : > { %v822_v37 = vrot.slane %v820_v24, 5  ;;  %v826_v38 = vshll.u32 %v2843_v16, 16  ;;  %1349 = vmatpush.bf16.msra.mxu3 %v1340_v31  ;;  %v2869_v40 = vrot.slane %v2861_v25, 9  ;;  %v1006_v41 = vrot.slane %v2841_v10, 5  ;;  %v582_v10 = vld [vmem:[%s3307_s19 + $0x20] sm:$0xe] }
  0x2d   : > { %v465_v35 = vpack.c.b16 %v459_v22, %v458_v11  ;;  %v2870_v42 = vrot.slane %v2862_v26, 9  ;;  %v1010_v44 = vrot.slane %v2843_v16, 5  ;;  %v1462_v46 = vsel %vm481_vm0, %v2948_v34, 0  ;;  %v2863_v13 = vld [vmem:[%s3307_s19 + $0x18] sm:$0xe] }
  0x2e   : > { %v823_v45 = vor.u32 %v822_v37, %v819_v30  ;;  %v1007_v48 = vsel %vm3413_vm7, %v2869_v40, %v1006_v41  ;;  %1471 = vmatpush.bf16.msra.mxu0 %v1462_v46  ;;  %v608_v50 = vsel %vm3413_vm7, %v2798_v32, %v607_v54  ;;  %v612_v51 = vsel %vm3413_vm7, %v2799_v28, %v611_v6  ;;  %v583_v14 = vld [vmem:[%s3307_s19 + $0x28] sm:$0xe]  ;;  %v581_v16 = vld [vmem:[%s3307_s19 + $0x18] sm:$0xe]  ;;  %v2864_v22 = vld [vmem:[%s3307_s19 + $0x20] sm:$0xe] }
  0x2f   : > { %v1011_v49 = vsel %vm3413_vm7, %v2870_v42, %v1010_v44  ;;  %v814_v52 = vrot.slane %v812_v29, 5  ;;  %v810_v53 = vrot.slane %v809_v36, 4  ;;  %v828_v56 = vrot.slane %v826_v38, 5  ;;  %v2845_v23 = vld [vmem:[%s3307_s19 + $0x1c] sm:$0x1] }
  0x30   : > { %2777 = vmatmul.msk.bf16.gmra.mxu2 %vm468_vm1, %v467_v21  ;;  %v824_v55 = vrot.slane %v823_v45, 4  ;;  %v1556_v57 = vsel %vm1554_vm8, %v2961_v47, 0  ;;  %v1038_v59 = vunpack.c.l.b16 %v1007_v48  ;;  %v1039_v54 = vunpack.c.l.b16 %v1011_v49  ;;  %v2847_v29 = vld [vmem:[%s3307_s19 + $0x24] sm:$0x1] }
  0x31   : > { %1565 = vmatpush.bf16.msra.mxu1 %v1556_v57  ;;  %v639_v61 = vunpack.c.l.b16 %v608_v50  ;;  %v640_v63 = vunpack.c.l.b16 %v612_v51  ;;  %v831_v2 = vshrl.u32 %v2844_v58, 16  ;;  %v815_v27 = vsel %vm3335_vm4, %v810_v53, %v814_v52  ;;  %v2848_v52 = vld [vmem:[%s3307_s19 + $0x28] sm:$0xf] }
  0x32   : > { %v829_v3 = vsel %vm3335_vm4, %v824_v55, %v828_v56  ;;  %v834_v6 = vshll.u32 %v2844_v58, 16  ;;  %v845_v7 = vshrl.u32 %v2846_v60, 16  ;;  %v848_v9 = vshll.u32 %v2846_v60, 16  ;;  %v2850_v58 = vld [vmem:[%s3307_s19 + $0x30] sm:$0xf] }
  0x33   : > { %2775 = vmatmul.msk.bf16.gmra.mxu0 %vm468_vm1, %v465_v35  ;;  %2836 = vmatmul.msk.bf16.vlgmr.msrb.gmra.mxu3 %vm468_vm1, %v2823_v8  ;;  %v1046_v8 = vpack.c.b16 %v1039_v54, %v1038_v59  ;;  %v647_v11 = vpack.c.b16 %v640_v63, %v639_v61  ;;  %v2827_v12 = vor.u32 %v3173_v1, %v2826_v0  ;;  %v916_v15 = vunpack.c.l.b16 %v815_v27  ;;  %v584_v63 = vld [vmem:[%s3307_s19 + $0x30] sm:$0xe] }
  0x34   : > { %v917_v32 = vunpack.c.l.b16 %v829_v3  ;;  %v2800_v19 = vrot.slane %v580_v4, 9  ;;  %v833_v21 = vrot.slane %v831_v2, 4  ;;  %v836_v24 = vrot.slane %v834_v6, 5  ;;  %v585_v2 = vld [vmem:[%s3307_s19 + $0x38] sm:$0xe] }
  0x35   : > { %v847_v25 = vrot.slane %v845_v7, 4  ;;  %v2802_v26 = vrot.slane %v582_v10, 9  ;;  %v623_v28 = vrot.slane %v3314_v17, 5  ;;  %v850_v30 = vrot.slane %v848_v9, 5 }
  0x36   : > { %v2871_v31 = vrot.slane %v2863_v13, 9  ;;  %v1014_v34 = vrot.slane %v2845_v23, 5  ;;  %v2803_v35 = vrot.slane %v583_v14, 9  ;;  %v2872_v36 = vrot.slane %v2864_v22, 9  ;;  %v2865_v14 = vld [vmem:[%s3307_s19 + $0x28] sm:$0xe] }
  0x37   : > { %v1018_v37 = vrot.slane %v2847_v29, 5  ;;  %v624_v38 = vsel %vm3413_vm7, %v2802_v26, %v623_v28  ;;  %v627_v40 = vrot.slane %v3317_v18, 5  ;;  %v615_v41 = vrot.slane %v3363_v20, 5 }
  0x38   : > { %v2801_v42 = vrot.slane %v581_v16, 9  ;;  %v619_v17 = vrot.slane %v3368_v33, 5  ;;  %v643_v44 = vunpack.c.l.b16 %v624_v38  ;;  %v924_v45 = vpack.c.b16 %v917_v32, %v916_v15  ;;  %v2866_v16 = vld [vmem:[%s3307_s19 + $0x30] sm:$0xe] }
  0x39   : > { %v840_v46 = vshll.u32 %v2845_v23, 16  ;;  %v854_v47 = vshll.u32 %v2847_v29, 16  ;;  %v628_v48 = vsel %vm3413_vm7, %v2803_v35, %v627_v40  ;;  %v837_v49 = vor.u32 %v836_v24, %v833_v21  ;;  %v2849_v21 = vld [vmem:[%s3307_s19 + $0x2c] sm:$0x1]  ;;  %v2830_v29 = vld [vmem:[%s3307_s19 + $0x28] sm:$0xf] }
  0x3a   : > { %v851_v50 = vor.u32 %v850_v30, %v847_v25  ;;  %v644_v51 = vunpack.c.l.b16 %v628_v48  ;;  %v1015_v18 = vsel %vm3413_vm7, %v2871_v31, %v1014_v34  ;;  %v1019_v20 = vsel %vm3413_vm7, %v2872_v36, %v1018_v37  ;;  %v2851_v30 = vld [vmem:[%s3307_s19 + $0x34] sm:$0x1]  ;;  %v3174_v34 = vld [vmem:[%s3307_s19 + $0x2c] sm:$0xf0] }
  0x3b   : > { %2878 = vmatmul.msk.bf16.vlgmr.msrb.gmra.mxu1 %vm468_vm1, %v1046_v8  ;;  %v616_v53 = vsel %vm3413_vm7, %v2800_v19, %v615_v41  ;;  %v620_v55 = vsel %vm3413_vm7, %v2801_v42, %v619_v17  ;;  %v842_v56 = vrot.slane %v840_v46, 5  ;;  %v856_v57 = vrot.slane %v854_v47, 5 }
  0x3c   : > { %v3463_v33 = vpack.c.b16 %v644_v51, %v643_v44  ;;  %v838_v59 = vrot.slane %v837_v49, 4  ;;  %v852_v54 = vrot.slane %v851_v50, 4  ;;  %v1040_v60 = vunpack.c.l.b16 %v1015_v18  ;;  %v2852_v18 = vld [vmem:[%s3307_s19 + $0x38] sm:$0xf] }
  0x3d   : > { %v1041_v61 = vunpack.c.l.b16 %v1019_v20  ;;  %v859_v0 = vshrl.u32 %v2848_v52, 16  ;;  %v862_v1 = vshll.u32 %v2848_v52, 16  ;;  %v2804_v27 = vrot.slane %v584_v63, 9 }
  0x3e   : > { %v873_v3 = vshrl.u32 %v2850_v58, 16  ;;  %v876_v4 = vshll.u32 %v2850_v58, 16  ;;  %v631_v6 = vrot.slane %v3347_v62, 5  ;;  %v2805_v7 = vrot.slane %v585_v2, 9  ;;  %v2913_v58 = vld [vmem:[%s3307_s19 + $0x18] sm:$0xf] }
  0x3f   : > { %v641_v8 = vunpack.c.l.b16 %v616_v53  ;;  %v642_v9 = vunpack.c.l.b16 %v620_v55  ;;  %v635_v10 = vrot.slane %v3353_v5, 5  ;;  %v1047_v13 = vpack.c.b16 %v1041_v61, %v1040_v60  ;;  %v2854_v53 = vld [vmem:[%s3307_s19 + $0x40] sm:$0xf] }
  0x40   : > { %2807 = vmatmul.msk.bf16.vlgmr.msrb.gmra.mxu2 %vm468_vm1, %v647_v11  ;;  %v843_v11 = vsel %vm3335_vm4, %v838_v59, %v842_v56  ;;  %v632_v15 = vsel %vm3413_vm7, %v2804_v27, %v631_v6  ;;  %v861_v32 = vrot.slane %v859_v0, 4  ;;  %v864_v62 = vrot.slane %v862_v1, 5  ;;  %v2867_v0 = vld [vmem:[%s3307_s19 + $0x38] sm:$0xe]  ;;  %v2868_v1 = vld [vmem:[%s3307_s19 + $0x40] sm:$0xe] }
  0x41   : > { %v636_v5 = vsel %vm3413_vm7, %v2805_v7, %v635_v10  ;;  %v645_v19 = vunpack.c.l.b16 %v632_v15  ;;  %v875_v22 = vrot.slane %v873_v3, 4  ;;  %v878_v23 = vrot.slane %v876_v4, 5  ;;  %v2855_v10 = vld [vmem:[%s3307_s19 + $0x44] sm:$0x1] }
  0x42   : > { %v646_v24 = vunpack.c.l.b16 %v636_v5  ;;  %v648_v25 = vpack.c.b16 %v642_v9, %v641_v8  ;;  %v918_v26 = vunpack.c.l.b16 %v843_v11  ;;  %v2873_v31 = vrot.slane %v2865_v14, 9  ;;  %v2853_v8 = vld [vmem:[%s3307_s19 + $0x3c] sm:$0x1]  ;;  %v2834_v9 = vld [vmem:[%s3307_s19 + $0x38] sm:$0xf] }
  0x43   : > { %2857 = vmatmul.msk.bf16.vlgmr.msrb.gmra.mxu0 %vm468_vm1, %v924_v45  ;;  %2837 = vmatmul.msk.bf16.gmra.mxu3 %vm468_vm1, %v2827_v12  ;;  %v857_v12 = vsel %vm3335_vm4, %v852_v54, %v856_v57  ;;  %v1022_v35 = vrot.slane %v2849_v21, 5  ;;  %v2874_v36 = vrot.slane %v2866_v16, 9  ;;  %v1026_v37 = vrot.slane %v2851_v30, 5  ;;  %v2911_v57 = vld [vmem:[%s3307_s19 + $0x10] sm:$0xf] }
  0x44   : > { %v919_v28 = vunpack.c.l.b16 %v857_v12  ;;  %v3492_v38 = vpack.c.b16 %v646_v24, %v645_v19  ;;  %v865_v40 = vor.u32 %v864_v62, %v861_v32  ;;  %v868_v41 = vshll.u32 %v2849_v21, 16  ;;  %v3515_v5 = vld [vmem:[%s3307_s19 + $0x14] sm:$0x1]  ;;  %v3175_v19 = vld [vmem:[%s3307_s19 + $0x3c] sm:$0xf0] }
  0x45   : > { %v879_v42 = vor.u32 %v878_v23, %v875_v22  ;;  %v882_v17 = vshll.u32 %v2851_v30, 16  ;;  %v2831_v45 = vor.u32 %v3174_v34, %v2830_v29  ;;  %v1023_v46 = vsel %vm3413_vm7, %v2873_v31, %v1022_v35 }
  0x46   : > { %v925_v44 = vpack.c.b16 %v919_v28, %v918_v26  ;;  %v1027_v47 = vsel %vm3413_vm7, %v2874_v36, %v1026_v37  ;;  %v866_v48 = vrot.slane %v865_v40, 4  ;;  %v870_v49 = vrot.slane %v868_v41, 5  ;;  %v3520_v26 = vld [vmem:[%s3307_s19 + $0x1c] sm:$0x1] }
  0x47   : > { %v880_v50 = vrot.slane %v879_v42, 4  ;;  %v884_v51 = vrot.slane %v882_v17, 5  ;;  %v1042_v20 = vunpack.c.l.b16 %v1023_v46  ;;  %v1043_v52 = vunpack.c.l.b16 %v1027_v47  ;;  %v1509_v17 = vld [vmem:[%s4108_s3] sm:$0x3] }
  0x48   : > { %v871_v55 = vsel %vm3335_vm4, %v866_v48, %v870_v49  ;;  %v887_v56 = vshrl.u32 %v2852_v18, 16  ;;  %v890_v54 = vshll.u32 %v2852_v18, 16  ;;  %v901_v60 = vshrl.u32 %v2854_v53, 16  ;;  %v2915_v49 = vld [vmem:[%s3307_s19 + $0x20] sm:$0xf] }
  0x49   : > { %v885_v59 = vsel %vm3335_vm4, %v880_v50, %v884_v51  ;;  %v904_v61 = vshll.u32 %v2854_v53, 16  ;;  %v1048_v63 = vpack.c.b16 %v1043_v52, %v1042_v20  ;;  %v1202_v2 = vshrl.u32 %v2911_v57, 16  ;;  %v3002_v18 = vld [vmem:[%s4108_s3 + $0x4] sm:$0x3]  ;;  %v2917_v20 = vld [vmem:[%s3307_s19 + $0x28] sm:$0xf] }
  0x4a   : > { %v1205_v27 = vshll.u32 %v2911_v57, 16  ;;  %v1216_v3 = vshrl.u32 %v2913_v58, 16  ;;  %v1219_v4 = vshll.u32 %v2913_v58, 16  ;;  %v920_v6 = vunpack.c.l.b16 %v871_v55  ;;  %v3015_v52 = vld [vmem:[%s4108_s3 + $0x6] sm:$0x3] }
  0x4b   : > { %2879 = vmatmul.msk.bf16.gmra.mxu1 %vm468_vm1, %v1047_v13  ;;  %v921_v7 = vunpack.c.l.b16 %v885_v59  ;;  %v889_v11 = vrot.slane %v887_v56, 4  ;;  %v892_v12 = vrot.slane %v890_v54, 5  ;;  %v903_v13 = vrot.slane %v901_v60, 4  ;;  %v3044_v58 = vld [vmem:[%s4108_s3 + $0x8] sm:$0x3] }
  0x4c   : > { %v906_v14 = vrot.slane %v904_v61, 5  ;;  %v2875_v15 = vrot.slane %v2867_v0, 9  ;;  %v1030_v32 = vrot.slane %v2853_v8, 5  ;;  %v2876_v62 = vrot.slane %v2868_v1, 9 }
  0x4d   : > { %v1034_v16 = vrot.slane %v2855_v10, 5  ;;  %v1204_v21 = vrot.slane %v1202_v2, 4  ;;  %v1207_v22 = vrot.slane %v1205_v27, 5  ;;  %v1218_v23 = vrot.slane %v1216_v3, 4 }
  0x4e   : > { %v1221_v24 = vrot.slane %v1219_v4, 5  ;;  %v893_v28 = vor.u32 %v892_v12, %v889_v11  ;;  %v907_v29 = vor.u32 %v906_v14, %v903_v13  ;;  %v910_v30 = vshll.u32 %v2855_v10, 16  ;;  %v3570_v14 = vld [vmem:[%s3307_s19 + $0x24] sm:$0x1] }
  0x4f   : > { %v1211_v31 = vshll.u32 %v3515_v5, 16  ;;  %v926_v34 = vpack.c.b16 %v921_v7, %v920_v6  ;;  %v2835_v35 = vor.u32 %v3175_v19, %v2834_v9  ;;  %v1031_v36 = vsel %vm3413_vm7, %v2875_v15, %v1030_v32  ;;  %v3573_v15 = vld [vmem:[%s3307_s19 + $0x2c] sm:$0x1]  ;;  %v2932_v32 = vld [vmem:[%s3307_s19 + $0x10] sm:$0xe] }
  0x50   : > { %2808 = vmatmul.msk.bf16.gmra.mxu2 %vm468_vm1, %v648_v25  ;;  %v896_v25 = vshll.u32 %v2853_v8, 16  ;;  %v1035_v37 = vsel %vm3413_vm7, %v2876_v62, %v1034_v16  ;;  %v1208_v40 = vor.u32 %v1207_v22, %v1204_v21  ;;  %v1222_v41 = vor.u32 %v1221_v24, %v1218_v23  ;;  %v2933_v62 = vld [vmem:[%s3307_s19 + $0x18] sm:$0xe] }
  0x51   : > { %v1225_v42 = vshll.u32 %v3520_v26, 16  ;;  %v894_v46 = vrot.slane %v893_v28, 4  ;;  %v908_v47 = vrot.slane %v907_v29, 4  ;;  %v912_v48 = vrot.slane %v910_v30, 5 }
  0x52   : > { %v1044_v50 = vunpack.c.l.b16 %v1031_v36  ;;  %v1045_v51 = vunpack.c.l.b16 %v1035_v37  ;;  %v1209_v53 = vrot.slane %v1208_v40, 4  ;;  %v1223_v55 = vrot.slane %v1222_v41, 4  ;;  %v3184_v37 = vld [vmem:[%s3587_s21 + $0x4c] sm:$0xf0] }
  0x53   : > { %2858 = vmatmul.msk.bf16.gmra.mxu0 %vm468_vm1, %v925_v44  ;;  %2838 = vmatmul.msk.bf16.gmra.mxu3 %vm468_vm1, %v2831_v45  ;;  %v898_v44 = vrot.slane %v896_v25, 5  ;;  %v1620_v45 = vsel %vm1554_vm8, %v1509_v17, 0  ;;  %v1227_v56 = vrot.slane %v1225_v42, 5  ;;  %v1806_v57 = vsel %vm1554_vm8, %v3002_v18, 0 }
  0x54   : > { %1629 = vmatpush.bf16.msrb.mxu2 %v1620_v45  ;;  %1815 = vmatpush.bf16.msrb.mxu3 %v1806_v57  ;;  %v1889_v59 = vsel %vm1554_vm8, %v3015_v52, 0  ;;  %v1972_v54 = vsel %vm1554_vm8, %v3044_v58, 0  ;;  %v1230_v60 = vshrl.u32 %v2915_v49, 16  ;;  %v1233_v61 = vshll.u32 %v2915_v49, 16  ;;  %v3176_v49 = vld [vmem:[%s3307_s19 + $0x14] sm:$0xf0] }
  0x55   : > { %v1247_v0 = vshll.u32 %v2917_v20, 16  ;;  %1898 = vmatpush.bf16.msrb.mxu0 %v1889_v59  ;;  %1981 = vmatpush.bf16.msrb.mxu1 %v1972_v54  ;;  %v899_v1 = vsel %vm3335_vm4, %v894_v46, %v898_v44  ;;  %v913_v2 = vsel %vm3335_vm4, %v908_v47, %v912_v48  ;;  %v1049_v27 = vpack.c.b16 %v1045_v51, %v1044_v50  ;;  %v3607_v58 = vld [vmem:[%s3307_s19 + $0x34] sm:$0x1]  ;;  %v3610_v59 = vld [vmem:[%s3307_s19 + $0x3c] sm:$0x1] }
  0x56   : > { %v1228_v4 = vsel %vm3335_vm4, %v1223_v55, %v1227_v56  ;;  %v1232_v6 = vrot.slane %v1230_v60, 4  ;;  %v1235_v7 = vrot.slane %v1233_v61, 5  ;;  %v922_v10 = vunpack.c.l.b16 %v899_v1  ;;  %v2934_v61 = vld [vmem:[%s3307_s19 + $0x20] sm:$0xe] }
  0x57   : > { %v1249_v9 = vrot.slane %v1247_v0, 5  ;;  %v923_v11 = vunpack.c.l.b16 %v913_v2  ;;  %v1316_v13 = vunpack.c.l.b16 %v1228_v4  ;;  %v1239_v19 = vshll.u32 %v3570_v14, 16 }
  0x58   : > { %v1236_v16 = vor.u32 %v1235_v7, %v1232_v6  ;;  %v1253_v22 = vshll.u32 %v3573_v15, 16  ;;  %v2940_v25 = vrot.slane %v2932_v32, 9  ;;  %v1405_v28 = vrot.slane %v3515_v5, 5  ;;  %v2921_v5 = vld [vmem:[%s3307_s19 + $0x38] sm:$0xf] }
  0x59   : > { %v927_v23 = vpack.c.b16 %v923_v11, %v922_v10  ;;  %v2941_v29 = vrot.slane %v2933_v62, 9  ;;  %v1409_v30 = vrot.slane %v3520_v26, 5  ;;  %v2964_v26 = vld [vmem:[%s3587_s21 + $0x48] sm:$0xf]  ;;  %v1272_v46 = vshrl.u32 %v2921_v5, 16 }
  0x5a   : > { %v1255_v36 = vrot.slane %v1253_v22, 5  ;;  %v1406_v40 = vsel %vm3413_vm7, %v2940_v25, %v1405_v28  ;;  %v1275_v47 = vshll.u32 %v2921_v5, 16  ;;  %v2965_v48 = vor.u32 %v3184_v37, %v2964_v26  ;;  %v2923_v32 = vld [vmem:[%s3307_s19 + $0x40] sm:$0xf]  ;;  %v2925_v62 = vld [vmem:[%s3307_s19 + $0x48] sm:$0xf] }
  0x5b   : > { %2880 = vmatmul.msk.bf16.gmra.mxu1 %vm468_vm1, %v1048_v63  ;;  %v1244_v63 = vshrl.u32 %v2917_v20, 16  ;;  %v1410_v41 = vsel %vm3413_vm7, %v2941_v29, %v1409_v30  ;;  %vm1541_vm9 = vcmask 31744   ;;  %v1437_v50 = vunpack.c.l.b16 %v1406_v40  ;;  %v3637_v40 = vld [vmem:[%s3307_s19 + $0x44] sm:$0x1] }
  0x5c   : > { %v1438_v51 = vunpack.c.l.b16 %v1410_v41  ;;  %v1274_v55 = vrot.slane %v1272_v46, 4  ;;  %v1277_v56 = vrot.slane %v1275_v47, 5  ;;  %v1267_v1 = vshll.u32 %v3607_v58, 16  ;;  %v3640_v41 = vld [vmem:[%s3307_s19 + $0x4c] sm:$0x1] }
  0x5d   : > { %v1246_v8 = vrot.slane %v1244_v63, 4  ;;  %v2935_v63 = vld [vmem:[%s3307_s19 + $0x28] sm:$0xe]  ;;  %v1413_v4 = vrot.slane %v3570_v14, 5  ;;  %v1417_v7 = vrot.slane %v3573_v15, 5  ;;  %v1289_v25 = vshll.u32 %v2923_v32, 16 }
  0x5e   : > { %v1445_v54 = vpack.c.b16 %v1438_v51, %v1437_v50  ;;  %v1278_v2 = vor.u32 %v1277_v56, %v1274_v55  ;;  %v2943_v6 = vrot.slane %v2935_v63, 9  ;;  %v3177_v14 = vld [vmem:[%s3307_s19 + $0x24] sm:$0xf0]  ;;  %v1300_v28 = vshrl.u32 %v2925_v62, 16 }
  0x5f   : > { %v1250_v21 = vor.u32 %v1249_v9, %v1246_v8  ;;  %v1269_v9 = vrot.slane %v1267_v1, 5  ;;  %v1303_v29 = vshll.u32 %v2925_v62, 16  ;;  %v1291_v5 = vrot.slane %v1289_v25, 5  ;;  %v2939_v25 = vld [vmem:[%s3307_s19 + $0x48] sm:$0xe] }
  0x60   : > { %2809 = vmatmul.msk.bf16.gmra.mxu2 %vm468_vm1, %v3463_v33  ;;  %v1213_v33 = vrot.slane %v1211_v31, 5  ;;  %v1237_v31 = vrot.slane %v1236_v16, 4  ;;  %v1279_v10 = vrot.slane %v1278_v2, 4  ;;  %v1418_v15 = vsel %vm3413_vm7, %v2943_v6, %v1417_v7  ;;  %v2901_v7 = vld [vmem:[%s3307_s19 + $0x30] sm:$0xf] }
  0x61   : > { %v1302_v26 = vrot.slane %v1300_v28, 4  ;;  %v1305_v37 = vrot.slane %v1303_v29, 5  ;;  %v1295_v47 = vshll.u32 %v3637_v40, 16  ;;  %v1421_v50 = vrot.slane %v3607_v58, 5 }
  0x62   : > { %v1214_v3 = vsel %vm3335_vm4, %v1209_v53, %v1213_v33  ;;  %v2893_v33 = vld [vmem:[%s3307_s19 + $0x10] sm:$0xf]  ;;  %vm2614_vm10 = vcmask 57344  }
  0x63   : > { %2859 = vmatmul.msk.bf16.gmra.mxu0 %vm468_vm1, %v926_v34  ;;  %2839 = vmatmul.msk.bf16.gmra.mxu3 %vm468_vm1, %v2835_v35  ;;  %v1315_v12 = vunpack.c.l.b16 %v1214_v3  ;;  %v1241_v34 = vrot.slane %v1239_v19, 5  ;;  %v1251_v35 = vrot.slane %v1250_v21, 4  ;;  %v2894_v57 = vor.u32 %v3176_v49, %v2893_v33  ;;  %v2897_v19 = vld [vmem:[%s3307_s19 + $0x20] sm:$0xf] }
  0x64   : > { %v2942_v3 = vrot.slane %v2934_v61, 9  ;;  %v2898_v30 = vor.u32 %v3177_v14, %v2897_v19  ;;  %v1309_v33 = vshll.u32 %v3640_v41, 16  ;;  %v1297_v55 = vrot.slane %v1295_v47, 5 }
  0x65   : > { %v1323_v24 = vpack.c.b16 %v1316_v13, %v1315_v12  ;;  %v1242_v42 = vsel %vm3335_vm4, %v1237_v31, %v1241_v34  ;;  %v1256_v17 = vsel %vm3335_vm4, %v1251_v35, %v1255_v36  ;;  %v2968_v12 = vld [vmem:[%s3587_s21 + $0x58] sm:$0xf]  ;;  %v3185_v13 = vld [vmem:[%s3587_s21 + $0x5c] sm:$0xf0]  ;;  %v1440_v34 = vunpack.c.l.b16 %v1418_v15  ;;  %v1654_v15 = vld [vmem:[%s3587_s21 + $0xc] sm:$0x1] }
  0x66   : > { %v1317_v18 = vunpack.c.l.b16 %v1242_v42  ;;  %v1318_v20 = vunpack.c.l.b16 %v1256_v17  ;;  %v1414_v16 = vsel %vm3413_vm7, %v2942_v3, %v1413_v4  ;;  %v2969_v21 = vor.u32 %v3185_v13, %v2968_v12 }
  0x67   : > { %v1439_v31 = vunpack.c.l.b16 %v1414_v16  ;;  %v1652_v16 = vld [vmem:[%s3587_s21 + $0x4] sm:$0x1] }
  0x68   : > { %v1324_v60 = vpack.c.b16 %v1318_v20, %v1317_v18  ;;  %v1425_v18 = vrot.slane %v3610_v59, 5  ;;  %v2972_v20 = vld [vmem:[%s3587_s21 + $0x68] sm:$0xf]  ;;  %v1677_v29 = vshll.u32 %v1652_v16, 16  ;;  %v1658_v16 = vld [vmem:[%s3587_s21 + $0x1c] sm:$0x1] }
  0x69   : > { %v1446_v42 = vpack.c.b16 %v1440_v34, %v1439_v31  ;;  %v1691_v34 = vshll.u32 %v1654_v15, 16 }
  0x6b   : > { %2881 = vmatmul.msk.bf16.gmra.mxu1 %vm468_vm1, %v1049_v27  ;;  %v1281_v27 = vshll.u32 %v3610_v59, 16 }
  0x6d   : > { %v1283_v11 = vrot.slane %v1281_v27, 5 }
  0x70   : > { %2810 = vmatmul.msk.bf16.gmra.mxu2 %vm468_vm1, %v3492_v38  ;;  %v2919_v38 = vld [vmem:[%s3307_s19 + $0x30] sm:$0xf] }
  0x71   : > { %v1258_v44 = vshrl.u32 %v2919_v38, 16  ;;  %v1261_v45 = vshll.u32 %v2919_v38, 16 }
  0x73   : > { %2860 = vmatmul.msk.bf16.gmra.mxu0 %vm468_vm1, %v927_v23  ;;  %2928 = vmatmul.msk.bf16.vlgmr.msra.gmra.mxu3 %vm468_vm1, %v1323_v24  ;;  %v1260_v52 = vrot.slane %v1258_v44, 4  ;;  %v1263_v53 = vrot.slane %v1261_v45, 5  ;;  %v1284_v23 = vsel %vm3335_vm4, %v1279_v10, %v1283_v11  ;;  %v1286_v24 = vshrl.u32 %v2923_v32, 16  ;;  %v2936_v44 = vld [vmem:[%s3307_s19 + $0x30] sm:$0xe] }
  0x74   : > { %v1320_v36 = vunpack.c.l.b16 %v1284_v23  ;;  %v2937_v45 = vld [vmem:[%s3307_s19 + $0x38] sm:$0xe]  ;;  %v2944_v49 = vrot.slane %v2936_v44, 9 }
  0x75   : > { %v1264_v0 = vor.u32 %v1263_v53, %v1260_v52  ;;  %v1288_v38 = vrot.slane %v1286_v24, 4  ;;  %v2945_v51 = vrot.slane %v2937_v45, 9  ;;  %v3186_v52 = vld [vmem:[%s3587_s21 + $0x6c] sm:$0xf0]  ;;  %v2938_v24 = vld [vmem:[%s3307_s19 + $0x40] sm:$0xe] }
  0x76   : > { %v1422_v58 = vsel %vm3413_vm7, %v2944_v49, %v1421_v50  ;;  %v2976_v44 = vld [vmem:[%s3587_s21 + $0x78] sm:$0xf]  ;;  %v1693_v49 = vrot.slane %v1691_v34, 5 }
  0x77   : > { %v1265_v8 = vrot.slane %v1264_v0, 4  ;;  %v1292_v46 = vor.u32 %v1291_v5, %v1288_v38  ;;  %v1426_v63 = vsel %vm3413_vm7, %v2945_v51, %v1425_v18  ;;  %v2973_v0 = vor.u32 %v3186_v52, %v2972_v20  ;;  %v1655_v51 = vld [vmem:[%s3587_s21 + $0x10] sm:$0xf]  ;;  %v1657_v18 = vld [vmem:[%s3587_s21 + $0x18] sm:$0xf] }
  0x78   : > { %v1442_v10 = vunpack.c.l.b16 %v1426_v63  ;;  %v1699_v63 = vshll.u32 %v1655_v51, 16 }
  0x79   : > { %v1270_v22 = vsel %vm3335_vm4, %v1265_v8, %v1269_v9  ;;  %v1293_v53 = vrot.slane %v1292_v46, 4  ;;  %v3178_v8 = vld [vmem:[%s3307_s19 + $0x34] sm:$0xf0]  ;;  %v1441_v9 = vunpack.c.l.b16 %v1422_v58  ;;  %v3187_v46 = vld [vmem:[%s3587_s21 + $0x7c] sm:$0xf0] }
  0x7a   : > { %v1319_v35 = vunpack.c.l.b16 %v1270_v22  ;;  %v2902_v62 = vor.u32 %v3178_v8, %v2901_v7 }
  0x7b   : > { %2978 = vmatmul.msk.bf16.vlgmr.msra.gmra.mxu1 %vm1541_vm9, %v2965_v48  ;;  %v1306_v48 = vor.u32 %v1305_v37, %v1302_v26  ;;  %v1298_v2 = vsel %vm3335_vm4, %v1293_v53, %v1297_v55  ;;  %v1447_v22 = vpack.c.b16 %v1442_v10, %v1441_v9  ;;  %v2946_v26 = vrot.slane %v2938_v24, 9  ;;  %v2905_v53 = vld [vmem:[%s3307_s19 + $0x40] sm:$0xf]  ;;  %v3179_v55 = vld [vmem:[%s3307_s19 + $0x44] sm:$0xf0] }
  0x7c   : > { %v1325_v17 = vpack.c.b16 %v1320_v36, %v1319_v35  ;;  %v1321_v11 = vunpack.c.l.b16 %v1298_v2  ;;  %v3081_v35 = vld [vmem:[%s4108_s3 + $0xa] sm:$0x3]  ;;  %v1429_v37 = vrot.slane %v3637_v40, 5  ;;  %v3094_v40 = vld [vmem:[%s4108_s3 + $0xc] sm:$0x3] }
  0x7d   : > { %v1307_v56 = vrot.slane %v1306_v48, 4  ;;  %v2166_v5 = vsel %vm1554_vm8, %v3081_v35, 0  ;;  %v1679_v48 = vrot.slane %v1677_v29, 5  ;;  %v2249_v50 = vsel %vm1554_vm8, %v3094_v40, 0  ;;  %v3047_v35 = vld [vmem:[%s3587_s21 + $0xd8] sm:$0xf] }
  0x7e   : > { %2258 = vmatpush.bf16.msra.mxu3 %v2249_v50  ;;  %v1430_v52 = vsel %vm3413_vm7, %v2946_v26, %v1429_v37  ;;  %v1719_v29 = vshll.u32 %v1658_v16, 16  ;;  %v3051_v16 = vld [vmem:[%s3587_s21 + $0xe8] sm:$0xf] }
  0x80   : > { %2907 = vmatmul.msk.bf16.vlgmr.msra.gmra.mxu2 %vm468_vm1, %v2894_v57  ;;  %v1311_v57 = vrot.slane %v1309_v33, 5 }
  0x81   : > { %2175 = vmatpush.bf16.msra.mxu2 %v2166_v5 }
  0x82   : > { %v1312_v27 = vsel %vm3335_vm4, %v1307_v56, %v1311_v57  ;;  %v2977_v57 = vor.u32 %v3187_v46, %v2976_v44  ;;  %v1659_v44 = vld [vmem:[%s3587_s21 + $0x20] sm:$0xf] }
  0x83   : > { %2949 = vmatmul.msk.bf16.vlgmr.msra.gmra.mxu0 %vm468_vm1, %v1445_v54  ;;  %2929 = vmatmul.msk.bf16.gmra.mxu3 %vm468_vm1, %v1324_v60  ;;  %v1651_v54 = vld [vmem:[%s3587_s21] sm:$0xf]  ;;  %v1653_v60 = vld [vmem:[%s3587_s21 + $0x8] sm:$0xf]  ;;  %v1322_v12 = vunpack.c.l.b16 %v1312_v27  ;;  %v1727_v40 = vshll.u32 %v1659_v44, 16 }
  0x84   : > { %v1668_v1 = vshrl.u32 %v1651_v54, 16  ;;  %v1671_v59 = vshll.u32 %v1651_v54, 16  ;;  %v1682_v3 = vshrl.u32 %v1653_v60, 16  ;;  %v1685_v4 = vshll.u32 %v1653_v60, 16 }
  0x85   : > { %v1326_v23 = vpack.c.b16 %v1322_v12, %v1321_v11  ;;  %v1696_v60 = vshrl.u32 %v1655_v51, 16  ;;  %v1656_v12 = vld [vmem:[%s3587_s21 + $0x14] sm:$0x1] }
  0x86   : > { %v1670_v13 = vrot.slane %v1668_v1, 4  ;;  %v1673_v32 = vrot.slane %v1671_v59, 5  ;;  %v1684_v19 = vrot.slane %v1682_v3, 4  ;;  %v1687_v14 = vrot.slane %v1685_v4, 5  ;;  %v3123_v59 = vld [vmem:[%s4108_s3 + $0xe] sm:$0x3] }
  0x87   : > { %v1713_v1 = vshll.u32 %v1657_v18, 16  ;;  %v2332_v27 = vsel %vm1554_vm8, %v3123_v59, 0  ;;  %v2906_v3 = vor.u32 %v3179_v55, %v2905_v53  ;;  %v1443_v4 = vunpack.c.l.b16 %v1430_v52  ;;  %v2984_v52 = vld [vmem:[%s3587_s21] sm:$0xf]  ;;  %v3180_v53 = vld [vmem:[%s3587_s21 + $0x4] sm:$0xf0] }
  0x88   : > { %v1674_v28 = vor.u32 %v1673_v32, %v1670_v13  ;;  %v1688_v31 = vor.u32 %v1687_v14, %v1684_v19  ;;  %2341 = vmatpush.bf16.msra.mxu0 %v2332_v27  ;;  %v1698_v10 = vrot.slane %v1696_v60, 4  ;;  %v1701_v13 = vrot.slane %v1699_v63, 5  ;;  %v3160_v14 = vld [vmem:[%s4108_s3 + $0x10] sm:$0x3]  ;;  %v1660_v59 = vld [vmem:[%s3587_s21 + $0x24] sm:$0x1] }
  0x8a   : > { %v1675_v47 = vrot.slane %v1674_v28, 4 }
  0x8b   : > { %2979 = vmatmul.msk.bf16.gmra.mxu1 %vm1541_vm9, %v2969_v21 }
  0x8c   : > { %v1680_v54 = vsel %vm3335_vm4, %v1675_v47, %v1679_v48  ;;  %v1724_v48 = vshrl.u32 %v1659_v44, 16  ;;  %v2988_v44 = vld [vmem:[%s3587_s21 + $0x10] sm:$0xf] }
  0x8d   : > { %v1781_v8 = vunpack.c.l.b16 %v1680_v54 }
  0x90   : > { %2908 = vmatmul.msk.bf16.gmra.mxu2 %vm468_vm1, %v2898_v30 }
  0x93   : > { %2950 = vmatmul.msk.bf16.gmra.mxu0 %vm468_vm1, %v1446_v42  ;;  %2930 = vmatmul.msk.bf16.gmra.mxu3 %vm468_vm1, %v1325_v17  ;;  %v2947_v42 = vrot.slane %v2939_v25, 9  ;;  %v1433_v17 = vrot.slane %v3640_v41, 5  ;;  %v1689_v41 = vrot.slane %v1688_v31, 4  ;;  %v1702_v25 = vor.u32 %v1701_v13, %v1698_v10 }
  0x95   : > { %v1434_v56 = vsel %vm3413_vm7, %v2947_v42, %v1433_v17  ;;  %v1694_v58 = vsel %vm3335_vm4, %v1689_v41, %v1693_v49  ;;  %v1703_v37 = vrot.slane %v1702_v25, 4  ;;  %v1721_v17 = vrot.slane %v1719_v29, 5  ;;  %v1665_v25 = vld [vmem:[%s3587_s21 + $0x38] sm:$0xf] }
  0x96   : > { %v568_v61 = vpop.f32.mrf.mxu3  ;;  %v1444_v7 = vunpack.c.l.b16 %v1434_v56  ;;  %v1782_v9 = vunpack.c.l.b16 %v1694_v58  ;;  %v1729_v58 = vrot.slane %v1727_v40, 5 }
  0x98   : > { %v558_v6 = vpop.f32.mrf.mxu1  ;;  %v1448_v15 = vpack.c.b16 %v1444_v7, %v1443_v4 }
  0x9b   : > { %2980 = vmatmul.msk.bf16.gmra.mxu1 %vm1541_vm9, %v2973_v0  ;;  %v1710_v0 = vshrl.u32 %v1657_v18, 16 }
  0x9d   : > { %v1712_v32 = vrot.slane %v1710_v0, 4  ;;  %v2985_v0 = vor.u32 %v3180_v53, %v2984_v52  ;;  %v3022_v52 = vld [vmem:[%s3587_s21 + $0xa0] sm:$0xf]  ;;  %v3189_v53 = vld [vmem:[%s3587_s21 + $0xa4] sm:$0xf0] }
  0x9e   : > { %v570_v21 = vpop.f32.mrf.mxu3 }
  0xa0   : > { %v494_v30 = vpop.f32.mrf.mxu0  ;;  %2909 = vmatmul.msk.bf16.gmra.mxu2 %vm468_vm1, %v2902_v62  ;;  %v560_v38 = vpop.f32.mrf.mxu1  ;;  %v1715_v62 = vrot.slane %v1713_v1, 5  ;;  %v3188_v1 = vld [vmem:[%s3587_s21 + $0x94] sm:$0xf0] }
  0xa1   : > { %v3674_v36 = vadd.f32 %v558_v6, %v494_v30 }
  0xa2   : > { %v1716_v28 = vor.u32 %v1715_v62, %v1712_v32 }
  0xa3   : > { %2951 = vmatmul.msk.bf16.gmra.mxu0 %vm468_vm1, %v1447_v22  ;;  %v504_v45 = vpop.f32.mrf.mxu2  ;;  %2931 = vmatmul.msk.bf16.gmra.mxu3 %vm468_vm1, %v1326_v23  ;;  %v1789_v22 = vpack.c.b16 %v1782_v9, %v1781_v8  ;;  %v1705_v23 = vshll.u32 %v1656_v12, 16  ;;  %v1733_v9 = vshll.u32 %v1660_v59, 16 }
  0xa4   : > { %v3686_v33 = vadd.f32 %v568_v61, %v504_v45  ;;  %v1717_v42 = vrot.slane %v1716_v28, 4  ;;  %v1661_v45 = vld [vmem:[%s3587_s21 + $0x28] sm:$0xf] }
  0xa5   : > { %v1707_v5 = vrot.slane %v1705_v23, 5  ;;  %v1738_v51 = vshrl.u32 %v1661_v45, 16  ;;  %v1741_v18 = vshll.u32 %v1661_v45, 16  ;;  %v3181_v45 = vld [vmem:[%s3587_s21 + $0x14] sm:$0xf0] }
  0xa6   : > { %v573_v20 = vpop.f32.mrf.mxu3  ;;  %v1722_v50 = vsel %vm3335_vm4, %v1717_v42, %v1721_v17  ;;  %v1769_v42 = vshll.u32 %v1665_v25, 16 }
  0xa7   : > { %v1708_v49 = vsel %vm3335_vm4, %v1703_v37, %v1707_v5  ;;  %v1784_v60 = vunpack.c.l.b16 %v1722_v50  ;;  %v1743_v27 = vrot.slane %v1741_v18, 5  ;;  %v1766_v37 = vshrl.u32 %v1665_v25, 16 }
  0xa8   : > { %v496_v61 = vpop.f32.mrf.mxu0  ;;  %v563_v39 = vpop.f32.mrf.mxu1  ;;  %v1783_v54 = vunpack.c.l.b16 %v1708_v49  ;;  %v2989_v18 = vor.u32 %v3181_v45, %v2988_v44  ;;  %v3146_v44 = vld [vmem:[%s3587_s21 + $0x10] sm:$0xf] }
  0xa9   : > { %v3704_v2 = vadd.f32 %v560_v38, %v496_v61  ;;  %v3192_v38 = vld [vmem:[%s3587_s21 + $0xdc] sm:$0xf0]  ;;  %v1726_v61 = vrot.slane %v1724_v48, 4 }
  0xaa   : > { %v3048_v47 = vor.u32 %v3192_v38, %v3047_v35  ;;  %v1790_v7 = vpack.c.b16 %v1784_v60, %v1783_v54  ;;  %v1664_v54 = vld [vmem:[%s3587_s21 + $0x34] sm:$0x1]  ;;  %v1666_v60 = vld [vmem:[%s3587_s21 + $0x3c] sm:$0x1] }
  0xab   : > { %v506_v6 = vpop.f32.mrf.mxu2  ;;  %2981 = vmatmul.msk.bf16.gmra.mxu1 %vm1541_vm9, %v2977_v57  ;;  %v3018_v57 = vld [vmem:[%s3587_s21 + $0x90] sm:$0xf]  ;;  %v1730_v8 = vor.u32 %v1729_v58, %v1726_v61 }
  0xac   : > { %v3707_v11 = vadd.f32 %v570_v21, %v506_v6  ;;  %v2526_v21 = vsel %vm1554_vm8, %v3160_v14, 0  ;;  %v3019_v6 = vor.u32 %v3188_v1, %v3018_v57  ;;  %v1735_v14 = vrot.slane %v1733_v9, 5 }
  0xad   : > { %2535 = vmatpush.bf16.msra.mxu1 %v2526_v21  ;;  %v1771_v57 = vrot.slane %v1769_v42, 5 }
  0xae   : > { %v575_v19 = vpop.f32.mrf.mxu3 }
  0xb0   : > { %v499_v24 = vpop.f32.mrf.mxu0  ;;  %2910 = vmatmul.msk.bf16.gmra.mxu2 %vm468_vm1, %v2906_v3  ;;  %v565_v31 = vpop.f32.mrf.mxu1  ;;  %v1662_v3 = vld [vmem:[%s3587_s21 + $0x2c] sm:$0x1] }
  0xb1   : > { %v3717_v30 = vadd.f32 %v563_v39, %v499_v24  ;;  %v1740_v39 = vrot.slane %v1738_v51, 4  ;;  %v1747_v13 = vshll.u32 %v1662_v3, 16  ;;  %v1663_v24 = vld [vmem:[%s3587_s21 + $0x30] sm:$0xf] }
  0xb2   : > { %v1752_v35 = vshrl.u32 %v1663_v24, 16  ;;  %v1755_v38 = vshll.u32 %v1663_v24, 16  ;;  %v3182_v24 = vld [vmem:[%s3587_s21 + $0x24] sm:$0xf0] }
  0xb3   : > { %2952 = vmatmul.msk.bf16.gmra.mxu0 %vm468_vm1, %v1448_v15  ;;  %v509_v34 = vpop.f32.mrf.mxu2  ;;  %3003 = vmatmul.msk.bf16.vlgmr.msrb.gmra.mxu3 %vm1541_vm9, %v1789_v22  ;;  %v1744_v12 = vor.u32 %v1743_v27, %v1740_v39  ;;  %v3193_v22 = vld [vmem:[%s3587_s21 + $0xec] sm:$0xf0]  ;;  %v1749_v21 = vrot.slane %v1747_v13, 5  ;;  %v1775_v27 = vshll.u32 %v1666_v60, 16  ;;  %v3059_v60 = vld [vmem:[%s3587_s21 + $0x108] sm:$0xf] }
  0xb4   : > { %v3723_v26 = vadd.f32 %v573_v20, %v509_v34  ;;  %v1754_v49 = vrot.slane %v1752_v35, 4  ;;  %v1757_v50 = vrot.slane %v1755_v38, 5 }
  0xb5   : > { %v1745_v23 = vrot.slane %v1744_v12, 4  ;;  %v1777_v13 = vrot.slane %v1775_v27, 5 }
  0xb6   : > { %v758_v46 = vpop.f32.mrf.mxu3  ;;  %v1758_v1 = vor.u32 %v1757_v50, %v1754_v49 }
  0xb8   : > { %v501_v41 = vpop.f32.mrf.mxu0  ;;  %v1074_v55 = vpop.f32.mrf.mxu1 }
  0xb9   : > { %v3731_v20 = vadd.f32 %v565_v31, %v501_v41  ;;  %v3052_v31 = vor.u32 %v3193_v22, %v3051_v16  ;;  %v3194_v16 = vld [vmem:[%s3587_s21 + $0xfc] sm:$0xf0] }
  0xbb   : > { %v511_v56 = vpop.f32.mrf.mxu2  ;;  %3061 = vmatmul.msk.bf16.vlgmr.msrb.gmra.mxu1 %vm1541_vm9, %v3048_v47 }
  0xbc   : > { %v3736_v63 = vadd.f32 %v575_v19, %v511_v56  ;;  %v1731_v19 = vrot.slane %v1730_v8, 4  ;;  %v1768_v56 = vrot.slane %v1766_v37, 4  ;;  %v3144_v37 = vld [vmem:[%s3587_s21 + $0x8] sm:$0xf] }
  0xbd   : > { %v2391_v49 = vshll.u32 %v3144_v37, 16 }
  0xbe   : > { %v760_v4 = vpop.f32.mrf.mxu3  ;;  %v1736_v34 = vsel %vm3335_vm4, %v1731_v19, %v1735_v14  ;;  %v1772_v39 = vor.u32 %v1771_v57, %v1768_v56 }
  0xbf   : > { %v1785_v40 = vunpack.c.l.b16 %v1736_v34 }
  0xc0   : > { %v952_v10 = vpop.f32.mrf.mxu0  ;;  %2998 = vmatmul.msk.bf16.vlgmr.msrb.gmra.mxu2 %vm1541_vm9, %v2985_v0  ;;  %v1076_v32 = vpop.f32.mrf.mxu1  ;;  %v1773_v12 = vrot.slane %v1772_v39, 4 }
  0xc3   : > { %3032 = vmatmul.msk.bf16.vlgmr.msrb.gmra.mxu0 %vm1541_vm9, %v3019_v6  ;;  %v675_v62 = vpop.f32.mrf.mxu2  ;;  %3004 = vmatmul.msk.bf16.gmra.mxu3 %vm1541_vm9, %v1790_v7 }
  0xc4   : > { %v695_v15 = vadd.f32 %v675_v62, %v3674_v36  ;;  %v1750_v36 = vsel %vm3335_vm4, %v1745_v23, %v1749_v21  ;;  %v3055_v62 = vld [vmem:[%s3587_s21 + $0xf8] sm:$0xf]  ;;  %v1778_v23 = vsel %vm3335_vm4, %v1773_v12, %v1777_v13  ;;  %v3068_v12 = vld [vmem:[%s3587_s21 + $0x9c] sm:$0x1] }
  0xc5   : > { %v1786_v41 = vunpack.c.l.b16 %v1750_v36  ;;  %v3190_v36 = vld [vmem:[%s3587_s21 + $0xb4] sm:$0xf0] }
  0xc6   : > { %v778_v28 = vadd.f32 %v758_v46, %v695_v15  ;;  %v763_v29 = vpop.f32.mrf.mxu3  ;;  %v3056_v15 = vor.u32 %v3194_v16, %v3055_v62  ;;  %v2996_v16 = vld [vmem:[%s3587_s21 + $0x30] sm:$0xf] }
  0xc7   : > { %v1791_v0 = vpack.c.b16 %v1786_v41, %v1785_v40  ;;  %v3065_v40 = vld [vmem:[%s3587_s21 + $0x90] sm:$0xf] }
  0xc8   : > { %v954_v5 = vpop.f32.mrf.mxu0  ;;  %v972_v17 = vadd.f32 %v952_v10, %v778_v28  ;;  %v1079_v46 = vpop.f32.mrf.mxu1  ;;  %v2031_v56 = vshll.u32 %v3065_v40, 16 }
  0xca   : > { %v3756_v47 = vadd.f32 %v1074_v55, %v972_v17  ;;  %v3023_v55 = vor.u32 %v3189_v53, %v3022_v52  ;;  %v2405_v52 = vshll.u32 %v3146_v44, 16  ;;  %v2028_v53 = vshrl.u32 %v3065_v40, 16 }
  0xcb   : > { %v677_v48 = vpop.f32.mrf.mxu2  ;;  %3062 = vmatmul.msk.bf16.gmra.mxu1 %vm1541_vm9, %v3052_v31  ;;  %v1788_v31 = vunpack.c.l.b16 %v1778_v23 }
  0xcc   : > { %v696_v51 = vadd.f32 %v677_v48, %v3704_v2  ;;  %v1761_v2 = vshll.u32 %v1664_v54, 16  ;;  %v2407_v27 = vrot.slane %v2405_v52, 5  ;;  %v3069_v52 = vld [vmem:[%s3587_s21 + $0xa0] sm:$0xf] }
  0xce   : > { %v779_v61 = vadd.f32 %v760_v4, %v696_v51  ;;  %v765_v58 = vpop.f32.mrf.mxu3  ;;  %v1759_v4 = vrot.slane %v1758_v1, 4  ;;  %v1763_v10 = vrot.slane %v1761_v2, 5  ;;  %v3145_v2 = vld [vmem:[%s3587_s21 + $0xc] sm:$0x1] }
  0xd0   : > { %v957_v59 = vpop.f32.mrf.mxu0  ;;  %2999 = vmatmul.msk.bf16.gmra.mxu2 %vm1541_vm9, %v2989_v18  ;;  %v973_v3 = vadd.f32 %v954_v5, %v779_v61  ;;  %v1081_v6 = vpop.f32.mrf.mxu1  ;;  %v1764_v22 = vsel %vm3335_vm4, %v1759_v4, %v1763_v10  ;;  %v3026_v5 = vld [vmem:[%s3587_s21 + $0xb0] sm:$0xf]  ;;  %v2402_v18 = vshrl.u32 %v3146_v44, 16  ;;  %v2033_v4 = vrot.slane %v2031_v56, 5 }
  0xd1   : > { %v3027_v45 = vor.u32 %v3190_v36, %v3026_v5  ;;  %v2051_v5 = vshll.u32 %v3068_v12, 16 }
  0xd2   : > { %v3765_v7 = vadd.f32 %v1076_v32, %v973_v3  ;;  %v2404_v39 = vrot.slane %v2402_v18, 4 }
  0xd3   : > { %3033 = vmatmul.msk.bf16.gmra.mxu0 %vm1541_vm9, %v3023_v55  ;;  %v680_v8 = vpop.f32.mrf.mxu2  ;;  %3005 = vmatmul.msk.bf16.gmra.mxu3 %vm1541_vm9, %v1791_v0  ;;  %v3195_v55 = vld [vmem:[%s3587_s21 + $0x10c] sm:$0xf0] }
  0xd4   : > { %v697_v9 = vadd.f32 %v680_v8, %v3717_v30  ;;  %v2992_v30 = vld [vmem:[%s3587_s21 + $0x20] sm:$0xf]  ;;  %v2030_v8 = vrot.slane %v2028_v53, 4  ;;  %v3060_v10 = vor.u32 %v3195_v55, %v3059_v60  ;;  %v3071_v60 = vld [vmem:[%s3587_s21 + $0xa8] sm:$0xf] }
  0xd5   : > { %v2993_v38 = vor.u32 %v3182_v24, %v2992_v30  ;;  %v3191_v30 = vld [vmem:[%s3587_s21 + $0xc4] sm:$0xf0]  ;;  %v2408_v24 = vor.u32 %v2407_v27, %v2404_v39  ;;  %v2056_v39 = vshrl.u32 %v3069_v52, 16 }
  0xd6   : > { %v780_v19 = vadd.f32 %v763_v29, %v697_v9  ;;  %v768_v14 = vpop.f32.mrf.mxu3  ;;  %v1787_v29 = vunpack.c.l.b16 %v1764_v22  ;;  %v3147_v9 = vld [vmem:[%s3587_s21 + $0x14] sm:$0x1]  ;;  %v2397_v22 = vshll.u32 %v3145_v2, 16 }
  0xd8   : > { %v959_v32 = vpop.f32.mrf.mxu0  ;;  %v974_v21 = vadd.f32 %v957_v59, %v780_v19  ;;  %v3778_v25 = vpop.f32.mrf.mxu1  ;;  %v1792_v48 = vpack.c.b16 %v1788_v31, %v1787_v29  ;;  %v2393_v59 = vrot.slane %v2391_v49, 5  ;;  %v3183_v19 = vld [vmem:[%s3587_s21 + $0x34] sm:$0xf0]  ;;  %v3097_v29 = vld [vmem:[%s3587_s21 + $0x8] sm:$0xf]  ;;  %v2399_v40 = vrot.slane %v2397_v22, 5 }
  0xd9   : > { %v3196_v31 = vld [vmem:[%s3587_s21 + $0xc] sm:$0xf0] }
  0xda   : > { %v3780_v34 = vadd.f32 %v1079_v46, %v974_v21  ;;  %v3067_v46 = vld [vmem:[%s3587_s21 + $0x98] sm:$0xf]  ;;  %v3030_v21 = vld [vmem:[%s3587_s21 + $0xc0] sm:$0xf]  ;;  %v3098_v49 = vor.u32 %v3196_v31, %v3097_v29 }
  0xdb   : > { %v682_v28 = vpop.f32.mrf.mxu2  ;;  %3063 = vmatmul.msk.bf16.gmra.mxu1 %vm1541_vm9, %v3056_v15  ;;  %v2042_v61 = vshrl.u32 %v3067_v46, 16  ;;  %v2045_v0 = vshll.u32 %v3067_v46, 16  ;;  %v3150_v46 = vld [vmem:[%s3587_s21 + $0x20] sm:$0xf] }
  0xdc   : > { %v698_v35 = vadd.f32 %v682_v28, %v3731_v20  ;;  %v2388_v20 = vshrl.u32 %v3144_v37, 16  ;;  %v2411_v28 = vshll.u32 %v3147_v9, 16  ;;  %v2997_v37 = vor.u32 %v3183_v19, %v2996_v16 }
  0xdd   : > { %v2044_v13 = vrot.slane %v2042_v61, 4  ;;  %v2430_v55 = vshrl.u32 %v3150_v46, 16  ;;  %v2073_v9 = vshll.u32 %v3071_v60, 16 }
  0xde   : > { %v781_v42 = vadd.f32 %v765_v58, %v698_v35  ;;  %v3787_v17 = vpop.f32.mrf.mxu3  ;;  %v2390_v1 = vrot.slane %v2388_v20, 4  ;;  %v2034_v35 = vor.u32 %v2033_v4, %v2030_v8  ;;  %v3031_v20 = vor.u32 %v3191_v30, %v3030_v21  ;;  %v3070_v30 = vld [vmem:[%s3587_s21 + $0xa4] sm:$0x1] }
  0xdf   : > { %v2413_v18 = vrot.slane %v2411_v28, 5  ;;  %v2059_v8 = vshll.u32 %v3069_v52, 16  ;;  %v2070_v4 = vshrl.u32 %v3071_v60, 16  ;;  %v2432_v19 = vrot.slane %v2430_v55, 4  ;;  %v3126_v52 = vld [vmem:[%s3587_s21 + $0x50] sm:$0xf] }
  0xe0   : > { %v962_v41 = vpop.f32.mrf.mxu0  ;;  %3000 = vmatmul.msk.bf16.gmra.mxu2 %vm1541_vm9, %v2993_v38  ;;  %v975_v50 = vadd.f32 %v959_v32, %v781_v42  ;;  %v3793_v51 = vpop.f32.mrf.mxu1  ;;  %v2047_v32 = vrot.slane %v2045_v0, 5  ;;  %v2394_v15 = vor.u32 %v2393_v59, %v2390_v1  ;;  %v2433_v0 = vshll.u32 %v3150_v46, 16 }
  0xe1   : > { %v2061_v28 = vrot.slane %v2059_v8, 5  ;;  %v2072_v29 = vrot.slane %v2070_v4, 4  ;;  %v2075_v31 = vrot.slane %v2073_v9, 5  ;;  %v2065_v46 = vshll.u32 %v3070_v30, 16  ;;  %v3154_v4 = vld [vmem:[%s3587_s21 + $0x30] sm:$0xf] }
  0xe2   : > { %v3795_v57 = vadd.f32 %v1081_v6, %v975_v50  ;;  %v2409_v50 = vrot.slane %v2408_v24, 4  ;;  %v2058_v24 = vrot.slane %v2056_v39, 4 }
  0xe3   : > { %3034 = vmatmul.msk.bf16.gmra.mxu0 %vm1541_vm9, %v3027_v45  ;;  %v685_v54 = vpop.f32.mrf.mxu2  ;;  %3006 = vmatmul.msk.bf16.gmra.mxu3 %vm1541_vm9, %v1792_v48  ;;  %v2048_v45 = vor.u32 %v2047_v32, %v2044_v13  ;;  %v2395_v48 = vrot.slane %v2394_v15, 4  ;;  %v3149_v13 = vld [vmem:[%s3587_s21 + $0x1c] sm:$0x1]  ;;  %v2435_v32 = vrot.slane %v2433_v0, 5 }
  0xe4   : > { %v699_v58 = vadd.f32 %v685_v54, %v3686_v33  ;;  %v3066_v33 = vld [vmem:[%s3587_s21 + $0x94] sm:$0x1] }
  0xe5   : > { %v2037_v38 = vshll.u32 %v3066_v33, 16  ;;  %v2049_v59 = vrot.slane %v2048_v45, 4  ;;  %v2400_v2 = vsel %vm3335_vm4, %v2395_v48, %v2399_v40 }
  0xe6   : > { %v782_v3 = vadd.f32 %v768_v14, %v699_v58  ;;  %v3803_v6 = vpop.f32.mrf.mxu3 }
  0xe7   : > { %v2039_v54 = vrot.slane %v2037_v38, 5 }
  0xe8   : > { %v964_v62 = vpop.f32.mrf.mxu0  ;;  %v976_v14 = vadd.f32 %v962_v41, %v782_v3  ;;  %v3810_v23 = vpop.f32.mrf.mxu1  ;;  %v3148_v41 = vld [vmem:[%s3587_s21 + $0x18] sm:$0xf]  ;;  %v2414_v3 = vsel %vm3335_vm4, %v2409_v50, %v2413_v18 }
  0xe9   : > { %v2416_v61 = vshrl.u32 %v3148_v41, 16  ;;  %v2419_v58 = vshll.u32 %v3148_v41, 16  ;;  %v2502_v21 = vunpack.c.l.b16 %v2414_v3 }
  0xea   : > { %v3817_v42 = vadd.f32 %v3778_v25, %v976_v14  ;;  %v2035_v25 = vrot.slane %v2034_v35, 4  ;;  %v2501_v14 = vunpack.c.l.b16 %v2400_v2  ;;  %v3197_v2 = vld [vmem:[%s3587_s21 + $0x1c] sm:$0xf0] }
  0xeb   : > { %v687_v36 = vpop.f32.mrf.mxu2  ;;  %3064 = vmatmul.msk.bf16.gmra.mxu1 %vm1541_vm9, %v3060_v10  ;;  %v2421_v16 = vrot.slane %v2419_v58, 5 }
  0xec   : > { %v700_v44 = vadd.f32 %v687_v36, %v3707_v11  ;;  %v2053_v11 = vrot.slane %v2051_v5, 5  ;;  %v2040_v10 = vsel %vm3335_vm4, %v2035_v25, %v2039_v54  ;;  %v3072_v5 = vld [vmem:[%s3587_s21 + $0xac] sm:$0x1]  ;;  %v2425_v36 = vshll.u32 %v3149_v13, 16  ;;  %v3200_v54 = vld [vmem:[%s3587_s21 + $0x54] sm:$0xf0] }
  0xed   : > { %v2141_v48 = vunpack.c.l.b16 %v2040_v10  ;;  %v2509_v41 = vpack.c.b16 %v2502_v21, %v2501_v14  ;;  %v2079_v50 = vshll.u32 %v3072_v5, 16  ;;  %v3127_v10 = vor.u32 %v3200_v54, %v3126_v52 }
  0xee   : > { %v783_v53 = vadd.f32 %v3787_v17, %v700_v44  ;;  %v3825_v56 = vpop.f32.mrf.mxu3  ;;  %v2054_v22 = vsel %vm3335_vm4, %v2049_v59, %v2053_v11  ;;  %v3101_v59 = vld [vmem:[%s3587_s21 + $0x18] sm:$0xf]  ;;  %v2461_v14 = vshll.u32 %v3154_v4, 16 }
  0xef   : > { %v2142_v40 = vunpack.c.l.b16 %v2054_v22  ;;  %v2081_v8 = vrot.slane %v2079_v50, 5  ;;  %v2458_v22 = vshrl.u32 %v3154_v4, 16  ;;  %v3201_v4 = vld [vmem:[%s3587_s21 + $0x64] sm:$0xf0] }
  0xf0   : > { %v967_v1 = vpop.f32.mrf.mxu0  ;;  %3001 = vmatmul.msk.bf16.gmra.mxu2 %vm1541_vm9, %v2997_v37  ;;  %v977_v17 = vadd.f32 %v964_v62, %v783_v53  ;;  %v3831_v27 = vpop.f32.mrf.mxu1  ;;  %v2418_v62 = vrot.slane %v2416_v61, 4  ;;  %v2427_v53 = vrot.slane %v2425_v36, 5 }
  0xf1   : > { %v2149_v0 = vpack.c.b16 %v2142_v40, %v2141_v48  ;;  %v2460_v40 = vrot.slane %v2458_v22, 4 }
  0xf2   : > { %v3838_v33 = vadd.f32 %v3793_v51, %v977_v17  ;;  %v3151_v51 = vld [vmem:[%s3587_s21 + $0x24] sm:$0x1]  ;;  %v2422_v37 = vor.u32 %v2421_v16, %v2418_v62  ;;  %v2067_v17 = vrot.slane %v2065_v46, 5  ;;  %v3073_v62 = vld [vmem:[%s3587_s21 + $0xb0] sm:$0xf] }
  0xf3   : > { %3035 = vmatmul.msk.bf16.gmra.mxu0 %vm1541_vm9, %v3031_v20  ;;  %v690_v12 = vpop.f32.mrf.mxu2  ;;  %3111 = vmatmul.msk.bf16.vlgmr.msra.gmra.mxu3 %vm1541_vm9, %v3098_v49  ;;  %v2439_v44 = vshll.u32 %v3151_v51, 16  ;;  %v2062_v49 = vor.u32 %v2061_v28, %v2058_v24  ;;  %v2084_v28 = vshrl.u32 %v3073_v62, 16 }
  0xf4   : > { %v701_v15 = vadd.f32 %v690_v12, %v3723_v26  ;;  %v2436_v26 = vor.u32 %v2435_v32, %v2432_v19  ;;  %v2423_v11 = vrot.slane %v2422_v37, 4  ;;  %v3102_v12 = vor.u32 %v3197_v2, %v3101_v59  ;;  %v3075_v32 = vld [vmem:[%s3587_s21 + $0xb8] sm:$0xf] }
  0xf5   : > { %v2441_v61 = vrot.slane %v2439_v44, 5  ;;  %v2063_v39 = vrot.slane %v2062_v49, 4  ;;  %v2098_v36 = vshrl.u32 %v3075_v32, 16  ;;  %v2101_v37 = vshll.u32 %v3075_v32, 16 }
  0xf6   : > { %v784_v35 = vadd.f32 %v3803_v6, %v701_v15  ;;  %v3849_v38 = vpop.f32.mrf.mxu3  ;;  %v2076_v6 = vor.u32 %v2075_v31, %v2072_v29  ;;  %v2437_v60 = vrot.slane %v2436_v26, 4  ;;  %v2087_v29 = vshll.u32 %v3073_v62, 16  ;;  %v3198_v62 = vld [vmem:[%s3587_s21 + $0x2c] sm:$0xf0] }
  0xf7   : > { %v2068_v51 = vsel %vm3335_vm4, %v2063_v39, %v2067_v17  ;;  %v2100_v54 = vrot.slane %v2098_v36, 4 }
  0xf8   : > { %v969_v45 = vpop.f32.mrf.mxu0  ;;  %v3852_v20 = vpop.f32.mrf.mxu1  ;;  %v978_v18 = vadd.f32 %v967_v1, %v784_v35  ;;  %v3152_v1 = vld [vmem:[%s3587_s21 + $0x28] sm:$0xf]  ;;  %v2077_v3 = vrot.slane %v2076_v6, 4  ;;  %v2442_v13 = vsel %vm3335_vm4, %v2437_v60, %v2441_v61  ;;  %v2143_v46 = vunpack.c.l.b16 %v2068_v51  ;;  %v3156_v51 = vld [vmem:[%s3587_s21 + $0x38] sm:$0xf] }
  0xf9   : > { %v2444_v16 = vshrl.u32 %v3152_v1, 16  ;;  %v2447_v15 = vshll.u32 %v3152_v1, 16  ;;  %v2504_v5 = vunpack.c.l.b16 %v2442_v13  ;;  %v2089_v52 = vrot.slane %v2087_v29, 5  ;;  %v3130_v1 = vld [vmem:[%s3587_s21 + $0x60] sm:$0xf] }
  0xfa   : > { %v3857_v58 = vadd.f32 %v3810_v23, %v978_v18  ;;  %v2082_v30 = vsel %vm3335_vm4, %v2077_v3, %v2081_v8  ;;  %v2086_v18 = vrot.slane %v2084_v28, 4 }
  0xfb   : > { %v692_v25 = vpop.f32.mrf.mxu2  ;;  %3161 = vmatmul.msk.bf16.vlgmr.msra.gmra.mxu1 %vm1541_vm9, %v2509_v41  ;;  %v2446_v26 = vrot.slane %v2444_v16, 4  ;;  %v2449_v48 = vrot.slane %v2447_v15, 5  ;;  %v2463_v41 = vrot.slane %v2461_v14, 5  ;;  %v2144_v50 = vunpack.c.l.b16 %v2082_v30  ;;  %v3158_v30 = vld [vmem:[%s3587_s21 + $0x40] sm:$0xf] }
  0xfc   : > { %v702_v55 = vadd.f32 %v692_v25, %v3736_v63  ;;  %v2428_v63 = vsel %vm3335_vm4, %v2423_v11, %v2427_v53  ;;  %v3074_v25 = vld [vmem:[%s3587_s21 + $0xb4] sm:$0x1]  ;;  %v2090_v39 = vor.u32 %v2089_v52, %v2086_v18 }
  0xfd   : > { %v2503_v24 = vunpack.c.l.b16 %v2428_v63  ;;  %v2093_v17 = vshll.u32 %v3074_v25, 16  ;;  %v2150_v8 = vpack.c.b16 %v2144_v50, %v2143_v46 }
  0xfe   : > { %v785_v9 = vadd.f32 %v3825_v56, %v702_v55  ;;  %v3866_v23 = vpop.f32.mrf.mxu3  ;;  %v3076_v55 = vld [vmem:[%s3587_s21 + $0xbc] sm:$0x1]  ;;  %v2091_v14 = vrot.slane %v2090_v39, 4  ;;  %v3159_v39 = vld [vmem:[%s3587_s21 + $0x44] sm:$0x1] }
  0xff   : > { %v2510_v53 = vpack.c.b16 %v2504_v5, %v2503_v24  ;;  %v3131_v24 = vor.u32 %v3201_v4, %v3130_v1  ;;  %v3157_v1 = vld [vmem:[%s3587_s21 + $0x3c] sm:$0x1] }
 0x100   : > { %v1473_v19 = vpop.f32.mrf.mxu0  ;;  %3082 = vmatmul.msk.bf16.vlgmr.msra.gmra.mxu2 %vm1541_vm9, %v2149_v0  ;;  %v979_v56 = vadd.f32 %v969_v45, %v785_v9  ;;  %v3875_v21 = vpop.f32.mrf.mxu1  ;;  %v3153_v45 = vld [vmem:[%s3587_s21 + $0x2c] sm:$0x1]  ;;  %v2450_v0 = vor.u32 %v2449_v48, %v2446_v26  ;;  %v3105_v9 = vld [vmem:[%s3587_s21 + $0x28] sm:$0xf]  ;;  %v2475_v48 = vshll.u32 %v3156_v51, 16 }
 0x101   : > { %v2453_v11 = vshll.u32 %v3153_v45, 16  ;;  %v3106_v28 = vor.u32 %v3198_v62, %v3105_v9  ;;  %v2472_v45 = vshrl.u32 %v3156_v51, 16  ;;  %v3134_v51 = vld [vmem:[%s3587_s21 + $0x70] sm:$0xf] }
 0x102   : > { %v3882_v31 = vadd.f32 %v3831_v27, %v979_v56  ;;  %v3155_v27 = vld [vmem:[%s3587_s21 + $0x34] sm:$0x1]  ;;  %v2451_v16 = vrot.slane %v2450_v0, 4  ;;  %v2095_v56 = vrot.slane %v2093_v17, 5 }
 0x103   : > { %3140 = vmatmul.msk.bf16.vlgmr.msra.gmra.mxu0 %vm1541_vm9, %v3127_v10  ;;  %v1157_v35 = vpop.f32.mrf.mxu2  ;;  %3112 = vmatmul.msk.bf16.gmra.mxu3 %vm1541_vm9, %v3102_v12  ;;  %v2467_v59 = vshll.u32 %v3155_v27, 16  ;;  %v2107_v12 = vshll.u32 %v3076_v55, 16  ;;  %v2455_v63 = vrot.slane %v2453_v11, 5  ;;  %v2474_v11 = vrot.slane %v2472_v45, 4 }
 0x104   : > { %v1177_v44 = vadd.f32 %v1157_v35, %v3756_v47  ;;  %v2103_v47 = vrot.slane %v2101_v37, 5  ;;  %v3077_v37 = vld [vmem:[%s3587_s21 + $0xc0] sm:$0xf]  ;;  %v2096_v46 = vsel %vm3335_vm4, %v2091_v14, %v2095_v56 }
 0x105   : > { %v2469_v32 = vrot.slane %v2467_v59, 5  ;;  %v2456_v36 = vsel %vm3335_vm4, %v2451_v16, %v2455_v63  ;;  %v2112_v18 = vshrl.u32 %v3077_v37, 16  ;;  %v2115_v52 = vshll.u32 %v3077_v37, 16 }
 0x106   : > { %v1371_v49 = vadd.f32 %v3849_v38, %v1177_v44  ;;  %v3890_v6 = vpop.f32.mrf.mxu3  ;;  %v2464_v38 = vor.u32 %v2463_v41, %v2460_v40  ;;  %v2104_v10 = vor.u32 %v2103_v47, %v2100_v54  ;;  %v3079_v44 = vld [vmem:[%s3587_s21 + $0xc8] sm:$0xf]  ;;  %v2486_v40 = vshrl.u32 %v3158_v30, 16 }
 0x107   : > { %v2489_v41 = vshll.u32 %v3158_v30, 16  ;;  %v2505_v50 = vunpack.c.l.b16 %v2456_v36  ;;  %v2126_v54 = vshrl.u32 %v3079_v44, 16  ;;  %v2129_v47 = vshll.u32 %v3079_v44, 16  ;;  %v3202_v30 = vld [vmem:[%s3587_s21 + $0x74] sm:$0xf0] }
 0x108   : > { %v3893_v60 = vadd.f32 %v1473_v19, %v1371_v49  ;;  %v1475_v61 = vpop.f32.mrf.mxu0  ;;  %v3896_v2 = vpop.f32.mrf.mxu1  ;;  %v2465_v19 = vrot.slane %v2464_v38, 4  ;;  %v2105_v29 = vrot.slane %v2104_v10, 4  ;;  %v2488_v55 = vrot.slane %v2486_v40, 4 }
 0x109   : > { %v2491_v0 = vrot.slane %v2489_v41, 5  ;;  %v2145_v17 = vunpack.c.l.b16 %v2096_v46  ;;  %v2117_v4 = vrot.slane %v2115_v52, 5  ;;  %v2128_v63 = vrot.slane %v2126_v54, 4 }
 0x10a   : > { %v3135_v46 = vor.u32 %v3202_v30, %v3134_v51 }
 0x10b   : > { %v1159_v3 = vpop.f32.mrf.mxu2  ;;  %3162 = vmatmul.msk.bf16.gmra.mxu1 %vm1541_vm9, %v2510_v53 }
 0x10c   : > { %v1178_v13 = vadd.f32 %v1159_v3, %v3765_v7  ;;  %v2109_v7 = vrot.slane %v2107_v12, 5  ;;  %v3078_v12 = vld [vmem:[%s3587_s21 + $0xc4] sm:$0x1] }
 0x10e   : > { %v1372_v15 = vadd.f32 %v3866_v23, %v1178_v13  ;;  %v3905_v22 = vpop.f32.mrf.mxu3  ;;  %v2470_v23 = vsel %vm3335_vm4, %v2465_v19, %v2469_v32  ;;  %v2110_v49 = vsel %vm3335_vm4, %v2105_v29, %v2109_v7  ;;  %v2131_v13 = vrot.slane %v2129_v47, 5  ;;  %v3109_v29 = vld [vmem:[%s3587_s21 + $0x38] sm:$0xf]  ;;  %v3199_v7 = vld [vmem:[%s3587_s21 + $0x3c] sm:$0xf0] }
 0x10f   : > { %v2506_v25 = vunpack.c.l.b16 %v2470_v23  ;;  %v2146_v3 = vunpack.c.l.b16 %v2110_v49  ;;  %v2481_v19 = vshll.u32 %v3157_v1, 16  ;;  %v2492_v32 = vor.u32 %v2491_v0, %v2488_v55 }
 0x110   : > { %v3909_v35 = vadd.f32 %v1475_v61, %v1372_v15  ;;  %v1478_v5 = vpop.f32.mrf.mxu0  ;;  %3083 = vmatmul.msk.bf16.gmra.mxu2 %vm1541_vm9, %v2150_v8  ;;  %v3917_v26 = vpop.f32.mrf.mxu1  ;;  %v2477_v61 = vrot.slane %v2475_v48, 5  ;;  %v2114_v8 = vrot.slane %v2112_v18, 4  ;;  %v2495_v15 = vshll.u32 %v3159_v39, 16 }
 0x111   : > { %v2511_v10 = vpack.c.b16 %v2506_v25, %v2505_v50  ;;  %v2151_v56 = vpack.c.b16 %v2146_v3, %v2145_v17  ;;  %v2132_v36 = vor.u32 %v2131_v13, %v2128_v63  ;;  %v2483_v44 = vrot.slane %v2481_v19, 5  ;;  %v3138_v13 = vld [vmem:[%s3587_s21 + $0x80] sm:$0xf] }
 0x112   : > { %v2478_v16 = vor.u32 %v2477_v61, %v2474_v11  ;;  %v2493_v45 = vrot.slane %v2492_v32, 4  ;;  %v2497_v48 = vrot.slane %v2495_v15, 5 }
 0x113   : > { %3141 = vmatmul.msk.bf16.gmra.mxu0 %vm1541_vm9, %v3131_v24  ;;  %v1162_v27 = vpop.f32.mrf.mxu2  ;;  %3113 = vmatmul.msk.bf16.gmra.mxu3 %vm1541_vm9, %v3106_v28  ;;  %v2121_v24 = vshll.u32 %v3078_v12, 16 }
 0x114   : > { %v1179_v53 = vadd.f32 %v1162_v27, %v3780_v34  ;;  %v2479_v37 = vrot.slane %v2478_v16, 4  ;;  %v3110_v27 = vor.u32 %v3199_v7, %v3109_v29 }
 0x115   : > { %v2123_v18 = vrot.slane %v2121_v24, 5 }
 0x116   : > { %v1373_v38 = vadd.f32 %v3890_v6, %v1179_v53  ;;  %v1361_v59 = vpop.f32.mrf.mxu3  ;;  %v3080_v6 = vld [vmem:[%s3587_s21 + $0xcc] sm:$0x1]  ;;  %v2133_v53 = vrot.slane %v2132_v36, 4  ;;  %v2484_v54 = vsel %vm3335_vm4, %v2479_v37, %v2483_v44 }
 0x117   : > { %v2135_v23 = vshll.u32 %v3080_v6, 16  ;;  %v2507_v61 = vunpack.c.l.b16 %v2484_v54  ;;  %v3203_v6 = vld [vmem:[%s3587_s21 + $0x84] sm:$0xf0] }
 0x118   : > { %v3930_v34 = vadd.f32 %v1478_v5, %v1373_v38  ;;  %v1480_v9 = vpop.f32.mrf.mxu0  ;;  %v3933_v62 = vpop.f32.mrf.mxu1  ;;  %v2118_v5 = vor.u32 %v2117_v4, %v2114_v8 }
 0x119   : > { %v2137_v25 = vrot.slane %v2135_v23, 5 }
 0x11b   : > { %v1164_v14 = vpop.f32.mrf.mxu2  ;;  %3163 = vmatmul.msk.bf16.gmra.mxu1 %vm1541_vm9, %v2511_v10  ;;  %v2138_v38 = vsel %vm3335_vm4, %v2133_v53, %v2137_v25 }
 0x11c   : > { %v1180_v28 = vadd.f32 %v1164_v14, %v3795_v57  ;;  %v2119_v57 = vrot.slane %v2118_v5, 4  ;;  %v2148_v4 = vunpack.c.l.b16 %v2138_v38 }
 0x11e   : > { %v1374_v40 = vadd.f32 %v3905_v22, %v1180_v28  ;;  %v1363_v41 = vpop.f32.mrf.mxu3  ;;  %v2498_v22 = vsel %vm3335_vm4, %v2493_v45, %v2497_v48  ;;  %v2124_v0 = vsel %vm3335_vm4, %v2119_v57, %v2123_v18 }
 0x11f   : > { %v2508_v55 = vunpack.c.l.b16 %v2498_v22  ;;  %v2147_v8 = vunpack.c.l.b16 %v2124_v0 }
 0x120   : > { %v3943_v49 = vadd.f32 %v1480_v9, %v1374_v40  ;;  %v1483_v50 = vpop.f32.mrf.mxu0  ;;  %3084 = vmatmul.msk.bf16.gmra.mxu2 %vm1541_vm9, %v2151_v56  ;;  %v3946_v52 = vpop.f32.mrf.mxu1 }
 0x121   : > { %v2512_v9 = vpack.c.b16 %v2508_v55, %v2507_v61  ;;  %v2152_v63 = vpack.c.b16 %v2148_v4, %v2147_v8 }
 0x123   : > { %3142 = vmatmul.msk.bf16.gmra.mxu0 %vm1541_vm9, %v3135_v46  ;;  %v1167_v47 = vpop.f32.mrf.mxu2  ;;  %3114 = vmatmul.msk.bf16.gmra.mxu3 %vm1541_vm9, %v3110_v27 }
 0x124   : > { %v1181_v11 = vadd.f32 %v1167_v47, %v3817_v42 }
 0x126   : > { %v1375_v1 = vadd.f32 %v1361_v59, %v1181_v11  ;;  %v1366_v39 = vpop.f32.mrf.mxu3  ;;  %v3139_v59 = vor.u32 %v3203_v6, %v3138_v13 }
 0x128   : > { %v3959_v17 = vadd.f32 %v1483_v50, %v1375_v1  ;;  %v1485_v3 = vpop.f32.mrf.mxu0  ;;  %v3961_v10 = vpop.f32.mrf.mxu1 }
 0x12b   : > { %v1169_v42 = vpop.f32.mrf.mxu2  ;;  %3164 = vmatmul.msk.bf16.gmra.mxu1 %vm1541_vm9, %v2512_v9 }
 0x12c   : > { %v1182_v12 = vadd.f32 %v1169_v42, %v3838_v33 }
 0x12e   : > { %v1376_v43 = vadd.f32 %v1363_v41, %v1182_v12  ;;  %v1368_v16 = vpop.f32.mrf.mxu3 }
 0x130   : > { %v3967_v19 = vadd.f32 %v1485_v3, %v1376_v43  ;;  %v1488_v32 = vpop.f32.mrf.mxu0  ;;  %3085 = vmatmul.msk.bf16.gmra.mxu2 %vm1541_vm9, %v2152_v63  ;;  %v3970_v15 = vpop.f32.mrf.mxu1 }
 0x133   : > { %3143 = vmatmul.msk.bf16.gmra.mxu0 %vm1541_vm9, %v3139_v59  ;;  %v1172_v14 = vpop.f32.mrf.mxu2 }
 0x134   : > { %v1183_v33 = vadd.f32 %v1172_v14, %v3857_v58 }
 0x136   : > { %v1377_v56 = vadd.f32 %v1366_v39, %v1183_v33  ;;  %v1817_v51 = vpop.f32.mrf.mxu3 }
 0x138   : > { %v3974_v30 = vadd.f32 %v1488_v32, %v1377_v56  ;;  %v1490_v24 = vpop.f32.mrf.mxu0  ;;  %v1983_v28 = vpop.f32.mrf.mxu1 }
 0x13b   : > { %v1174_v29 = vpop.f32.mrf.mxu2 }
 0x13c   : > { %v1184_v7 = vadd.f32 %v1174_v29, %v3882_v31 }
 0x13e   : > { %v1378_v5 = vadd.f32 %v1368_v16, %v1184_v7  ;;  %v1819_v36 = vpop.f32.mrf.mxu3 }
 0x140   : > { %v3977_v23 = vadd.f32 %v1490_v24, %v1378_v5  ;;  %v1900_v37 = vpop.f32.mrf.mxu0  ;;  %v1985_v44 = vpop.f32.mrf.mxu1 }
 0x143   : > { %v1631_v45 = vpop.f32.mrf.mxu2 }
 0x144   : > { %v1632_v4 = vadd.f32 %v1631_v45, %v3852_v20 }
 0x146   : > { %v1822_v48 = vpop.f32.mrf.mxu3  ;;  %v1837_v12 = vadd.f32 %v1817_v51, %v1632_v4 }
 0x148   : > { %v1902_v40 = vpop.f32.mrf.mxu0  ;;  %v1988_v41 = vpop.f32.mrf.mxu1  ;;  %v1920_v43 = vadd.f32 %v1900_v37, %v1837_v12 }
 0x14a   : > { %v2003_v14 = vadd.f32 %v1983_v28, %v1920_v43 }
 0x14b   : > { %v1633_v58 = vpop.f32.mrf.mxu2 }
 0x14c   : > { %v1634_v6 = vadd.f32 %v1633_v58, %v3875_v21  ;;  %v4018_v21 = vld [vmem:[%s4109_s4] ss:$0 sm:$0xff] }
 0x14e   : > { %v1824_v46 = vpop.f32.mrf.mxu3  ;;  %v1838_v32 = vadd.f32 %v1819_v36, %v1634_v6 }
 0x150   : > { %v1905_v27 = vpop.f32.mrf.mxu0  ;;  %v3979_v50 = vpop.f32.mrf.mxu1  ;;  %v1921_v7 = vadd.f32 %v1902_v40, %v1838_v32 }
 0x152   : > { %v2004_v37 = vadd.f32 %v1985_v44, %v1921_v7 }
 0x153   : > { %v1636_v57 = vpop.f32.mrf.mxu2 }
 0x154   : > { %v1637_v20 = vadd.f32 %v1636_v57, %v3896_v2 }
 0x156   : > { %v3981_v18 = vpop.f32.mrf.mxu3  ;;  %v1839_v45 = vadd.f32 %v1822_v48, %v1637_v20 }
 0x158   : > { %v1907_v53 = vpop.f32.mrf.mxu0  ;;  %v3983_v31 = vpop.f32.mrf.mxu1  ;;  %v1922_v57 = vadd.f32 %v1905_v27, %v1839_v45 }
 0x15a   : > { %v2005_v43 = vadd.f32 %v1988_v41, %v1922_v57 }
 0x15b   : > { %v1638_v25 = vpop.f32.mrf.mxu2 }
 0x15c   : > { %v1639_v2 = vadd.f32 %v1638_v25, %v3917_v26 }
 0x15e   : > { %v3985_v54 = vpop.f32.mrf.mxu3 }
 0x160   : > { %v3987_v22 = vpop.f32.mrf.mxu0  ;;  %v3989_v47 = vpop.f32.mrf.mxu1 }
 0x163   : > { %v1641_v11 = vpop.f32.mrf.mxu2 }
 0x166   : > { %v3991_v61 = vpop.f32.mrf.mxu3 }
 0x168   : > { %v3993_v55 = vpop.f32.mrf.mxu0  ;;  %v3995_v0 = vpop.f32.mrf.mxu1 }
 0x16b   : > { %v3997_v38 = vpop.f32.mrf.mxu2 }
 0x16e   : > { %v3999_v1 = vpop.f32.mrf.mxu3 }
 0x170   : > { %v4001_v39 = vpop.f32.mrf.mxu0  ;;  %v4003_v3 = vpop.f32.mrf.mxu1 }
 0x173   : > { %v4005_v8 = vpop.f32.mrf.mxu2 }
 0x176   : > { %v2260_v9 = vpop.f32.mrf.mxu3 }
 0x178   : > { %v4008_v42 = vpop.f32.mrf.mxu0  ;;  %v2537_v13 = vpop.f32.mrf.mxu1 }
 0x17b   : > { %v4010_v63 = vpop.f32.mrf.mxu2 }
 0x17e   : > { %v2262_v59 = vpop.f32.mrf.mxu3 }
 0x180   : > { %v2343_v16 = vpop.f32.mrf.mxu0  ;;  %v2539_v24 = vpop.f32.mrf.mxu1 }
 0x183   : > { %v2177_v33 = vpop.f32.mrf.mxu2 }
 0x184   : > { %v2197_v56 = vadd.f32 %v2177_v33, %v2003_v14  ;;  %v1642_v33 = vadd.f32 %v1641_v11, %v3933_v62 }
 0x186   : > { %v2280_v29 = vadd.f32 %v2260_v9, %v2197_v56  ;;  %v2265_v28 = vpop.f32.mrf.mxu3  ;;  %v1841_v62 = vadd.f32 %v3981_v18, %v1642_v33 }
 0x188   : > { %v2363_v5 = vadd.f32 %v2343_v16, %v2280_v29  ;;  %v2345_v51 = vpop.f32.mrf.mxu0  ;;  %v2542_v9 = vpop.f32.mrf.mxu1 }
 0x18a   : > { %v2557_v4 = vadd.f32 %v2537_v13, %v2363_v5 }
 0x18b   : > { %v2179_v36 = vpop.f32.mrf.mxu2 }
 0x18c   : > { %v2565_v58 = vadd.f32 %v2557_v4, %v3893_v60  ;;  %v2198_v12 = vadd.f32 %v2179_v36, %v2004_v37  ;;  %v1840_v60 = vadd.f32 %v1824_v46, %v1639_v2 }
 0x18e   : > { %v2577_v48 = vadd.f32 %v4018_v21, %v2565_v58  ;;  %v2281_v40 = vadd.f32 %v2262_v59, %v2198_v12  ;;  %v2267_v32 = vpop.f32.mrf.mxu3  ;;  %v1923_v14 = vadd.f32 %v1907_v53, %v1840_v60 }
 0x190   : > { %2585 = vst.msk [vmem:[%s4025_s14] sm:$0xff] %vm468_vm1, %v2577_v48  ;;  %v2364_v44 = vadd.f32 %v2345_v51, %v2281_v40  ;;  %v2348_v13 = vpop.f32.mrf.mxu0  ;;  %v2616_v56 = vmul.f32 %v2577_v48, %v2577_v48  ;;  %v2593_v20 = vsel %vm468_vm1, %v2577_v48, 0.0  ;;  %v2006_v53 = vadd.f32 %v3979_v50, %v1923_v14 }
 0x191   : > { %v1924_v50 = vadd.f32 %v3987_v22, %v1841_v62 }
 0x192   : > { %v2558_v6 = vadd.f32 %v2539_v24, %v2364_v44  ;;  %v2624_v11 = vsel %vm468_vm1, %v2616_v56, 0.0 }
 0x193   : > { %v2182_v26 = vpop.f32.mrf.mxu2 }
 0x194   : > { %v2566_v25 = vadd.f32 %v2558_v6, %v3909_v35  ;;  %v2199_v16 = vadd.f32 %v2182_v26, %v2005_v43  ;;  %v2544_v35 = vpop.f32.mrf.mxu1  ;;  %v1647_v26 = vadd.f32 %v4005_v8, %v3961_v10 }
 0x196   : > { %v2578_v27 = vadd.f32 %v4018_v21, %v2566_v25  ;;  %v2282_v59 = vadd.f32 %v2265_v28, %v2199_v16  ;;  %v1644_v28 = vadd.f32 %v3997_v38, %v3946_v52  ;;  %v2270_v2 = vpop.f32.mrf.mxu3  ;;  %v2007_v38 = vadd.f32 %v3983_v31, %v1924_v50 }
 0x198   : > { %2586 = vst.msk [vmem:[%s4025_s14 + $0x8] sm:$0xff] %vm468_vm1, %v2578_v27  ;;  %v2594_v46 = vsel %vm468_vm1, %v2578_v27, 0.0  ;;  %v2617_v24 = vmul.f32 %v2578_v27, %v2578_v27  ;;  %v2365_v41 = vadd.f32 %v2348_v13, %v2282_v59  ;;  %v2350_v29 = vpop.f32.mrf.mxu0 }
 0x199   : > { %v2595_v7 = vadd.f32 %v2594_v46, %v2593_v20 }
 0x19a   : > { %v2625_v5 = vsel %vm468_vm1, %v2617_v24, 0.0  ;;  %v2559_v51 = vadd.f32 %v2542_v9, %v2365_v41 }
 0x19b   : > { %v2626_v45 = vadd.f32 %v2625_v5, %v2624_v11  ;;  %v2184_v4 = vpop.f32.mrf.mxu2 }
 0x19c   : > { %v2567_v37 = vadd.f32 %v2559_v51, %v3930_v34  ;;  %v2200_v36 = vadd.f32 %v2184_v4, %v2006_v53  ;;  %v1842_v34 = vadd.f32 %v3985_v54, %v1644_v28  ;;  %v2547_v60 = vpop.f32.mrf.mxu1 }
 0x19e   : > { %v2579_v58 = vadd.f32 %v4018_v21, %v2567_v37  ;;  %v2283_v12 = vadd.f32 %v2267_v32, %v2200_v36  ;;  %v1925_v32 = vadd.f32 %v3993_v55, %v1842_v34  ;;  %v2272_v56 = vpop.f32.mrf.mxu3 }
 0x1a0   : > { %2587 = vst.msk [vmem:[%s4025_s14 + $0x10] sm:$0xff] %vm468_vm1, %v2579_v58  ;;  %v2596_v18 = vsel %vm468_vm1, %v2579_v58, 0.0  ;;  %v2618_v48 = vmul.f32 %v2579_v58, %v2579_v58  ;;  %v2366_v40 = vadd.f32 %v2350_v29, %v2283_v12  ;;  %v2353_v9 = vpop.f32.mrf.mxu0  ;;  %v2008_v10 = vadd.f32 %v3989_v47, %v1925_v32 }
 0x1a1   : > { %v2597_v57 = vadd.f32 %v2596_v18, %v2595_v7  ;;  %v1649_v29 = vadd.f32 %v4010_v63, %v3970_v15 }
 0x1a2   : > { %v2627_v44 = vsel %vm468_vm1, %v2618_v48, 0.0  ;;  %v2560_v52 = vadd.f32 %v2544_v35, %v2366_v40 }
 0x1a3   : > { %v2628_v13 = vadd.f32 %v2627_v44, %v2626_v45  ;;  %v2187_v22 = vpop.f32.mrf.mxu2 }
 0x1a4   : > { %v2568_v6 = vadd.f32 %v2560_v52, %v3943_v49  ;;  %v2201_v43 = vadd.f32 %v2187_v22, %v2007_v38  ;;  %v1843_v49 = vadd.f32 %v3991_v61, %v1647_v26  ;;  %v2549_v41 = vpop.f32.mrf.mxu1 }
 0x1a6   : > { %v2580_v25 = vadd.f32 %v4018_v21, %v2568_v6  ;;  %v2284_v16 = vadd.f32 %v2270_v2, %v2201_v43  ;;  %v1926_v61 = vadd.f32 %v4001_v39, %v1843_v49  ;;  %v2275_v45 = vpop.f32.mrf.mxu3 }
 0x1a8   : > { %2588 = vst.msk [vmem:[%s4025_s14 + $0x18] sm:$0xff] %vm468_vm1, %v2580_v25  ;;  %v2598_v54 = vsel %vm468_vm1, %v2580_v25, 0.0  ;;  %v2619_v14 = vmul.f32 %v2580_v25, %v2580_v25  ;;  %v2367_v31 = vadd.f32 %v2353_v9, %v2284_v16  ;;  %v2355_v20 = vpop.f32.mrf.mxu0  ;;  %v2009_v15 = vadd.f32 %v3995_v0, %v1926_v61 }
 0x1a9   : > { %v2599_v33 = vadd.f32 %v2598_v54, %v2597_v57 }
 0x1aa   : > { %v2629_v27 = vsel %vm468_vm1, %v2619_v14, 0.0  ;;  %v2561_v59 = vadd.f32 %v2547_v60, %v2367_v31 }
 0x1ab   : > { %v2630_v8 = vadd.f32 %v2629_v27, %v2628_v13  ;;  %v2189_v46 = vpop.f32.mrf.mxu2 }
 0x1ac   : > { %v2569_v55 = vadd.f32 %v2561_v59, %v3959_v17  ;;  %v2202_v24 = vadd.f32 %v2189_v46, %v2008_v10  ;;  %v1844_v17 = vadd.f32 %v3999_v1, %v1649_v29  ;;  %v2552_v50 = vpop.f32.mrf.mxu1 }
 0x1ae   : > { %v2581_v7 = vadd.f32 %v4018_v21, %v2569_v55  ;;  %v2285_v35 = vadd.f32 %v2272_v56, %v2202_v24  ;;  %v1927_v12 = vadd.f32 %v4008_v42, %v1844_v17  ;;  %v2277_v42 = vpop.f32.mrf.mxu3 }
 0x1b0   : > { %2589 = vst.msk [vmem:[%s4025_s14 + $0x20] sm:$0xff] %vm468_vm1, %v2581_v7  ;;  %v2600_v53 = vsel %vm468_vm1, %v2581_v7, 0.0  ;;  %v2620_v47 = vmul.f32 %v2581_v7, %v2581_v7  ;;  %v2368_v62 = vadd.f32 %v2355_v20, %v2285_v35  ;;  %v2358_v36 = vpop.f32.mrf.mxu0 }
 0x1b1   : > { %v2601_v11 = vadd.f32 %v2600_v53, %v2599_v33 }
 0x1b2   : > { %v2631_v5 = vsel %vm468_vm1, %v2620_v47, 0.0  ;;  %v2562_v51 = vadd.f32 %v2549_v41, %v2368_v62 }
 0x1b3   : > { %v2632_v63 = vadd.f32 %v2631_v5, %v2630_v8  ;;  %v2192_v4 = vpop.f32.mrf.mxu2 }
 0x1b4   : > { %v2570_v39 = vadd.f32 %v2562_v51, %v3967_v19  ;;  %v2203_v37 = vadd.f32 %v2192_v4, %v2009_v15  ;;  %v2010_v19 = vadd.f32 %v4003_v3, %v1927_v12  ;;  %v2554_v26 = vpop.f32.mrf.mxu1 }
 0x1b6   : > { %v2582_v28 = vadd.f32 %v4018_v21, %v2570_v39  ;;  %v2286_v58 = vadd.f32 %v2275_v45, %v2203_v37 }
 0x1b8   : > { %2590 = vst.msk [vmem:[%s4025_s14 + $0x28] sm:$0xff] %vm468_vm1, %v2582_v28  ;;  %v2602_v1 = vsel %vm468_vm1, %v2582_v28, 0.0  ;;  %v2621_v2 = vmul.f32 %v2582_v28, %v2582_v28  ;;  %v2369_v0 = vadd.f32 %v2358_v36, %v2286_v58  ;;  %v2360_v13 = vpop.f32.mrf.mxu0 }
 0x1b9   : > { %v2603_v18 = vadd.f32 %v2602_v1, %v2601_v11 }
 0x1ba   : > { %v2633_v48 = vsel %vm468_vm1, %v2621_v2, 0.0  ;;  %v2563_v40 = vadd.f32 %v2552_v50, %v2369_v0 }
 0x1bb   : > { %v2634_v57 = vadd.f32 %v2633_v48, %v2632_v63  ;;  %v2194_v9 = vpop.f32.mrf.mxu2 }
 0x1bc   : > { %v2571_v34 = vadd.f32 %v2563_v40, %v3974_v30  ;;  %v2204_v44 = vadd.f32 %v2194_v9, %v2010_v19 }
 0x1be   : > { %v2583_v52 = vadd.f32 %v4018_v21, %v2571_v34  ;;  %v2287_v38 = vadd.f32 %v2277_v42, %v2204_v44 }
 0x1c0   : > { %2591 = vst.msk [vmem:[%s4025_s14 + $0x30] sm:$0xff] %vm468_vm1, %v2583_v52  ;;  %v2604_v60 = vsel %vm468_vm1, %v2583_v52, 0.0  ;;  %v2622_v22 = vmul.f32 %v2583_v52, %v2583_v52  ;;  %v2370_v6 = vadd.f32 %v2360_v13, %v2287_v38 }
 0x1c1   : > { %v2605_v43 = vadd.f32 %v2604_v60, %v2603_v18 }
 0x1c2   : > { %v2635_v3 = vsel %vm468_vm1, %v2622_v22, 0.0  ;;  %v2564_v25 = vadd.f32 %v2554_v26, %v2370_v6 }
 0x1c3   : > { %v2636_v16 = vadd.f32 %v2635_v3, %v2634_v57 }
 0x1c4   : > { %v2572_v30 = vadd.f32 %v2564_v25, %v3977_v23 }
 0x1c6   : > { %v2584_v32 = vadd.f32 %v4018_v21, %v2572_v30 }
 0x1c8   : > { %2592 = vst.msk [vmem:[%s4025_s14 + $0x38] sm:$0xff] %vm468_vm1, %v2584_v32  ;;  %v2606_v54 = vsel %vm468_vm1, %v2584_v32, 0.0  ;;  %v2623_v14 = vmul.f32 %v2584_v32, %v2584_v32 }
 0x1c9   : > { %v2607_v31 = vadd.f32 %v2606_v54, %v2605_v43 }
 0x1ca   : > { %v2637_v33 = vsel %vm468_vm1, %v2623_v14, 0.0 }
 0x1cb   : > { %v2608_v56 = vrot.slane %v2607_v31, 4  ;;  %v2638_v49 = vadd.f32 %v2637_v33, %v2636_v16 }
 0x1cd   : > { %v2609_v27 = vadd.f32 %v2608_v56, %v2607_v31  ;;  %v2639_v59 = vrot.slane %v2638_v49, 4 }
 0x1cf   : > { %v2610_v10 = vrot.slane %v2609_v27, 2  ;;  %v2640_v8 = vadd.f32 %v2639_v59, %v2638_v49 }
 0x1d1   : > { %v2611_v20 = vadd.f32 %v2610_v10, %v2609_v27  ;;  %v2641_v23 = vrot.slane %v2640_v8, 2 }
 0x1d3   : > { %v2612_v46 = vrot.slane %v2611_v20, 1  ;;  %v2642_v21 = vadd.f32 %v2641_v23, %v2640_v8 }
 0x1d5   : > { %v2613_v55 = vadd.f32 %v2612_v46, %v2611_v20  ;;  %v2643_v24 = vrot.slane %v2642_v21, 1 }
 0x1d7   : > { %2615 = vst.msk [vmem:[%s317_s17] sm:$0x1] %vm2614_vm10, %v2613_v55  ;;  %v2644_v41 = vadd.f32 %v2643_v24, %v2642_v21 }
 0x1d9   : > { %2645 = vst.msk [vmem:[%s320_s20] sm:$0x1] %vm2614_vm10, %v2644_v41 }
 0x1da PF: > { %s18_s24 = sadd.s32 1, %s3223_s24  }
 0x1db   : > { %p15_p5 = scmp.ge.s32.totalorder %s18_s24, 4  }
 0x1dd   :  { %17 = sbr.rel (!%p15_p5) target bundleno = 1 (0x1), region = 120 }

</bundles_post_ra>
